<compile_context>
chip_gen: v6e
topology: v6e:2x2x1
jax: 0.10.0
libtpu: 0.0.40
codegen_flags: <defaults>
</compile_context>

<pallas_src>
import functools

import jax
import jax.numpy as jnp
from jax.experimental import pallas as pl
from jax.experimental.pallas import tpu as pltpu

LANE = 128  # TPU lane width: all feature dims are zero-padded to this.

_VMEM = pl.BlockSpec(memory_space=pltpu.MemorySpace.VMEM)
_SMEM = pl.BlockSpec(memory_space=pltpu.MemorySpace.SMEM)


# -----------------------------------------------------------------------------
# Fused kernel: all GIN conv blocks + head in one invocation (feature-major).
# Shapes inside the kernel:
#   adjT_ref : [N, N]    bf16   (adj transposed; 0/1 exact in bf16)
#   xT_ref   : [128, N]  f32    (features on sublanes, nodes on lanes)
#   w*Ts_ref : [L+1, 128, 128] bf16 (pre-transposed weights)
#   b*/bn_*  : [L+1, 128, 1]   f32  (per-sublane broadcasts)
# -----------------------------------------------------------------------------
def _fused_gin_kernel(eps_ref, adjT_ref, xT_ref,
                      w1Ts_ref, b1s_ref, w2Ts_ref, b2s_ref,
                      bn_scale_ref, bn_shift_ref,
                      hw1T_ref, hb1_ref, hw2T_ref, hb2_ref, out_ref):
    h = xT_ref[...]                              # [128, N] f32

    num_blocks = w1Ts_ref.shape[0]               # static -> unrolled at trace time
    for l in range(num_blocks):
        # GIN aggregation (transposed): aggT = hT @ adjT  == (adj @ h)^T.
        # adjT is read straight from its input window (no hoisted NxN copy).
        agg = jnp.dot(h.astype(jnp.bfloat16), adjT_ref[...],
                      preferred_element_type=jnp.float32)
        h = (1.0 + eps_ref[l]) * h + agg
        # MLP = Linear -> ReLU -> Linear   (output lanes = N, wide MXU outputs)
        h = jnp.dot(w1Ts_ref[l], h.astype(jnp.bfloat16),
                    preferred_element_type=jnp.float32) + b1s_ref[l]
        h = jnp.maximum(h, 0.0)
        h = jnp.dot(w2Ts_ref[l], h.astype(jnp.bfloat16),
                    preferred_element_type=jnp.float32) + b2s_ref[l]
        # outer F.relu
        h = jnp.maximum(h, 0.0)
        # BatchNorm1d (inference), pre-folded to an affine in the wrapper.
        h = h * bn_scale_ref[l] + bn_shift_ref[l]

    # Head: relu(lin1) -> dropout (identity in eval) -> lin2 -> log_softmax.
    h = jnp.dot(hw1T_ref[...], h.astype(jnp.bfloat16),
                preferred_element_type=jnp.float32) + hb1_ref[...]
    h = jnp.maximum(h, 0.0)
    # hb2's padded rows (>= num_class) were set to -1e30 at pack time, so the
    # padded logits are automatically masked out of the softmax (no iota/where).
    logits = jnp.dot(hw2T_ref[...], h.astype(jnp.bfloat16),
                     preferred_element_type=jnp.float32) + hb2_ref[...]

    m = jnp.max(logits, axis=0, keepdims=True)       # sublane (class) reduction
    z = logits - m
    lse = jnp.log(jnp.sum(jnp.exp(z), axis=0, keepdims=True))
    out_ref[...] = z - lse


# -----------------------------------------------------------------------------
# Wrapper: pad / stack / transpose / fold params once, then a single pallas_call
# -----------------------------------------------------------------------------
def _pad_to(a, shape):
    return jnp.pad(a, [(0, t - s) for s, t in zip(a.shape, shape)])


def pack_adj(adj):
    """One-time adjacency prep: transpose for the feature-major layout and cast
    to bf16 (exact for 0/1 entries).  Done at pack time so no per-call f32->bf16
    round trip of the N^2 array."""
    return jnp.asarray(adj.T, jnp.bfloat16)


def pack_params(params):
    """Transpose + pad feature dims to 128, stack per-layer weights, fold BN,
    cast matmul operands to bf16, and bake the class mask into lin2's bias."""
    blocks = [params["first"]] + list(params["layers"])
    w1Ts = jnp.stack([_pad_to(b["w1"].T, (LANE, LANE)) for b in blocks]).astype(jnp.bfloat16)
    w2Ts = jnp.stack([_pad_to(b["w2"].T, (LANE, LANE)) for b in blocks]).astype(jnp.bfloat16)
    b1s = jnp.stack([_pad_to(b["b1"].T, (LANE, 1)) for b in blocks])
    b2s = jnp.stack([_pad_to(b["b2"].T, (LANE, 1)) for b in blocks])
    scales = [b["gamma"] * jax.lax.rsqrt(b["var"] + 1e-5) for b in blocks]
    shifts = [b["beta"] - b["mean"] * s for b, s in zip(blocks, scales)]
    bn_scale = jnp.stack([_pad_to(s.T, (LANE, 1)) for s in scales])
    bn_shift = jnp.stack([_pad_to(s.T, (LANE, 1)) for s in shifts])
    eps = jnp.concatenate([b["eps"] for b in blocks])            # [L+1] -> SMEM

    hp = params["head"]
    num_class = hp["b2"].shape[1]
    hb2 = _pad_to(hp["b2"].T, (LANE, 1))
    # Baked class mask: padded logit rows == their bias (hw2T pad cols are 0),
    # so a -1e30 bias removes them from the softmax for free.  Keep f32.
    row = jnp.arange(LANE)[:, None]
    hb2 = jnp.where(row < num_class, hb2, jnp.float32(-1e30))

    return {
        "eps": eps, "w1Ts": w1Ts, "b1s": b1s, "w2Ts": w2Ts, "b2s": b2s,
        "bn_scale": bn_scale, "bn_shift": bn_shift,
        "hw1T": _pad_to(hp["w1"].T, (LANE, LANE)).astype(jnp.bfloat16),
        "hb1": _pad_to(hp["b1"].T, (LANE, 1)),
        "hw2T": _pad_to(hp["w2"].T, (LANE, LANE)).astype(jnp.bfloat16),
        "hb2": hb2,
    }


def _vmem_limit_bytes(n, num_blocks):
    adj_bytes = 2 * n * n                              # resident bf16 adjacency
    act_bytes = 8 * LANE * n * 4                       # h / agg / temporaries (f32)
    w_bytes = (2 * num_blocks + 2) * LANE * LANE * 2   # bf16 weight slabs
    vec_bytes = (4 * num_blocks + 2) * LANE * LANE * 4 # lane-padded bias/BN vectors
    need = adj_bytes + act_bytes + w_bytes + vec_bytes
    # Floor at the 32 MiB default, cap at 64 MiB (v7x per-core physical VMEM).
    return int(min(64 << 20, max(32 << 20, 2 * need)))


def _cost_estimate(n, num_blocks):
    mm_agg = 2 * LANE * n * n                          # hT[128,n] @ adjT[n,n]
    mm_mlp = 2 * LANE * LANE * n                       # [128,128] @ [128,n]
    flops = num_blocks * (mm_agg + 2 * mm_mlp) + 2 * mm_mlp
    transcendentals = LANE * n                         # exp in log_softmax
    bytes_accessed = (2 * n * n                        # adjT bf16
                      + 2 * LANE * n * 4               # xT in + out f32
                      + (2 * num_blocks + 2) * LANE * LANE * 2
                      + (4 * num_blocks + 2) * LANE * 4)
    return pl.CostEstimate(flops=flops, transcendentals=transcendentals,
                           bytes_accessed=bytes_accessed)


@functools.partial(jax.jit, static_argnames=("num_class",))
def gin_forward(x, adjT_bf16, packed, *, num_class):
    n = x.shape[0]
    num_blocks = packed["w1Ts"].shape[0]
    xT = _pad_to(x.T, (LANE, n))                       # [128, N] f32, zero-padded rows
    outT = pl.pallas_call(
        _fused_gin_kernel,
        out_shape=jax.ShapeDtypeStruct((LANE, n), jnp.float32),
        in_specs=[_SMEM] + [_VMEM] * 12,
        out_specs=_VMEM,
        compiler_params=pltpu.CompilerParams(
            vmem_limit_bytes=_vmem_limit_bytes(n, num_blocks)),
        cost_estimate=_cost_estimate(n, num_blocks),
    )(packed["eps"], adjT_bf16, xT,
      packed["w1Ts"], packed["b1s"], packed["w2Ts"], packed["b2s"],
      packed["bn_scale"], packed["bn_shift"],
      packed["hw1T"], packed["hb1"], packed["hw2T"], packed["hb2"])
    return outT[:num_class, :].T


# -----------------------------------------------------------------------------
# Pure-JAX reference (node-major; mirrors the kernel's bf16-operand / f32-acc policy)
# -----------------------------------------------------------------------------
def ref_forward(x, adj, params):
    def mm(a, b):
        return jnp.dot(a.astype(jnp.bfloat16), b.astype(jnp.bfloat16),
                       preferred_element_type=jnp.float32)

    def layer(h, p):
        agg = mm(adj, h)
        h = (1.0 + p["eps"][0]) * h + agg
        h = jnp.maximum(mm(h, p["w1"]) + p["b1"], 0.0)
        h = jnp.maximum(mm(h, p["w2"]) + p["b2"], 0.0)
        scale = p["gamma"] * jax.lax.rsqrt(p["var"] + 1e-5)
        shift = p["beta"] - p["mean"] * scale
        return h * scale + shift

    h = layer(x, params["first"])
    for p in params["layers"]:
        h = layer(h, p)
    hp = params["head"]
    h = jnp.maximum(mm(h, hp["w1"]) + hp["b1"], 0.0)
    logits = mm(h, hp["w2"]) + hp["b2"]
    return jax.nn.log_softmax(logits, axis=-1)


# -----------------------------------------------------------------------------
# Deterministic parameter / graph construction (shapes from GIN.__init__)
# -----------------------------------------------------------------------------
def make_params(key, num_node_features, hidden, num_class, num_layers, eps=0.0):
    def lin(k, fin, fout):
        kw, kb = jax.random.split(k)
        scale = 1.0 / jnp.sqrt(fin)
        return (jax.random.uniform(kw, (fin, fout), jnp.float32, -scale, scale),
                jax.random.uniform(kb, (1, fout), jnp.float32, -scale, scale))

    def gin_block(k, fin, fout):
        k1, k2 = jax.random.split(k)
        w1, b1 = lin(k1, fin, fout)
        w2, b2 = lin(k2, fout, fout)
        return {
            "eps": jnp.array([eps], jnp.float32),
            "w1": w1, "b1": b1, "w2": w2, "b2": b2,
            # BatchNorm1d default init / running stats
            "gamma": jnp.ones((1, fout), jnp.float32),
            "beta": jnp.zeros((1, fout), jnp.float32),
            "mean": jnp.zeros((1, fout), jnp.float32),
            "var": jnp.ones((1, fout), jnp.float32),
        }

    keys = jax.random.split(key, num_layers + 3)
    params = {"first": gin_block(keys[0], num_node_features, hidden)}
    params["layers"] = [gin_block(keys[1 + i], hidden, hidden) for i in range(num_layers)]
    w1, b1 = lin(keys[num_layers + 1], hidden, hidden)
    w2, b2 = lin(keys[num_layers + 2], hidden, num_class)
    params["head"] = {"w1": w1, "b1": b1, "w2": w2, "b2": b2}
    return params


def make_graph(key, num_nodes, num_node_features):
    kx, ke = jax.random.split(key)
    x = jax.random.normal(kx, (num_nodes, num_node_features), jnp.float32)
    # Deterministic ring graph (both directions) plus a few random extra edges,
    # densified into adj[dst, src].
    idx = jnp.arange(num_nodes)
    adj = jnp.zeros((num_nodes, num_nodes), jnp.float32)
    adj = adj.at[idx, (idx + 1) % num_nodes].set(1.0)
    adj = adj.at[(idx + 1) % num_nodes, idx].set(1.0)
    extra_src = jax.random.randint(ke, (num_nodes // 2,), 0, num_nodes)
    extra_dst = (extra_src + num_nodes // 3 + 1) % num_nodes
    adj = adj.at[extra_dst, extra_src].set(1.0)
    return x, adj


if __name__ == "__main__":
    # Small shapes consistent with the module's defaults (scaled down):
    #   nodes N = 16, num_node_features = 32, hidden = 16, num_class = 18, num_layers = 2
    N, F_IN, HIDDEN, NUM_CLASS, NUM_LAYERS = 16, 32, 16, 18, 2
    assert max(F_IN, HIDDEN, NUM_CLASS) <= LANE

    key = jax.random.PRNGKey(0)
    k_graph, k_params = jax.random.split(key)
    x, adj = make_graph(k_graph, N, F_IN)
    params = make_params(k_params, F_IN, HIDDEN, NUM_CLASS, NUM_LAYERS, eps=0.0)
    packed = pack_params(params)
    adjT_bf16 = pack_adj(adj)          # one-time bf16 cast + transpose (not per call)

    out = gin_forward(x, adjT_bf16, packed, num_class=NUM_CLASS)
    out = jax.block_until_ready(out)

    expected = ref_forward(x, adj, params)
    assert out.shape == (N, NUM_CLASS), out.shape
    assert jnp.allclose(out, expected, atol=2e-4, rtol=2e-4), "mismatch vs JAX reference"
    # log_softmax rows should sum to ~1 after exp
    assert jnp.allclose(jnp.sum(jnp.exp(out), axis=-1), 1.0, atol=1e-4)

    print("KERNEL_OK")
</pallas_src>

<mosaic_0001>
module attributes {stable_mosaic.version = 11 : i64} {
  func.func @_fused_gin_kernel(%arg0: memref<3xf32, #tpu.memory_space<smem>>, %arg1: memref<16x16xbf16, #tpu.memory_space<vmem>>, %arg2: memref<128x16xf32, #tpu.memory_space<vmem>>, %arg3: memref<3x128x128xbf16, #tpu.memory_space<vmem>>, %arg4: memref<3x128x1xf32, #tpu.memory_space<vmem>>, %arg5: memref<3x128x128xbf16, #tpu.memory_space<vmem>>, %arg6: memref<3x128x1xf32, #tpu.memory_space<vmem>>, %arg7: memref<3x128x1xf32, #tpu.memory_space<vmem>>, %arg8: memref<3x128x1xf32, #tpu.memory_space<vmem>>, %arg9: memref<128x128xbf16, #tpu.memory_space<vmem>>, %arg10: memref<128x1xf32, #tpu.memory_space<vmem>>, %arg11: memref<128x128xbf16, #tpu.memory_space<vmem>>, %arg12: memref<128x1xf32, #tpu.memory_space<vmem>>, %arg13: memref<128x16xf32, #tpu.memory_space<vmem>>) attributes {dimension_semantics = [], scalar_prefetch = 0 : i64, scratch_operands = 0 : i64, tpu.core_type = #tpu.core_type<tc>} {
    %c0 = arith.constant 0 : index
    %c0_0 = arith.constant 0 : index
    %0 = vector.load %arg2[%c0, %c0_0] : memref<128x16xf32, #tpu.memory_space<vmem>>, vector<128x16xf32>
    %1 = arith.truncf %0 : vector<128x16xf32> to vector<128x16xbf16>
    %c0_1 = arith.constant 0 : index
    %c0_2 = arith.constant 0 : index
    %2 = vector.load %arg1[%c0_1, %c0_2] : memref<16x16xbf16, #tpu.memory_space<vmem>>, vector<16x16xbf16>
    %cst = arith.constant dense<0.000000e+00> : vector<128x16xf32>
    %3 = tpu.matmul %1, %2, %cst {dimension_numbers = #tpu.dot_dimension_numbers<[1], [0], [0], [1], [0, 0, 1, 1], [], []>} : vector<128x16xbf16>, vector<16x16xbf16>, vector<128x16xf32> -> vector<128x16xf32>
    %c0_3 = arith.constant 0 : index
    %4 = memref.load %arg0[%c0_3] : memref<3xf32, #tpu.memory_space<smem>>
    %cst_4 = arith.constant 1.000000e+00 : f32
    %5 = arith.addf %cst_4, %4 : f32
    %6 = vector.broadcast %5 : f32 to vector<128x16xf32>
    %7 = arith.mulf %6, %0 : vector<128x16xf32>
    %8 = arith.addf %7, %3 : vector<128x16xf32>
    %c0_5 = arith.constant 0 : index
    %c0_6 = arith.constant 0 : index
    %c0_7 = arith.constant 0 : index
    %9 = vector.load %arg3[%c0_5, %c0_6, %c0_7] : memref<3x128x128xbf16, #tpu.memory_space<vmem>>, vector<1x128x128xbf16>
    %10 = vector.shape_cast %9 : vector<1x128x128xbf16> to vector<128x128xbf16>
    %11 = arith.truncf %8 : vector<128x16xf32> to vector<128x16xbf16>
    %cst_8 = arith.constant dense<0.000000e+00> : vector<128x16xf32>
    %12 = tpu.matmul %10, %11, %cst_8 {dimension_numbers = #tpu.dot_dimension_numbers<[1], [0], [0], [1], [0, 0, 1, 1], [], []>} : vector<128x128xbf16>, vector<128x16xbf16>, vector<128x16xf32> -> vector<128x16xf32>
    %c0_9 = arith.constant 0 : index
    %c0_10 = arith.constant 0 : index
    %c0_11 = arith.constant 0 : index
    %13 = vector.load %arg4[%c0_9, %c0_10, %c0_11] : memref<3x128x1xf32, #tpu.memory_space<vmem>>, vector<1x128x1xf32>
    %14 = vector.shape_cast %13 : vector<1x128x1xf32> to vector<128x1xf32>
    %15 = vector.broadcast %14 : vector<128x1xf32> to vector<128x16xf32>
    %16 = arith.addf %12, %15 : vector<128x16xf32>
    %cst_12 = arith.constant 0.000000e+00 : f32
    %17 = vector.broadcast %cst_12 : f32 to vector<128x16xf32>
    %18 = arith.maximumf %16, %17 : vector<128x16xf32>
    %c0_13 = arith.constant 0 : index
    %c0_14 = arith.constant 0 : index
    %c0_15 = arith.constant 0 : index
    %19 = vector.load %arg5[%c0_13, %c0_14, %c0_15] : memref<3x128x128xbf16, #tpu.memory_space<vmem>>, vector<1x128x128xbf16>
    %20 = vector.shape_cast %19 : vector<1x128x128xbf16> to vector<128x128xbf16>
    %21 = arith.truncf %18 : vector<128x16xf32> to vector<128x16xbf16>
    %cst_16 = arith.constant dense<0.000000e+00> : vector<128x16xf32>
    %22 = tpu.matmul %20, %21, %cst_16 {dimension_numbers = #tpu.dot_dimension_numbers<[1], [0], [0], [1], [0, 0, 1, 1], [], []>} : vector<128x128xbf16>, vector<128x16xbf16>, vector<128x16xf32> -> vector<128x16xf32>
    %c0_17 = arith.constant 0 : index
    %c0_18 = arith.constant 0 : index
    %c0_19 = arith.constant 0 : index
    %23 = vector.load %arg6[%c0_17, %c0_18, %c0_19] : memref<3x128x1xf32, #tpu.memory_space<vmem>>, vector<1x128x1xf32>
    %24 = vector.shape_cast %23 : vector<1x128x1xf32> to vector<128x1xf32>
    %25 = vector.broadcast %24 : vector<128x1xf32> to vector<128x16xf32>
    %26 = arith.addf %22, %25 : vector<128x16xf32>
    %cst_20 = arith.constant 0.000000e+00 : f32
    %27 = vector.broadcast %cst_20 : f32 to vector<128x16xf32>
    %28 = arith.maximumf %26, %27 : vector<128x16xf32>
    %c0_21 = arith.constant 0 : index
    %c0_22 = arith.constant 0 : index
    %c0_23 = arith.constant 0 : index
    %29 = vector.load %arg7[%c0_21, %c0_22, %c0_23] : memref<3x128x1xf32, #tpu.memory_space<vmem>>, vector<1x128x1xf32>
    %30 = vector.shape_cast %29 : vector<1x128x1xf32> to vector<128x1xf32>
    %31 = vector.broadcast %30 : vector<128x1xf32> to vector<128x16xf32>
    %32 = arith.mulf %28, %31 : vector<128x16xf32>
    %c0_24 = arith.constant 0 : index
    %c0_25 = arith.constant 0 : index
    %c0_26 = arith.constant 0 : index
    %33 = vector.load %arg8[%c0_24, %c0_25, %c0_26] : memref<3x128x1xf32, #tpu.memory_space<vmem>>, vector<1x128x1xf32>
    %34 = vector.shape_cast %33 : vector<1x128x1xf32> to vector<128x1xf32>
    %35 = vector.broadcast %34 : vector<128x1xf32> to vector<128x16xf32>
    %36 = arith.addf %32, %35 : vector<128x16xf32>
    %37 = arith.truncf %36 : vector<128x16xf32> to vector<128x16xbf16>
    %c0_27 = arith.constant 0 : index
    %c0_28 = arith.constant 0 : index
    %38 = vector.load %arg1[%c0_27, %c0_28] : memref<16x16xbf16, #tpu.memory_space<vmem>>, vector<16x16xbf16>
    %cst_29 = arith.constant dense<0.000000e+00> : vector<128x16xf32>
    %39 = tpu.matmul %37, %38, %cst_29 {dimension_numbers = #tpu.dot_dimension_numbers<[1], [0], [0], [1], [0, 0, 1, 1], [], []>} : vector<128x16xbf16>, vector<16x16xbf16>, vector<128x16xf32> -> vector<128x16xf32>
    %c1 = arith.constant 1 : index
    %40 = memref.load %arg0[%c1] : memref<3xf32, #tpu.memory_space<smem>>
    %cst_30 = arith.constant 1.000000e+00 : f32
    %41 = arith.addf %cst_30, %40 : f32
    %42 = vector.broadcast %41 : f32 to vector<128x16xf32>
    %43 = arith.mulf %42, %36 : vector<128x16xf32>
    %44 = arith.addf %43, %39 : vector<128x16xf32>
    %c1_31 = arith.constant 1 : index
    %c0_32 = arith.constant 0 : index
    %c0_33 = arith.constant 0 : index
    %45 = vector.load %arg3[%c1_31, %c0_32, %c0_33] : memref<3x128x128xbf16, #tpu.memory_space<vmem>>, vector<1x128x128xbf16>
    %46 = vector.shape_cast %45 : vector<1x128x128xbf16> to vector<128x128xbf16>
    %47 = arith.truncf %44 : vector<128x16xf32> to vector<128x16xbf16>
    %cst_34 = arith.constant dense<0.000000e+00> : vector<128x16xf32>
    %48 = tpu.matmul %46, %47, %cst_34 {dimension_numbers = #tpu.dot_dimension_numbers<[1], [0], [0], [1], [0, 0, 1, 1], [], []>} : vector<128x128xbf16>, vector<128x16xbf16>, vector<128x16xf32> -> vector<128x16xf32>
    %c1_35 = arith.constant 1 : index
    %c0_36 = arith.constant 0 : index
    %c0_37 = arith.constant 0 : index
    %49 = vector.load %arg4[%c1_35, %c0_36, %c0_37] : memref<3x128x1xf32, #tpu.memory_space<vmem>>, vector<1x128x1xf32>
    %50 = vector.shape_cast %49 : vector<1x128x1xf32> to vector<128x1xf32>
    %51 = vector.broadcast %50 : vector<128x1xf32> to vector<128x16xf32>
    %52 = arith.addf %48, %51 : vector<128x16xf32>
    %cst_38 = arith.constant 0.000000e+00 : f32
    %53 = vector.broadcast %cst_38 : f32 to vector<128x16xf32>
    %54 = arith.maximumf %52, %53 : vector<128x16xf32>
    %c1_39 = arith.constant 1 : index
    %c0_40 = arith.constant 0 : index
    %c0_41 = arith.constant 0 : index
    %55 = vector.load %arg5[%c1_39, %c0_40, %c0_41] : memref<3x128x128xbf16, #tpu.memory_space<vmem>>, vector<1x128x128xbf16>
    %56 = vector.shape_cast %55 : vector<1x128x128xbf16> to vector<128x128xbf16>
    %57 = arith.truncf %54 : vector<128x16xf32> to vector<128x16xbf16>
    %cst_42 = arith.constant dense<0.000000e+00> : vector<128x16xf32>
    %58 = tpu.matmul %56, %57, %cst_42 {dimension_numbers = #tpu.dot_dimension_numbers<[1], [0], [0], [1], [0, 0, 1, 1], [], []>} : vector<128x128xbf16>, vector<128x16xbf16>, vector<128x16xf32> -> vector<128x16xf32>
    %c1_43 = arith.constant 1 : index
    %c0_44 = arith.constant 0 : index
    %c0_45 = arith.constant 0 : index
    %59 = vector.load %arg6[%c1_43, %c0_44, %c0_45] : memref<3x128x1xf32, #tpu.memory_space<vmem>>, vector<1x128x1xf32>
    %60 = vector.shape_cast %59 : vector<1x128x1xf32> to vector<128x1xf32>
    %61 = vector.broadcast %60 : vector<128x1xf32> to vector<128x16xf32>
    %62 = arith.addf %58, %61 : vector<128x16xf32>
    %cst_46 = arith.constant 0.000000e+00 : f32
    %63 = vector.broadcast %cst_46 : f32 to vector<128x16xf32>
    %64 = arith.maximumf %62, %63 : vector<128x16xf32>
    %c1_47 = arith.constant 1 : index
    %c0_48 = arith.constant 0 : index
    %c0_49 = arith.constant 0 : index
    %65 = vector.load %arg7[%c1_47, %c0_48, %c0_49] : memref<3x128x1xf32, #tpu.memory_space<vmem>>, vector<1x128x1xf32>
    %66 = vector.shape_cast %65 : vector<1x128x1xf32> to vector<128x1xf32>
    %67 = vector.broadcast %66 : vector<128x1xf32> to vector<128x16xf32>
    %68 = arith.mulf %64, %67 : vector<128x16xf32>
    %c1_50 = arith.constant 1 : index
    %c0_51 = arith.constant 0 : index
    %c0_52 = arith.constant 0 : index
    %69 = vector.load %arg8[%c1_50, %c0_51, %c0_52] : memref<3x128x1xf32, #tpu.memory_space<vmem>>, vector<1x128x1xf32>
    %70 = vector.shape_cast %69 : vector<1x128x1xf32> to vector<128x1xf32>
    %71 = vector.broadcast %70 : vector<128x1xf32> to vector<128x16xf32>
    %72 = arith.addf %68, %71 : vector<128x16xf32>
    %73 = arith.truncf %72 : vector<128x16xf32> to vector<128x16xbf16>
    %c0_53 = arith.constant 0 : index
    %c0_54 = arith.constant 0 : index
    %74 = vector.load %arg1[%c0_53, %c0_54] : memref<16x16xbf16, #tpu.memory_space<vmem>>, vector<16x16xbf16>
    %cst_55 = arith.constant dense<0.000000e+00> : vector<128x16xf32>
    %75 = tpu.matmul %73, %74, %cst_55 {dimension_numbers = #tpu.dot_dimension_numbers<[1], [0], [0], [1], [0, 0, 1, 1], [], []>} : vector<128x16xbf16>, vector<16x16xbf16>, vector<128x16xf32> -> vector<128x16xf32>
    %c2 = arith.constant 2 : index
    %76 = memref.load %arg0[%c2] : memref<3xf32, #tpu.memory_space<smem>>
    %cst_56 = arith.constant 1.000000e+00 : f32
    %77 = arith.addf %cst_56, %76 : f32
    %78 = vector.broadcast %77 : f32 to vector<128x16xf32>
    %79 = arith.mulf %78, %72 : vector<128x16xf32>
    %80 = arith.addf %79, %75 : vector<128x16xf32>
    %c2_57 = arith.constant 2 : index
    %c0_58 = arith.constant 0 : index
    %c0_59 = arith.constant 0 : index
    %81 = vector.load %arg3[%c2_57, %c0_58, %c0_59] : memref<3x128x128xbf16, #tpu.memory_space<vmem>>, vector<1x128x128xbf16>
    %82 = vector.shape_cast %81 : vector<1x128x128xbf16> to vector<128x128xbf16>
    %83 = arith.truncf %80 : vector<128x16xf32> to vector<128x16xbf16>
    %cst_60 = arith.constant dense<0.000000e+00> : vector<128x16xf32>
    %84 = tpu.matmul %82, %83, %cst_60 {dimension_numbers = #tpu.dot_dimension_numbers<[1], [0], [0], [1], [0, 0, 1, 1], [], []>} : vector<128x128xbf16>, vector<128x16xbf16>, vector<128x16xf32> -> vector<128x16xf32>
    %c2_61 = arith.constant 2 : index
    %c0_62 = arith.constant 0 : index
    %c0_63 = arith.constant 0 : index
    %85 = vector.load %arg4[%c2_61, %c0_62, %c0_63] : memref<3x128x1xf32, #tpu.memory_space<vmem>>, vector<1x128x1xf32>
    %86 = vector.shape_cast %85 : vector<1x128x1xf32> to vector<128x1xf32>
    %87 = vector.broadcast %86 : vector<128x1xf32> to vector<128x16xf32>
    %88 = arith.addf %84, %87 : vector<128x16xf32>
    %cst_64 = arith.constant 0.000000e+00 : f32
    %89 = vector.broadcast %cst_64 : f32 to vector<128x16xf32>
    %90 = arith.maximumf %88, %89 : vector<128x16xf32>
    %c2_65 = arith.constant 2 : index
    %c0_66 = arith.constant 0 : index
    %c0_67 = arith.constant 0 : index
    %91 = vector.load %arg5[%c2_65, %c0_66, %c0_67] : memref<3x128x128xbf16, #tpu.memory_space<vmem>>, vector<1x128x128xbf16>
    %92 = vector.shape_cast %91 : vector<1x128x128xbf16> to vector<128x128xbf16>
    %93 = arith.truncf %90 : vector<128x16xf32> to vector<128x16xbf16>
    %cst_68 = arith.constant dense<0.000000e+00> : vector<128x16xf32>
    %94 = tpu.matmul %92, %93, %cst_68 {dimension_numbers = #tpu.dot_dimension_numbers<[1], [0], [0], [1], [0, 0, 1, 1], [], []>} : vector<128x128xbf16>, vector<128x16xbf16>, vector<128x16xf32> -> vector<128x16xf32>
    %c2_69 = arith.constant 2 : index
    %c0_70 = arith.constant 0 : index
    %c0_71 = arith.constant 0 : index
    %95 = vector.load %arg6[%c2_69, %c0_70, %c0_71] : memref<3x128x1xf32, #tpu.memory_space<vmem>>, vector<1x128x1xf32>
    %96 = vector.shape_cast %95 : vector<1x128x1xf32> to vector<128x1xf32>
    %97 = vector.broadcast %96 : vector<128x1xf32> to vector<128x16xf32>
    %98 = arith.addf %94, %97 : vector<128x16xf32>
    %cst_72 = arith.constant 0.000000e+00 : f32
    %99 = vector.broadcast %cst_72 : f32 to vector<128x16xf32>
    %100 = arith.maximumf %98, %99 : vector<128x16xf32>
    %c2_73 = arith.constant 2 : index
    %c0_74 = arith.constant 0 : index
    %c0_75 = arith.constant 0 : index
    %101 = vector.load %arg7[%c2_73, %c0_74, %c0_75] : memref<3x128x1xf32, #tpu.memory_space<vmem>>, vector<1x128x1xf32>
    %102 = vector.shape_cast %101 : vector<1x128x1xf32> to vector<128x1xf32>
    %103 = vector.broadcast %102 : vector<128x1xf32> to vector<128x16xf32>
    %104 = arith.mulf %100, %103 : vector<128x16xf32>
    %c2_76 = arith.constant 2 : index
    %c0_77 = arith.constant 0 : index
    %c0_78 = arith.constant 0 : index
    %105 = vector.load %arg8[%c2_76, %c0_77, %c0_78] : memref<3x128x1xf32, #tpu.memory_space<vmem>>, vector<1x128x1xf32>
    %106 = vector.shape_cast %105 : vector<1x128x1xf32> to vector<128x1xf32>
    %107 = vector.broadcast %106 : vector<128x1xf32> to vector<128x16xf32>
    %108 = arith.addf %104, %107 : vector<128x16xf32>
    %c0_79 = arith.constant 0 : index
    %c0_80 = arith.constant 0 : index
    %109 = vector.load %arg9[%c0_79, %c0_80] : memref<128x128xbf16, #tpu.memory_space<vmem>>, vector<128x128xbf16>
    %110 = arith.truncf %108 : vector<128x16xf32> to vector<128x16xbf16>
    %cst_81 = arith.constant dense<0.000000e+00> : vector<128x16xf32>
    %111 = tpu.matmul %109, %110, %cst_81 {dimension_numbers = #tpu.dot_dimension_numbers<[1], [0], [0], [1], [0, 0, 1, 1], [], []>} : vector<128x128xbf16>, vector<128x16xbf16>, vector<128x16xf32> -> vector<128x16xf32>
    %c0_82 = arith.constant 0 : index
    %c0_83 = arith.constant 0 : index
    %112 = vector.load %arg10[%c0_82, %c0_83] : memref<128x1xf32, #tpu.memory_space<vmem>>, vector<128x1xf32>
    %113 = vector.broadcast %112 : vector<128x1xf32> to vector<128x16xf32>
    %114 = arith.addf %111, %113 : vector<128x16xf32>
    %cst_84 = arith.constant 0.000000e+00 : f32
    %115 = vector.broadcast %cst_84 : f32 to vector<128x16xf32>
    %116 = arith.maximumf %114, %115 : vector<128x16xf32>
    %c0_85 = arith.constant 0 : index
    %c0_86 = arith.constant 0 : index
    %117 = vector.load %arg11[%c0_85, %c0_86] : memref<128x128xbf16, #tpu.memory_space<vmem>>, vector<128x128xbf16>
    %118 = arith.truncf %116 : vector<128x16xf32> to vector<128x16xbf16>
    %cst_87 = arith.constant dense<0.000000e+00> : vector<128x16xf32>
    %119 = tpu.matmul %117, %118, %cst_87 {dimension_numbers = #tpu.dot_dimension_numbers<[1], [0], [0], [1], [0, 0, 1, 1], [], []>} : vector<128x128xbf16>, vector<128x16xbf16>, vector<128x16xf32> -> vector<128x16xf32>
    %c0_88 = arith.constant 0 : index
    %c0_89 = arith.constant 0 : index
    %120 = vector.load %arg12[%c0_88, %c0_89] : memref<128x1xf32, #tpu.memory_space<vmem>>, vector<128x1xf32>
    %121 = vector.broadcast %120 : vector<128x1xf32> to vector<128x16xf32>
    %122 = arith.addf %119, %121 : vector<128x16xf32>
    %cst_90 = arith.constant dense<0xFF800000> : vector<16xf32>
    %123 = vector.multi_reduction <maximumf>, %122, %cst_90 [0] : vector<128x16xf32> to vector<16xf32>
    %124 = vector.shape_cast %123 : vector<16xf32> to vector<1x16xf32>
    %125 = vector.broadcast %124 : vector<1x16xf32> to vector<128x16xf32>
    %126 = arith.subf %122, %125 : vector<128x16xf32>
    %127 = math.exp %126 : vector<128x16xf32>
    %cst_91 = arith.constant dense<0.000000e+00> : vector<16xf32>
    %128 = vector.multi_reduction <add>, %127, %cst_91 [0] : vector<128x16xf32> to vector<16xf32>
    %129 = vector.shape_cast %128 : vector<16xf32> to vector<1x16xf32>
    %130 = math.log %129 : vector<1x16xf32>
    %131 = vector.broadcast %130 : vector<1x16xf32> to vector<128x16xf32>
    %132 = arith.subf %126, %131 : vector<128x16xf32>
    %c0_92 = arith.constant 0 : index
    %c0_93 = arith.constant 0 : index
    %133 = vector.load %arg13[%c0_92, %c0_93] : memref<128x16xf32, #tpu.memory_space<vmem>>, vector<128x16xf32>
    tpu.vector_store %arg13[%c0_92, %c0_93], %132 {strides = array<i32>} : memref<128x16xf32, #tpu.memory_space<vmem>>, vector<128x16xf32>,
    return
  }
}

</mosaic_0001>

<bundles_post_ra>
// kernel: gin_forward.1
= control target key start
LH: loop header
LB: loop body
LE: loop exit
PB: predicated region body
PF: predicated region fallthrough
CT: control target
= control target key end

     0   :  { %18 = vsyncpa [#allocation3], 0  ;;  %s6413_s0 = inlined_call_operand.vmem [shape: f32[3], index: 0, kind: input, shape index: {}]   ;;  %s6414_s1 = inlined_call_operand.vmem [shape: bf16[16,16], index: 1, kind: input, shape index: {}]   ;;  %s6415_s2 = inlined_call_operand.vmem [shape: f32[128,16], index: 2, kind: input, shape index: {}]   ;;  %s6416_s3 = inlined_call_operand.vmem [shape: bf16[3,128,128], index: 3, kind: input, shape index: {}]   ;;  %s6417_s4 = inlined_call_operand.vmem [shape: f32[3,128,1], index: 4, kind: input, shape index: {}]   ;;  %s6418_s5 = inlined_call_operand.vmem [shape: bf16[3,128,128], index: 5, kind: input, shape index: {}]   ;;  %s6419_s6 = inlined_call_operand.vmem [shape: f32[3,128,1], index: 6, kind: input, shape index: {}]   ;;  %s6420_s7 = inlined_call_operand.vmem [shape: f32[3,128,1], index: 7, kind: input, shape index: {}]   ;;  %s6421_s8 = inlined_call_operand.vmem [shape: f32[3,128,1], index: 8, kind: input, shape index: {}]   ;;  %s6422_s9 = inlined_call_operand.vmem [shape: bf16[128,128], index: 9, kind: input, shape index: {}]   ;;  %s6423_s10 = inlined_call_operand.vmem [shape: f32[128,1], index: 10, kind: input, shape index: {}]   ;;  %s6424_s11 = inlined_call_operand.vmem [shape: bf16[128,128], index: 11, kind: input, shape index: {}]   ;;  %s6425_s12 = inlined_call_operand.vmem [shape: f32[128,1], index: 12, kind: input, shape index: {}]   ;;  %s6426_s13 = inlined_call_operand.vmem [shape: f32[128,16], index: 13, kind: output, shape index: {}]  }
   0x1   :  { %s25_s27 = sshll.u32 %s6413_s0, 4  ;;  %s26_s27 = int_to_ptr.vmem [resolvable:$true] %s25_s27 }
   0x2   :  { %s4508_s28 = scalar_lea.vmem %s26_s27, 16  ;;  %p4513_p1 = scmp.lt.s32.totalorder %s26_s27, %s26_s27 }
   0x3   :  { %p4509_p0 = scmp.ne.s32.totalorder %s26_s27, %s4508_s28  ;;  %p4514_p2 = scmp.lt.s32.totalorder %s4508_s28, %s4508_s28 }
   0x5   :  { %p4515_p3 = por %p4514_p2, %p4513_p1 }
   0x7   :  { %p4516_p4 = pnand %p4515_p3, %p4509_p0 }
   0x9   :  { %4519 = shalt.err (!%p4516_p4)
}
   0xa   :  { %s4522_s29 = smov [#allocation2]  }
   0xb   :  { %28 = dma.vmem_to_smem %s26_s27, 16, %s4522_s29, [#allocation3]  }
   0xc   :  { %4520 = dma.done.wait [#allocation3], 16  }
   0xd   :  { %4521 = vsyncadd [#allocation3], 4294967280 }
   0xe   :  { %56 = sfence }
   0xf   :  { %v285_v0 = vld [vmem:[%s6417_s4 + $0x70] sm:$0xff]  ;;  %v283_v1 = vld [vmem:[%s6417_s4 + $0x60] sm:$0xff]  ;;  %v4523_v2 = vmov 0   ;;  %v286_v4 = vld [vmem:[%s6417_s4 + $0x78] sm:$0xff]  ;;  %vm90_vm0 = vcmask 130048   ;;  %s212_s30 = sld [smem:[#allocation2]] }
  0x10   :  { %4403 = vset.pattern.permute.xlu1 %v4523_v2  ;;  %4402 = vset.pattern.permute.xlu0 %v4523_v2  ;;  %v4404_v3 = vld [vmem:[%s6414_s1] sm:$0xff]   ;;  %v59_v6 = vld [vmem:[%s6415_s2 + $0x8] sm:$0xff]  ;;  %v60_v9 = vld [vmem:[%s6415_s2 + $0x10] sm:$0xff]  ;;  %s3685_s18 = sld [smem:[#allocation2 + $0x1]] }
  0x11   :  { %359 = vperm.xlu0 %4402, %v285_v0   ;;  %349 = vperm.xlu1 %4403, %v283_v1   ;;  %v58_v5 = vld [vmem:[%s6415_s2] sm:$0xff]  ;;  %v284_v7 = vld [vmem:[%s6417_s4 + $0x68] sm:$0xff]  ;;  %v4624_v10 = vld [vmem:[%s6415_s2 + $0x18] sm:$0xff] }
  0x12   :  { %4090 = vmatprep.subr.bf16.mxu0 %v4404_v3  ;;  %v74_v8 = vpack.c.bf16 %v59_v6, %v58_v5  ;;  %v75_v11 = vpack.c.bf16 %v4624_v10, %v60_v9  ;;  %v4631_v12 = vld [vmem:[%s6415_s2 + $0x20] sm:$0xff]  ;;  %v4636_v13 = vld [vmem:[%s6415_s2 + $0x28] sm:$0xff]  ;;  %v282_v15 = vld [vmem:[%s6417_s4 + $0x58] sm:$0xff] }
  0x13   :  { %4091 = vmatpush3.bf16.msra.mxu0 %v4404_v3  ;;  %v76_v14 = vpack.c.bf16 %v4636_v13, %v4631_v12  ;;  %v281_v16 = vld [vmem:[%s6417_s4 + $0x50] sm:$0xff]  ;;  %v4656_v18 = vld [vmem:[%s6415_s2 + $0x38] sm:$0xff]  ;;  %v4661_v19 = vld [vmem:[%s6415_s2 + $0x40] sm:$0xff] }
  0x14   :  { %4092 = vmatprep.mubr.msk.bf16.mxu0 %vm90_vm0, %v74_v8  ;;  %v4651_v17 = vld [vmem:[%s6415_s2 + $0x30] sm:$0xff]  ;;  %v4666_v20 = vld [vmem:[%s6415_s2 + $0x48] sm:$0xff]  ;;  %v279_v22 = vld [vmem:[%s6417_s4 + $0x40] sm:$0xff] }
  0x15   :  { %364 = vperm.xlu0 %4402, %v286_v4   ;;  %354 = vperm.xlu1 %4403, %v284_v7   ;;  %v280_v21 = vld [vmem:[%s6417_s4 + $0x48] sm:$0xff]  ;;  %v77_v23 = vpack.c.bf16 %v4656_v18, %v4651_v17  ;;  %v78_v24 = vpack.c.bf16 %v4666_v20, %v4661_v19  ;;  %v278_v25 = vld [vmem:[%s6417_s4 + $0x38] sm:$0xff]  ;;  %v277_v26 = vld [vmem:[%s6417_s4 + $0x30] sm:$0xff]  ;;  %s213_s21 = sadd.f32 1.0, %s212_s30 }
  0x16   :  { %4093 = vmatmul.mubr.msk.bf16.vlgmr.msra.gmra.mxu0 %vm90_vm0, %v75_v11  ;;  %v4689_v27 = vld [vmem:[%s6415_s2 + $0x50] sm:$0xff]  ;;  %v4694_v28 = vld [vmem:[%s6415_s2 + $0x58] sm:$0xff]  ;;  %v4699_v29 = vld [vmem:[%s6415_s2 + $0x60] sm:$0xff] }
  0x17   :  { %4096 = vmatprep.mubr.msk.bf16.mxu0 %vm90_vm0, %v76_v14  ;;  %v4704_v30 = vld [vmem:[%s6415_s2 + $0x68] sm:$0xff]  ;;  %v275_v32 = vld [vmem:[%s6417_s4 + $0x20] sm:$0xff]  ;;  %v79_v33 = vpack.c.bf16 %v4694_v28, %v4689_v27  ;;  %v274_v35 = vld [vmem:[%s6417_s4 + $0x18] sm:$0xff] }
  0x18   :  { %v276_v31 = vld [vmem:[%s6417_s4 + $0x28] sm:$0xff]  ;;  %v80_v34 = vpack.c.bf16 %v4704_v30, %v4699_v29  ;;  %v273_v36 = vld [vmem:[%s6417_s4 + $0x10] sm:$0xff]  ;;  %v4732_v38 = vld [vmem:[%s6415_s2 + $0x78] sm:$0xff] }
  0x19   :  { %344 = vperm.xlu1 %4403, %v282_v15   ;;  %339 = vperm.xlu0 %4402, %v281_v16   ;;  %v4727_v37 = vld [vmem:[%s6415_s2 + $0x70] sm:$0xff]  ;;  %v272_v39 = vld [vmem:[%s6417_s4 + $0x8] sm:$0xff]  ;;  %v271_v40 = vld [vmem:[%s6417_s4] sm:$0xff] }
  0x1a   :  { %v81_v41 = vpack.c.bf16 %v4732_v38, %v4727_v37  ;;  %v553_v42 = vld [vmem:[%s6419_s6 + $0x8] sm:$0xff]  ;;  %v552_v43 = vld [vmem:[%s6419_s6] sm:$0xff]  ;;  %v555_v44 = vld [vmem:[%s6419_s6 + $0x18] sm:$0xff] }
  0x1b   :  { %v554_v45 = vld [vmem:[%s6419_s6 + $0x10] sm:$0xff]  ;;  %v810_v46 = vld [vmem:[%s6420_s7 + $0x8] sm:$0xff]  ;;  %v809_v47 = vld [vmem:[%s6420_s7] sm:$0xff] }
  0x1c   :  { %v812_v48 = vld [vmem:[%s6420_s7 + $0x18] sm:$0xff]  ;;  %v811_v49 = vld [vmem:[%s6420_s7 + $0x10] sm:$0xff]  ;;  %v922_v50 = vld [vmem:[%s6421_s8 + $0x8] sm:$0xff] }
  0x1d   :  { %334 = vperm.xlu1 %4403, %v280_v21   ;;  %329 = vperm.xlu0 %4402, %v279_v22   ;;  %v921_v51 = vld [vmem:[%s6421_s8] sm:$0xff]  ;;  %v924_v52 = vld [vmem:[%s6421_s8 + $0x18] sm:$0xff]  ;;  %v923_v53 = vld [vmem:[%s6421_s8 + $0x10] sm:$0xff] }
  0x1e   :  { %4097 = vmatmul.mubr.msk.bf16.gmra.mxu0 %vm90_vm0, %v77_v23  ;;  %v557_v54 = vld [vmem:[%s6419_s6 + $0x28] sm:$0xff]  ;;  %v556_v55 = vld [vmem:[%s6419_s6 + $0x20] sm:$0xff]  ;;  %v559_v56 = vld [vmem:[%s6419_s6 + $0x38] sm:$0xff] }
  0x1f   :  { %4100 = vmatprep.mubr.msk.bf16.mxu0 %vm90_vm0, %v78_v24  ;;  %v558_v57 = vld [vmem:[%s6419_s6 + $0x30] sm:$0xff]  ;;  %v814_v58 = vld [vmem:[%s6420_s7 + $0x28] sm:$0xff]  ;;  %v813_v59 = vld [vmem:[%s6420_s7 + $0x20] sm:$0xff] }
  0x20   :  { %v816_v60 = vld [vmem:[%s6420_s7 + $0x38] sm:$0xff]  ;;  %v815_v61 = vld [vmem:[%s6420_s7 + $0x30] sm:$0xff]  ;;  %v926_v62 = vld [vmem:[%s6421_s8 + $0x28] sm:$0xff] }
  0x21   :  { %324 = vperm.xlu1 %4403, %v278_v25   ;;  %319 = vperm.xlu0 %4402, %v277_v26   ;;  %v925_v63 = vld [vmem:[%s6421_s8 + $0x20] sm:$0xff]  ;;  %v928_v0 = vld [vmem:[%s6421_s8 + $0x38] sm:$0xff]  ;;  %v927_v1 = vld [vmem:[%s6421_s8 + $0x30] sm:$0xff] }
  0x22   :  { %v561_v2 = vld [vmem:[%s6419_s6 + $0x48] sm:$0xff]  ;;  %v560_v3 = vld [vmem:[%s6419_s6 + $0x40] sm:$0xff]  ;;  %v563_v4 = vld [vmem:[%s6419_s6 + $0x58] sm:$0xff] }
  0x23   :  { %v562_v5 = vld [vmem:[%s6419_s6 + $0x50] sm:$0xff]  ;;  %v818_v6 = vld [vmem:[%s6420_s7 + $0x48] sm:$0xff]  ;;  %v817_v7 = vld [vmem:[%s6420_s7 + $0x40] sm:$0xff] }
  0x24   :  { %v820_v8 = vld [vmem:[%s6420_s7 + $0x58] sm:$0xff]  ;;  %v819_v9 = vld [vmem:[%s6420_s7 + $0x50] sm:$0xff]  ;;  %v930_v11 = vld [vmem:[%s6421_s8 + $0x48] sm:$0xff] }
  0x25   :  { %314 = vperm.xlu1 %4403, %v276_v31   ;;  %309 = vperm.xlu0 %4402, %v275_v32   ;;  %v929_v14 = vld [vmem:[%s6421_s8 + $0x40] sm:$0xff]  ;;  %v932_v15 = vld [vmem:[%s6421_s8 + $0x58] sm:$0xff]  ;;  %v931_v16 = vld [vmem:[%s6421_s8 + $0x50] sm:$0xff] }
  0x26   :  { %4101 = vmatmul.mubr.msk.bf16.gmra.mxu0 %vm90_vm0, %v79_v33  ;;  %v565_v21 = vld [vmem:[%s6419_s6 + $0x68] sm:$0xff]  ;;  %v564_v22 = vld [vmem:[%s6419_s6 + $0x60] sm:$0xff]  ;;  %v567_v23 = vld [vmem:[%s6419_s6 + $0x78] sm:$0xff] }
  0x27   :  { %4104 = vmatprep.mubr.msk.bf16.mxu0 %vm90_vm0, %v80_v34  ;;  %v566_v24 = vld [vmem:[%s6419_s6 + $0x70] sm:$0xff]  ;;  %v822_v25 = vld [vmem:[%s6420_s7 + $0x68] sm:$0xff]  ;;  %v821_v26 = vld [vmem:[%s6420_s7 + $0x60] sm:$0xff] }
  0x28   :  { %v824_v31 = vld [vmem:[%s6420_s7 + $0x78] sm:$0xff]  ;;  %v823_v32 = vld [vmem:[%s6420_s7 + $0x70] sm:$0xff]  ;;  %v934_v33 = vld [vmem:[%s6421_s8 + $0x68] sm:$0xff] }
  0x29   :  { %304 = vperm.xlu1 %4403, %v274_v35   ;;  %299 = vperm.xlu0 %4402, %v273_v36   ;;  %v933_v34 = vld [vmem:[%s6421_s8 + $0x60] sm:$0xff]  ;;  %v936_v35 = vld [vmem:[%s6421_s8 + $0x78] sm:$0xff]  ;;  %v935_v36 = vld [vmem:[%s6421_s8 + $0x70] sm:$0xff] }
  0x2d   :  { %294 = vperm.xlu1 %4403, %v272_v39   ;;  %289 = vperm.xlu0 %4402, %v271_v40  }
  0x2e   :  { %4105 = vmatmul.mubr.msk.bf16.gmra.mxu0 %vm90_vm0, %v81_v41  ;;  %v3717_v41 = vld [vmem:[%s6417_s4 + $0xf8] sm:$0xff] }
  0x31   :  { %575 = vperm.xlu1 %4403, %v553_v42   ;;  %570 = vperm.xlu0 %4402, %v552_v43   ;;  %v3716_v42 = vld [vmem:[%s6417_s4 + $0xf0] sm:$0xff] }
  0x35   :  { %585 = vperm.xlu1 %4403, %v555_v44   ;;  %580 = vperm.xlu0 %4402, %v554_v45   ;;  %v3715_v45 = vld [vmem:[%s6417_s4 + $0xe8] sm:$0xff] }
  0x39   :  { %832 = vperm.xlu1 %4403, %v810_v46   ;;  %827 = vperm.xlu0 %4402, %v809_v47   ;;  %v3714_v46 = vld [vmem:[%s6417_s4 + $0xe0] sm:$0xff] }
  0x3d   :  { %842 = vperm.xlu1 %4403, %v812_v48   ;;  %837 = vperm.xlu0 %4402, %v811_v49   ;;  %v4405_v49 = vld [vmem:[%s6416_s3] sm:$0xff]  }
  0x3e   :  { %4124 = vmatprep.mubr.bf16.mxu1 %v4405_v49  ;;  %v3785_v49 = vld [vmem:[%s6421_s8 + $0x98] sm:$0xff] }
  0x41   :  { %944 = vperm.xlu1 %4403, %v922_v50   ;;  %939 = vperm.xlu0 %4402, %v921_v51   ;;  %v3713_v50 = vld [vmem:[%s6417_s4 + $0xd8] sm:$0xff]  ;;  %v3712_v51 = vld [vmem:[%s6417_s4 + $0xd0] sm:$0xff] }
  0x45   :  { %954 = vperm.xlu1 %4403, %v924_v52   ;;  %949 = vperm.xlu0 %4402, %v923_v53  }
  0x49   :  { %595 = vperm.xlu1 %4403, %v557_v54   ;;  %590 = vperm.xlu0 %4402, %v556_v55   ;;  %v3711_v54 = vld [vmem:[%s6417_s4 + $0xc8] sm:$0xff]  ;;  %v3710_v55 = vld [vmem:[%s6417_s4 + $0xc0] sm:$0xff] }
  0x4d   :  { %605 = vperm.xlu1 %4403, %v559_v56   ;;  %600 = vperm.xlu0 %4402, %v558_v57  }
  0x51   :  { %852 = vperm.xlu1 %4403, %v814_v58   ;;  %847 = vperm.xlu0 %4402, %v813_v59   ;;  %v3709_v58 = vld [vmem:[%s6417_s4 + $0xb8] sm:$0xff]  ;;  %v3708_v59 = vld [vmem:[%s6417_s4 + $0xb0] sm:$0xff] }
  0x55   :  { %862 = vperm.xlu1 %4403, %v816_v60   ;;  %857 = vperm.xlu0 %4402, %v815_v61  }
  0x59   :  { %964 = vperm.xlu1 %4403, %v926_v62   ;;  %959 = vperm.xlu0 %4402, %v925_v63   ;;  %v3707_v62 = vld [vmem:[%s6417_s4 + $0xa8] sm:$0xff]  ;;  %v3706_v63 = vld [vmem:[%s6417_s4 + $0xa0] sm:$0xff] }
  0x5d   :  { %974 = vperm.xlu1 %4403, %v928_v0   ;;  %969 = vperm.xlu0 %4402, %v927_v1  }
  0x61   :  { %615 = vperm.xlu1 %4403, %v561_v2   ;;  %610 = vperm.xlu0 %4402, %v560_v3   ;;  %v3705_v2 = vld [vmem:[%s6417_s4 + $0x98] sm:$0xff]  ;;  %v3704_v3 = vld [vmem:[%s6417_s4 + $0x90] sm:$0xff] }
  0x65   :  { %625 = vperm.xlu1 %4403, %v563_v4   ;;  %620 = vperm.xlu0 %4402, %v562_v5  }
  0x69   :  { %872 = vperm.xlu1 %4403, %v818_v6   ;;  %867 = vperm.xlu0 %4402, %v817_v7   ;;  %v3703_v6 = vld [vmem:[%s6417_s4 + $0x88] sm:$0xff]  ;;  %v3702_v7 = vld [vmem:[%s6417_s4 + $0x80] sm:$0xff] }
  0x6d   :  { %882 = vperm.xlu1 %4403, %v820_v8   ;;  %877 = vperm.xlu0 %4402, %v819_v9  }
  0x71   :  { %984 = vperm.xlu1 %4403, %v930_v11   ;;  %979 = vperm.xlu0 %4402, %v929_v14   ;;  %v3743_v11 = vld [vmem:[%s6419_s6 + $0x88] sm:$0xff]  ;;  %v3742_v14 = vld [vmem:[%s6419_s6 + $0x80] sm:$0xff] }
  0x75   :  { %994 = vperm.xlu1 %4403, %v932_v15   ;;  %989 = vperm.xlu0 %4402, %v931_v16  }
  0x79   :  { %635 = vperm.xlu1 %4403, %v565_v21   ;;  %630 = vperm.xlu0 %4402, %v564_v22   ;;  %v3745_v21 = vld [vmem:[%s6419_s6 + $0x98] sm:$0xff]  ;;  %v3744_v22 = vld [vmem:[%s6419_s6 + $0x90] sm:$0xff] }
  0x7d   :  { %645 = vperm.xlu1 %4403, %v567_v23   ;;  %640 = vperm.xlu0 %4402, %v566_v24  }
  0x81   :  { %892 = vperm.xlu1 %4403, %v822_v25   ;;  %887 = vperm.xlu0 %4402, %v821_v26   ;;  %v3767_v25 = vld [vmem:[%s6420_s7 + $0x88] sm:$0xff]  ;;  %v3766_v26 = vld [vmem:[%s6420_s7 + $0x80] sm:$0xff] }
  0x85   :  { %902 = vperm.xlu1 %4403, %v824_v31   ;;  %897 = vperm.xlu0 %4402, %v823_v32  }
  0x89   :  { %1004 = vperm.xlu1 %4403, %v934_v33   ;;  %999 = vperm.xlu0 %4402, %v933_v34   ;;  %v3769_v33 = vld [vmem:[%s6420_s7 + $0x98] sm:$0xff]  ;;  %v3768_v34 = vld [vmem:[%s6420_s7 + $0x90] sm:$0xff] }
  0x8c   :  { %v4887_v39 = vpop.permute.xlu0 %359  ;;  %v4889_v40 = vpop.permute.xlu1 %349 }
  0x8d   :  { %1014 = vperm.xlu1 %4403, %v936_v35   ;;  %1009 = vperm.xlu0 %4402, %v935_v36  }
  0x90   :  { %v4897_v43 = vpop.permute.xlu0 %364  ;;  %v4899_v44 = vpop.permute.xlu1 %354 }
  0x91   :  { %1316 = vperm.xlu1 %4403, %v3717_v41   ;;  %1311 = vperm.xlu0 %4402, %v3716_v42   ;;  %v3783_v41 = vld [vmem:[%s6421_s8 + $0x88] sm:$0xff]  ;;  %v3782_v42 = vld [vmem:[%s6421_s8 + $0x80] sm:$0xff] }
  0x94   :  { %v4907_v47 = vpop.permute.xlu1 %344  ;;  %v4909_v48 = vpop.permute.xlu0 %339 }
  0x95   :  { %1306 = vperm.xlu1 %4403, %v3715_v45   ;;  %1301 = vperm.xlu0 %4402, %v3714_v46  }
  0x98   :  { %v4920_v52 = vpop.permute.xlu1 %334  ;;  %v4922_v53 = vpop.permute.xlu0 %329 }
  0x99   :  { %1296 = vperm.xlu1 %4403, %v3713_v50   ;;  %1291 = vperm.xlu0 %4402, %v3712_v51   ;;  %v3784_v50 = vld [vmem:[%s6421_s8 + $0x90] sm:$0xff] }
  0x9c   :  { %v4930_v56 = vpop.permute.xlu1 %324  ;;  %v4932_v57 = vpop.permute.xlu0 %319 }
  0x9d   :  { %1286 = vperm.xlu1 %4403, %v3711_v54   ;;  %1281 = vperm.xlu0 %4402, %v3710_v55   ;;  %v3747_v55 = vld [vmem:[%s6419_s6 + $0xa8] sm:$0xff] }
  0xa0   :  { %v4940_v60 = vpop.permute.xlu1 %314  ;;  %v4942_v61 = vpop.permute.xlu0 %309 }
  0xa1   :  { %1276 = vperm.xlu1 %4403, %v3709_v58   ;;  %1271 = vperm.xlu0 %4402, %v3708_v59   ;;  %v3746_v58 = vld [vmem:[%s6419_s6 + $0xa0] sm:$0xff] }
  0xa4   :  { %v4950_v0 = vpop.permute.xlu1 %304  ;;  %v4952_v1 = vpop.permute.xlu0 %299 }
  0xa5   :  { %1266 = vperm.xlu1 %4403, %v3707_v62   ;;  %1261 = vperm.xlu0 %4402, %v3706_v63   ;;  %v3749_v63 = vld [vmem:[%s6419_s6 + $0xb8] sm:$0xff] }
  0xa8   :  { %v4960_v4 = vpop.permute.xlu1 %294  ;;  %v4962_v5 = vpop.permute.xlu0 %289 }
  0xa9   :  { %1256 = vperm.xlu1 %4403, %v3705_v2   ;;  %1251 = vperm.xlu0 %4402, %v3704_v3   ;;  %v3748_v2 = vld [vmem:[%s6419_s6 + $0xb0] sm:$0xff] }
  0xac   :  { %v4970_v8 = vpop.permute.xlu1 %575  ;;  %v4972_v9 = vpop.permute.xlu0 %570 }
  0xad   :  { %1246 = vperm.xlu1 %4403, %v3703_v6   ;;  %1241 = vperm.xlu0 %4402, %v3702_v7   ;;  %v3771_v7 = vld [vmem:[%s6420_s7 + $0xa8] sm:$0xff] }
  0xb0   :  { %v4980_v15 = vpop.permute.xlu1 %585  ;;  %v4982_v16 = vpop.permute.xlu0 %580 }
  0xb1   :  { %1529 = vperm.xlu1 %4403, %v3743_v11   ;;  %1524 = vperm.xlu0 %4402, %v3742_v14   ;;  %v3770_v11 = vld [vmem:[%s6420_s7 + $0xa0] sm:$0xff] }
  0xb4   :  { %v4990_v23 = vpop.permute.xlu1 %832  ;;  %v4992_v24 = vpop.permute.xlu0 %827 }
  0xb5   :  { %6427 = vst [vmem:[#allocation5_spill] sm:$0xff] %v4990_v23  ;;  %1539 = vperm.xlu1 %4403, %v3745_v21   ;;  %1534 = vperm.xlu0 %4402, %v3744_v22   ;;  %v3773_v22 = vld [vmem:[%s6420_s7 + $0xb8] sm:$0xff] }
  0xb8   :  { %v5000_v31 = vpop.permute.xlu1 %842  ;;  %v5002_v32 = vpop.permute.xlu0 %837 }
  0xb9   :  { %6428 = vst [vmem:[#allocation6_spill] sm:$0xff] %v5002_v32  ;;  %1787 = vperm.xlu1 %4403, %v3767_v25   ;;  %1782 = vperm.xlu0 %4402, %v3766_v26   ;;  %v3772_v25 = vld [vmem:[%s6420_s7 + $0xb0] sm:$0xff]  ;;  %v3755_v32 = vld [vmem:[%s6419_s6 + $0xe8] sm:$0xff] }
  0xbc   :  { %v5010_v35 = vpop.permute.xlu1 %944  ;;  %v5012_v36 = vpop.permute.xlu0 %939 }
  0xbd   :  { %6429 = vst [vmem:[#allocation7_spill] sm:$0xff] %v5010_v35  ;;  %6430 = vst [vmem:[#allocation8_spill] sm:$0xff] %v5012_v36  ;;  %1797 = vperm.xlu1 %4403, %v3769_v33   ;;  %1792 = vperm.xlu0 %4402, %v3768_v34  }
  0xc0   :  { %v5020_v45 = vpop.permute.xlu1 %954  ;;  %v5022_v46 = vpop.permute.xlu0 %949 }
  0xc1   :  { %6431 = vst [vmem:[#allocation9_spill] sm:$0xff] %v5020_v45  ;;  %6432 = vst [vmem:[#allocation10_spill] sm:$0xff] %v5022_v46  ;;  %1900 = vperm.xlu1 %4403, %v3783_v41   ;;  %1895 = vperm.xlu0 %4402, %v3782_v42   ;;  %v3787_v41 = vld [vmem:[%s6421_s8 + $0xa8] sm:$0xff]  ;;  %v3786_v42 = vld [vmem:[%s6421_s8 + $0xa0] sm:$0xff] }
  0xc4   :  { %v5030_v51 = vpop.permute.xlu1 %595  ;;  %v5032_v54 = vpop.permute.xlu0 %590 }
  0xc5   :  { %6433 = vst [vmem:[#allocation11_spill] sm:$0xff] %v5030_v51  ;;  %6434 = vst [vmem:[#allocation12_spill] sm:$0xff] %v5032_v54  ;;  %1910 = vperm.xlu1 %4403, %v3785_v49   ;;  %1905 = vperm.xlu0 %4402, %v3784_v50  }
  0xc8   :  { %v5040_v59 = vpop.permute.xlu1 %605  ;;  %v5042_v62 = vpop.permute.xlu0 %600 }
  0xc9   :  { %6435 = vst [vmem:[#allocation13_spill] sm:$0xff] %v5040_v59  ;;  %6436 = vst [vmem:[#allocation14_spill] sm:$0xff] %v5042_v62  ;;  %1549 = vperm.xlu1 %4403, %v3747_v55   ;;  %1544 = vperm.xlu0 %4402, %v3746_v58   ;;  %v3789_v58 = vld [vmem:[%s6421_s8 + $0xb8] sm:$0xff] }
  0xcc   :  { %v5050_v3 = vpop.permute.xlu1 %852  ;;  %v5052_v6 = vpop.permute.xlu0 %847 }
  0xcd   :  { %6437 = vst [vmem:[#allocation15_spill] sm:$0xff] %v5050_v3  ;;  %6438 = vst [vmem:[#allocation16_spill] sm:$0xff] %v5052_v6  ;;  %1559 = vperm.xlu1 %4403, %v3749_v63   ;;  %1554 = vperm.xlu0 %4402, %v3748_v2   ;;  %v3788_v63 = vld [vmem:[%s6421_s8 + $0xb0] sm:$0xff] }
  0xd0   :  { %v5060_v14 = vpop.permute.xlu1 %862  ;;  %v5062_v21 = vpop.permute.xlu0 %857 }
  0xd1   :  { %6439 = vst [vmem:[#allocation17_spill] sm:$0xff] %v5060_v14  ;;  %6440 = vst [vmem:[#allocation18_spill] sm:$0xff] %v5062_v21  ;;  %1807 = vperm.xlu1 %4403, %v3771_v7   ;;  %1802 = vperm.xlu0 %4402, %v3770_v11  }
  0xd4   :  { %v5070_v26 = vpop.permute.xlu1 %964  ;;  %v5072_v33 = vpop.permute.xlu0 %959 }
  0xd5   :  { %6441 = vst [vmem:[#allocation19_spill] sm:$0xff] %v5070_v26  ;;  %6442 = vst [vmem:[#allocation20_spill] sm:$0xff] %v5072_v33  ;;  %1817 = vperm.xlu1 %4403, %v3773_v22   ;;  %1812 = vperm.xlu0 %4402, %v3772_v25   ;;  %v3751_v25 = vld [vmem:[%s6419_s6 + $0xc8] sm:$0xff] }
  0xd6   :  { %v5074_v34 = vpop.f32.mrf.mxu0 }
  0xd8   :  { %v5082_v49 = vpop.permute.xlu1 %974  ;;  %v5084_v50 = vpop.permute.xlu0 %969 }
  0xd9   :  { %6443 = vst [vmem:[#allocation21_spill] sm:$0xff] %v5082_v49  ;;  %6444 = vst [vmem:[#allocation22_spill] sm:$0xff] %v5084_v50  ;;  %v5086_v55 = vpop.f32.mrf.mxu0  ;;  %1920 = vperm.xlu1 %4403, %v3787_v41   ;;  %1915 = vperm.xlu0 %4402, %v3786_v42   ;;  %v3750_v41 = vld [vmem:[%s6419_s6 + $0xc0] sm:$0xff] }
  0xdb   :  { %v5094_v2 = vpop.f32.mrf.mxu0 }
  0xdc   :  { %v5096_v7 = vpop.permute.xlu1 %615  ;;  %v5098_v11 = vpop.permute.xlu0 %610 }
  0xdd   :  { %6445 = vst [vmem:[#allocation23_spill] sm:$0xff] %v5096_v7  ;;  %6446 = vst [vmem:[#allocation24_spill] sm:$0xff] %v5098_v11  ;;  %v5100_v22 = vpop.f32.mrf.mxu0  ;;  %1930 = vperm.xlu1 %4403, %v3789_v58   ;;  %1925 = vperm.xlu0 %4402, %v3788_v63   ;;  %v3753_v58 = vld [vmem:[%s6419_s6 + $0xd8] sm:$0xff]  ;;  %v3752_v63 = vld [vmem:[%s6419_s6 + $0xd0] sm:$0xff] }
  0xdf   :  { %v5108_v42 = vpop.f32.mrf.mxu0 }
  0xe0   :  { %v5110_v50 = vpop.permute.xlu1 %625  ;;  %v5112_v26 = vpop.permute.xlu0 %620 }
  0xe1   :  { %6447 = vst [vmem:[#allocation25_spill] sm:$0xff] %v5110_v50  ;;  %6448 = vst [vmem:[#allocation26_spill] sm:$0xff] %v5112_v26  ;;  %v5114_v7 = vpop.f32.mrf.mxu0  ;;  %1569 = vperm.xlu1 %4403, %v3751_v25   ;;  %1564 = vperm.xlu0 %4402, %v3750_v41   ;;  %v3775_v25 = vld [vmem:[%s6420_s7 + $0xc8] sm:$0xff]  ;;  %v3774_v41 = vld [vmem:[%s6420_s7 + $0xc0] sm:$0xff] }
  0xe3   :  { %v5122_v33 = vpop.f32.mrf.mxu0 }
  0xe4   :  { %v5124_v49 = vpop.permute.xlu1 %872  ;;  %v5126_v50 = vpop.permute.xlu0 %867 }
  0xe5   :  { %6449 = vst [vmem:[#allocation27_spill] sm:$0xff] %v5124_v49  ;;  %6450 = vst [vmem:[#allocation28_spill] sm:$0xff] %v5126_v50  ;;  %v5128_v11 = vpop.f32.mrf.mxu0  ;;  %1579 = vperm.xlu1 %4403, %v3753_v58   ;;  %1574 = vperm.xlu0 %4402, %v3752_v63   ;;  %v3777_v58 = vld [vmem:[%s6420_s7 + $0xd8] sm:$0xff]  ;;  %v3776_v63 = vld [vmem:[%s6420_s7 + $0xd0] sm:$0xff] }
  0xe7   :  { %v4102_v26 = vpop.f32.mrf.mxu0 }
  0xe8   :  { %v5136_v3 = vpop.permute.xlu1 %882  ;;  %v5138_v14 = vpop.permute.xlu0 %877 }
  0xe9   :  { %6451 = vst [vmem:[#allocation29_spill] sm:$0xff] %v5136_v3  ;;  %6452 = vst [vmem:[#allocation30_spill] sm:$0xff] %v5138_v14  ;;  %v181_v49 = vpop.f32.mrf.mxu0  ;;  %1827 = vperm.xlu1 %4403, %v3775_v25   ;;  %1822 = vperm.xlu0 %4402, %v3774_v41   ;;  %v3791_v25 = vld [vmem:[%s6421_s8 + $0xc8] sm:$0xff]  ;;  %v3790_v41 = vld [vmem:[%s6421_s8 + $0xc0] sm:$0xff]  ;;  %v5156_v14 = vstv %s213_s21 }
  0xea   :  { %v229_v59 = vmul.f32 %v5156_v14, %v4727_v37  ;;  %v227_v46 = vmul.f32 %v5156_v14, %v4699_v29  ;;  %v228_v35 = vmul.f32 %v5156_v14, %v4704_v30  ;;  %v3793_v37 = vld [vmem:[%s6421_s8 + $0xd8] sm:$0xff]  ;;  %v225_v30 = vmul.f32 %v5156_v14, %v4689_v27 }
  0xeb   :  { %v4103_v50 = vpop.f32.mrf.mxu0 }
  0xec   :  { %v5146_v21 = vpop.permute.xlu1 %984  ;;  %v5148_v6 = vpop.permute.xlu0 %979  ;;  %v241_v27 = vadd.f32 %v4102_v26, %v225_v30 }
  0xed   :  { %6453 = vst [vmem:[#allocation31_spill] sm:$0xff] %v5146_v21  ;;  %6454 = vst [vmem:[#allocation32_spill] sm:$0xff] %v5148_v6  ;;  %v184_v3 = vpop.f32.mrf.mxu0  ;;  %1837 = vperm.xlu1 %4403, %v3777_v58   ;;  %1832 = vperm.xlu0 %4402, %v3776_v63   ;;  %v230_v58 = vmul.f32 %v5156_v14, %v4732_v38  ;;  %v226_v38 = vmul.f32 %v5156_v14, %v4694_v28  ;;  %v3754_v28 = vld [vmem:[%s6419_s6 + $0xe0] sm:$0xff] }
  0xef   :  { %v4106_v51 = vpop.f32.mrf.mxu0 }
  0xf0   :  { %v5160_v21 = vpop.permute.xlu1 %994  ;;  %v5162_v6 = vpop.permute.xlu0 %989 }
  0xf1   :  { %6455 = vst [vmem:[#allocation33_spill] sm:$0xff] %v5160_v21  ;;  %6456 = vst [vmem:[#allocation34_spill] sm:$0xff] %v5162_v6  ;;  %v197_v63 = vpop.f32.mrf.mxu0  ;;  %1940 = vperm.xlu1 %4403, %v3791_v25   ;;  %1935 = vperm.xlu0 %4402, %v3790_v41   ;;  %v3792_v6 = vld [vmem:[%s6421_s8 + $0xd0] sm:$0xff]  ;;  %v245_v25 = vadd.f32 %v4106_v51, %v229_v59  ;;  %v242_v51 = vadd.f32 %v4103_v50, %v226_v38  ;;  %v3779_v50 = vld [vmem:[%s6420_s7 + $0xe8] sm:$0xff] }
  0xf2   :  { %v243_v45 = vadd.f32 %v227_v46, %v197_v63  ;;  %v224_v59 = vmul.f32 %v5156_v14, %v4666_v20  ;;  %v3757_v46 = vld [vmem:[%s6419_s6 + $0xf8] sm:$0xff]  ;;  %v3756_v20 = vld [vmem:[%s6419_s6 + $0xf0] sm:$0xff] }
  0xf3   :  { %v4107_v21 = vpop.f32.mrf.mxu0 }
  0xf4   :  { %v246_v41 = vadd.f32 %v4107_v21, %v230_v58  ;;  %v5178_v36 = vpop.permute.xlu1 %635  ;;  %v5182_v54 = vpop.permute.xlu0 %630  ;;  %v220_v58 = vmul.f32 %v5156_v14, %v4636_v13  ;;  %v3780_v13 = vld [vmem:[%s6420_s7 + $0xf0] sm:$0xff] }
  0xf5   :  { %v200_v29 = vpop.f32.mrf.mxu0  ;;  %1950 = vperm.xlu1 %4403, %v3793_v37   ;;  %1945 = vperm.xlu0 %4402, %v3792_v6  }
  0xf6   :  { %v244_v23 = vadd.f32 %v228_v35, %v200_v29  ;;  %v270_v62 = vpack.c.bf16 %v246_v41, %v245_v25  ;;  %v223_v35 = vmul.f32 %v5156_v14, %v4661_v19  ;;  %v221_v19 = vmul.f32 %v5156_v14, %v4651_v17 }
  0xf7   :  { %v218_v25 = vmul.f32 %v5156_v14, %v4624_v10 }
  0xf8   :  { %v269_v6 = vpack.c.bf16 %v244_v23, %v243_v45  ;;  %4108 = vmatprep.subr.bf16.mxu1 %v270_v62  ;;  %v5197_v21 = vpop.permute.xlu1 %645  ;;  %v222_v23 = vmul.f32 %v5156_v14, %v4656_v18  ;;  %v240_v45 = vadd.f32 %v224_v59, %v184_v3  ;;  %v239_v26 = vadd.f32 %v223_v35, %v181_v49  ;;  %v3778_v18 = vld [vmem:[%s6420_s7 + $0xe0] sm:$0xff]  ;;  %v4504_v59 = vld [vmem:[%s6415_s2 + $0x8] sm:$0xff] }
  0xf9   :  { %4109 = vmatpush3.bf16.msra.mxu1 %v270_v62  ;;  %1589 = vperm.xlu1 %4403, %v3755_v32   ;;  %v268_v32 = vpack.c.bf16 %v242_v51, %v241_v27  ;;  %v5204_v62 = vpop.permute.xlu0 %640  ;;  %v237_v17 = vadd.f32 %v5108_v42, %v221_v19  ;;  %v219_v49 = vmul.f32 %v5156_v14, %v4631_v12  ;;  %v4503_v12 = vld [vmem:[%s6415_s2 + $0x10] sm:$0xff] }
  0xfa   :  { %1584 = vperm.xlu0 %4402, %v3754_v28   ;;  %4110 = vmatprep.subr.bf16.mxu1 %v269_v6  ;;  %v238_v3 = vadd.f32 %v5122_v33, %v222_v23  ;;  %v267_v63 = vpack.c.bf16 %v240_v45, %v239_v26  ;;  %v3781_v33 = vld [vmem:[%s6420_s7 + $0xf8] sm:$0xff]  ;;  %v236_v42 = vadd.f32 %v220_v58, %v5128_v11  ;;  %v3795_v28 = vld [vmem:[%s6421_s8 + $0xe8] sm:$0xff]  ;;  %v3794_v11 = vld [vmem:[%s6421_s8 + $0xe0] sm:$0xff] }
  0xfb   :  { %v217_v29 = vmul.f32 %v4503_v12, %v5156_v14  ;;  %v235_v30 = vadd.f32 %v219_v49, %v5114_v7  ;;  %v234_v51 = vadd.f32 %v5094_v2, %v218_v25  ;;  %v216_v7 = vmul.f32 %v4504_v59, %v5156_v14  ;;  %v3797_v2 = vld [vmem:[%s6421_s8 + $0xf8] sm:$0xff]  ;;  %v3796_v23 = vld [vmem:[%s6421_s8 + $0xf0] sm:$0xff]  ;;  %v3831_v12 = vld [vmem:[%s6417_s4 + $0x140] sm:$0xff] }
  0xfc   :  { %v5217_v37 = vpop.permute.xlu1 %892  ;;  %v266_v41 = vpack.c.bf16 %v238_v3, %v237_v17  ;;  %v3838_v26 = vld [vmem:[%s6417_s4 + $0x178] sm:$0xff]  ;;  %v3835_v3 = vld [vmem:[%s6417_s4 + $0x160] sm:$0xff]  ;;  %v4407_v17 = vld [vmem:[%s6416_s3 + $0x10] sm:$0xff]  }
  0xfd   :  { %4111 = vmatpush3.bf16.msra.mxu1 %v269_v6  ;;  %1599 = vperm.xlu1 %4403, %v3757_v46   ;;  %v5222_v38 = vpop.permute.xlu0 %887  ;;  %v265_v6 = vpack.c.bf16 %v236_v42, %v235_v30  ;;  %v233_v35 = vadd.f32 %v5074_v34, %v217_v29  ;;  %v4505_v46 = vld [vmem:[%s6415_s2] sm:$0xff]  ;;  %v232_v45 = vadd.f32 %v216_v7, %v5100_v22  ;;  %v3834_v49 = vld [vmem:[%s6417_s4 + $0x158] sm:$0xff]  ;;  %v3832_v42 = vld [vmem:[%s6417_s4 + $0x148] sm:$0xff]  ;;  %s3806_s2 = sld [smem:[#allocation2 + $0x2]] }
  0xfe   :  { %1594 = vperm.xlu0 %4402, %v3756_v20   ;;  %4112 = vmatprep.subr.bf16.mxu1 %v268_v32  ;;  %v215_v20 = vmul.f32 %v4505_v46, %v5156_v14  ;;  %v4408_v29 = vld [vmem:[%s6416_s3 + $0x18] sm:$0xff]   ;;  %v4409_v30 = vld [vmem:[%s6416_s3 + $0x20] sm:$0xff]   ;;  %v3828_v7 = vld [vmem:[%s6417_s4 + $0x128] sm:$0xff] }
 0x100   :  { %v5241_v10 = vpop.permute.xlu1 %902  ;;  %v231_v19 = vadd.f32 %v215_v20, %v5086_v55  ;;  %v3836_v55 = vld [vmem:[%s6417_s4 + $0x168] sm:$0xff]  ;;  %v4411_v20 = vld [vmem:[%s6416_s3 + $0x30] sm:$0xff]  }
 0x101   :  { %4113 = vmatpush3.bf16.msra.mxu1 %v268_v32  ;;  %1847 = vperm.xlu1 %4403, %v3779_v50   ;;  %v5251_v27 = vpop.permute.xlu0 %897  ;;  %v264_v32 = vpack.c.bf16 %v234_v51, %v233_v35  ;;  %v3837_v50 = vld [vmem:[%s6417_s4 + $0x170] sm:$0xff]  ;;  %v4410_v35 = vld [vmem:[%s6416_s3 + $0x28] sm:$0xff]  }
 0x102   :  { %1842 = vperm.xlu0 %4402, %v3778_v18   ;;  %4114 = vmatprep.subr.bf16.mxu1 %v267_v63  ;;  %v263_v18 = vpack.c.bf16 %v232_v45, %v231_v19  ;;  %v3829_v51 = vld [vmem:[%s6417_s4 + $0x130] sm:$0xff]  ;;  %v3824_v45 = vld [vmem:[%s6417_s4 + $0x108] sm:$0xff] }
 0x103   :  { %s2119_s24 = sadd.f32 1.0, %s3806_s2 }
 0x104   :  { %v5265_v34 = vpop.permute.xlu1 %1004 }
 0x105   :  { %4115 = vmatpush3.bf16.msra.mxu1 %v267_v63  ;;  %1857 = vperm.xlu1 %4403, %v3781_v33   ;;  %v5268_v14 = vpop.permute.xlu0 %999  ;;  %v4406_v63 = vld [vmem:[%s6416_s3 + $0x8] sm:$0xff]   ;;  %v4506_v33 = vld [vmem:[%s6414_s1] sm:$0xff]  }
 0x106   :  { %1852 = vperm.xlu0 %4402, %v3780_v13   ;;  %4116 = vmatprep.subr.bf16.mxu1 %v266_v41  ;;  %v3833_v13 = vld [vmem:[%s6417_s4 + $0x150] sm:$0xff] }
 0x108   :  { %v5279_v22 = vpop.permute.xlu1 %1014 }
 0x109   :  { %4117 = vmatpush3.bf16.msra.mxu1 %v266_v41  ;;  %1960 = vperm.xlu1 %4403, %v3795_v28   ;;  %v5284_v58 = vpop.permute.xlu0 %1009  ;;  %v3830_v28 = vld [vmem:[%s6417_s4 + $0x138] sm:$0xff] }
 0x10a   :  { %1955 = vperm.xlu0 %4402, %v3794_v11   ;;  %4118 = vmatprep.subr.bf16.mxu1 %v265_v6 }
 0x10c   :  { %v5301_v25 = vpop.permute.xlu1 %1316 }
 0x10d   :  { %4119 = vmatpush3.bf16.msra.mxu1 %v265_v6  ;;  %1970 = vperm.xlu1 %4403, %v3797_v2   ;;  %6457 = vst [vmem:[#allocation35_spill] sm:$0xff] %v5301_v25  ;;  %v5303_v41 = vpop.permute.xlu0 %1311  ;;  %v3827_v6 = vld [vmem:[%s6417_s4 + $0x120] sm:$0xff] }
 0x10e   :  { %1965 = vperm.xlu0 %4402, %v3796_v23   ;;  %4120 = vmatprep.subr.bf16.mxu1 %v264_v32  ;;  %v3826_v23 = vld [vmem:[%s6417_s4 + $0x118] sm:$0xff] }
 0x110   :  { %v5320_v11 = vpop.permute.xlu1 %1306 }
 0x111   :  { %4121 = vmatpush3.bf16.msra.mxu1 %v264_v32  ;;  %2272 = vperm.xlu1 %4403, %v3838_v26   ;;  %6458 = vst [vmem:[#allocation36_spill] sm:$0xff] %v5320_v11  ;;  %v5325_v59 = vpop.permute.xlu0 %1301  ;;  %v3825_v32 = vld [vmem:[%s6417_s4 + $0x110] sm:$0xff]  ;;  %v3823_v26 = vld [vmem:[%s6417_s4 + $0x100] sm:$0xff]  ;;  %s1163_s4 = sadd.f32 1.0, %s3685_s18 }
 0x112   :  { %2267 = vperm.xlu0 %4402, %v3837_v50   ;;  %4122 = vmatprep.subr.bf16.mxu1 %v263_v18 }
 0x114   :  { %v5336_v46 = vpop.permute.xlu1 %1296 }
 0x115   :  { %4123 = vmatpush3.bf16.msra.mxu1 %v263_v18  ;;  %2262 = vperm.xlu1 %4403, %v3836_v55   ;;  %6459 = vst [vmem:[#allocation37_spill] sm:$0xff] %v5336_v46  ;;  %v5341_v2 = vpop.permute.xlu0 %1291  ;;  %v4412_v18 = vld [vmem:[%s6416_s3 + $0x38] sm:$0xff]  }
 0x116   :  { %2257 = vperm.xlu0 %4402, %v3835_v3   ;;  %4172 = vmatprep.subr.bf16.mxu1 %v4506_v33  ;;  %6460 = vst [vmem:[#allocation38_spill] sm:$0xff] %v5341_v2  ;;  %v3878_v55 = vld [vmem:[%s6419_s6 + $0x178] sm:$0xff]  ;;  %v3877_v3 = vld [vmem:[%s6419_s6 + $0x170] sm:$0xff] }
 0x118   :  { %4125 = vmatmul.mubr.bf16.vlgmr.msra.gmra.mxu1 %v4406_v63  ;;  %v5352_v19 = vpop.permute.xlu1 %1286 }
 0x119   :  { %2252 = vperm.xlu1 %4403, %v3834_v49   ;;  %4128 = vmatprep.mubr.bf16.mxu1 %v4407_v17  ;;  %6461 = vst [vmem:[#allocation39_spill] sm:$0xff] %v5352_v19  ;;  %v5357_v50 = vpop.permute.xlu0 %1281  ;;  %v3876_v49 = vld [vmem:[%s6419_s6 + $0x168] sm:$0xff] }
 0x11a   :  { %2247 = vperm.xlu0 %4402, %v3833_v13   ;;  %4173 = vmatpush3.bf16.msra.mxu1 %v4506_v33  ;;  %6462 = vst [vmem:[#allocation40_spill] sm:$0xff] %v5357_v50  ;;  %v3875_v33 = vld [vmem:[%s6419_s6 + $0x160] sm:$0xff]  ;;  %v3902_v13 = vld [vmem:[%s6420_s7 + $0x178] sm:$0xff] }
 0x11c   :  { %v5368_v63 = vpop.permute.xlu1 %1276 }
 0x11d   :  { %2242 = vperm.xlu1 %4403, %v3832_v42   ;;  %6463 = vst [vmem:[#allocation41_spill] sm:$0xff] %v5368_v63  ;;  %v5370_v17 = vpop.permute.xlu0 %1271 }
 0x11e   :  { %2237 = vperm.xlu0 %4402, %v3831_v12   ;;  %6464 = vst [vmem:[#allocation42_spill] sm:$0xff] %v5370_v17  ;;  %v3901_v12 = vld [vmem:[%s6420_s7 + $0x170] sm:$0xff] }
 0x120   :  { %4129 = vmatmul.mubr.bf16.gmra.mxu1 %v4408_v29  ;;  %v5381_v42 = vpop.permute.xlu1 %1266 }
 0x121   :  { %2232 = vperm.xlu1 %4403, %v3830_v28   ;;  %4132 = vmatprep.mubr.bf16.mxu1 %v4409_v30  ;;  %6465 = vst [vmem:[#allocation43_spill] sm:$0xff] %v5381_v42  ;;  %v5386_v29 = vpop.permute.xlu0 %1261  ;;  %v3918_v30 = vld [vmem:[%s6421_s8 + $0x178] sm:$0xff]  ;;  %v3917_v28 = vld [vmem:[%s6421_s8 + $0x170] sm:$0xff] }
 0x122   :  { %2227 = vperm.xlu0 %4402, %v3829_v51   ;;  %6466 = vst [vmem:[#allocation44_spill] sm:$0xff] %v5386_v29 }
 0x124   :  { %v5394_v51 = vpop.permute.xlu1 %1256 }
 0x125   :  { %2222 = vperm.xlu1 %4403, %v3828_v7   ;;  %6467 = vst [vmem:[#allocation45_spill] sm:$0xff] %v5394_v51  ;;  %v5396_v7 = vpop.permute.xlu0 %1251 }
 0x126   :  { %2217 = vperm.xlu0 %4402, %v3827_v6   ;;  %6468 = vst [vmem:[#allocation46_spill] sm:$0xff] %v5396_v7  ;;  %v3874_v6 = vld [vmem:[%s6419_s6 + $0x158] sm:$0xff] }
 0x128   :  { %4133 = vmatmul.mubr.bf16.gmra.mxu1 %v4410_v35  ;;  %v3873_v35 = vld [vmem:[%s6419_s6 + $0x150] sm:$0xff] }
 0x129   :  { %2212 = vperm.xlu1 %4403, %v3826_v23   ;;  %4136 = vmatprep.mubr.bf16.mxu1 %v4411_v20  ;;  %v3900_v20 = vld [vmem:[%s6420_s7 + $0x168] sm:$0xff]  ;;  %v5407_v23 = vpop.permute.xlu1 %1246 }
 0x12a   :  { %2207 = vperm.xlu0 %4402, %v3825_v32   ;;  %6469 = vst [vmem:[#allocation47_spill] sm:$0xff] %v5407_v23  ;;  %v3899_v32 = vld [vmem:[%s6420_s7 + $0x160] sm:$0xff] }
 0x12d   :  { %2202 = vperm.xlu1 %4403, %v3824_v45   ;;  %v5412_v45 = vpop.permute.xlu0 %1241 }
 0x12e   :  { %2197 = vperm.xlu0 %4402, %v3823_v26   ;;  %6470 = vst [vmem:[#allocation48_spill] sm:$0xff] %v5412_v45  ;;  %v3916_v26 = vld [vmem:[%s6421_s8 + $0x168] sm:$0xff] }
 0x130   :  { %4137 = vmatmul.mubr.bf16.gmra.mxu1 %v4412_v18  ;;  %v3915_v18 = vld [vmem:[%s6421_s8 + $0x160] sm:$0xff] }
 0x131   :  { %2555 = vperm.xlu1 %4403, %v3878_v55   ;;  %v5420_v55 = vpop.permute.xlu1 %1529 }
 0x132   :  { %2550 = vperm.xlu0 %4402, %v3877_v3   ;;  %6471 = vst [vmem:[#allocation49_spill] sm:$0xff] %v5420_v55  ;;  %v5422_v3 = vpop.permute.xlu0 %1524 }
 0x133   :  { %6472 = vst [vmem:[#allocation50_spill] sm:$0xff] %v5422_v3 }
 0x135   :  { %2545 = vperm.xlu1 %4403, %v3876_v49   ;;  %v3872_v49 = vld [vmem:[%s6419_s6 + $0x148] sm:$0xff] }
 0x136   :  { %2540 = vperm.xlu0 %4402, %v3875_v33   ;;  %v3871_v33 = vld [vmem:[%s6419_s6 + $0x140] sm:$0xff] }
 0x139   :  { %2813 = vperm.xlu1 %4403, %v3902_v13   ;;  %v3898_v13 = vld [vmem:[%s6420_s7 + $0x158] sm:$0xff] }
 0x13a   :  { %2808 = vperm.xlu0 %4402, %v3901_v12   ;;  %v5433_v12 = vpop.permute.xlu1 %1539 }
 0x13b   :  { %6473 = vst [vmem:[#allocation51_spill] sm:$0xff] %v5433_v12 }
 0x13d   :  { %2926 = vperm.xlu1 %4403, %v3918_v30   ;;  %v3897_v30 = vld [vmem:[%s6420_s7 + $0x150] sm:$0xff] }
 0x13e   :  { %2921 = vperm.xlu0 %4402, %v3917_v28   ;;  %v5438_v28 = vpop.permute.xlu0 %1534 }
 0x13f   :  { %6474 = vst [vmem:[#allocation52_spill] sm:$0xff] %v5438_v28 }
 0x141   :  { %2535 = vperm.xlu1 %4403, %v3874_v6   ;;  %v3914_v6 = vld [vmem:[%s6421_s8 + $0x158] sm:$0xff] }
 0x142   :  { %2530 = vperm.xlu0 %4402, %v3873_v35   ;;  %v3913_v35 = vld [vmem:[%s6421_s8 + $0x150] sm:$0xff] }
 0x145   :  { %2803 = vperm.xlu1 %4403, %v3900_v20   ;;  %v5446_v20 = vpop.permute.xlu1 %1787 }
 0x146   :  { %2798 = vperm.xlu0 %4402, %v3899_v32   ;;  %6475 = vst [vmem:[#allocation53_spill] sm:$0xff] %v5446_v20  ;;  %v5448_v32 = vpop.permute.xlu0 %1782  ;;  %v3868_v20 = vld [vmem:[%s6419_s6 + $0x128] sm:$0xff] }
 0x147   :  { %6476 = vst [vmem:[#allocation54_spill] sm:$0xff] %v5448_v32 }
 0x149   :  { %2916 = vperm.xlu1 %4403, %v3916_v26   ;;  %v3870_v26 = vld [vmem:[%s6419_s6 + $0x138] sm:$0xff] }
 0x14a   :  { %2911 = vperm.xlu0 %4402, %v3915_v18   ;;  %v3869_v18 = vld [vmem:[%s6419_s6 + $0x130] sm:$0xff] }
 0x14d   :  { %2525 = vperm.xlu1 %4403, %v3872_v49   ;;  %v3896_v49 = vld [vmem:[%s6420_s7 + $0x148] sm:$0xff] }
 0x14e   :  { %2520 = vperm.xlu0 %4402, %v3871_v33   ;;  %v5459_v33 = vpop.permute.xlu1 %1797 }
 0x14f   :  { %6477 = vst [vmem:[#allocation55_spill] sm:$0xff] %v5459_v33 }
 0x151   :  { %2793 = vperm.xlu1 %4403, %v3898_v13   ;;  %v3895_v13 = vld [vmem:[%s6420_s7 + $0x140] sm:$0xff] }
 0x152   :  { %2788 = vperm.xlu0 %4402, %v3897_v30   ;;  %v5464_v30 = vpop.permute.xlu0 %1792 }
 0x153   :  { %6478 = vst [vmem:[#allocation56_spill] sm:$0xff] %v5464_v30 }
 0x155   :  { %2906 = vperm.xlu1 %4403, %v3914_v6   ;;  %v3912_v6 = vld [vmem:[%s6421_s8 + $0x148] sm:$0xff] }
 0x156   :  { %2901 = vperm.xlu0 %4402, %v3913_v35   ;;  %v3911_v35 = vld [vmem:[%s6421_s8 + $0x140] sm:$0xff] }
 0x159   :  { %2515 = vperm.xlu1 %4403, %v3870_v26   ;;  %v5472_v26 = vpop.permute.xlu1 %1900 }
 0x15a   :  { %2510 = vperm.xlu0 %4402, %v3869_v18   ;;  %6479 = vst [vmem:[#allocation57_spill] sm:$0xff] %v5472_v26  ;;  %v5474_v18 = vpop.permute.xlu0 %1895  ;;  %v3910_v26 = vld [vmem:[%s6421_s8 + $0x138] sm:$0xff] }
 0x15b   :  { %6480 = vst [vmem:[#allocation58_spill] sm:$0xff] %v5474_v18 }
 0x15d   :  { %2783 = vperm.xlu1 %4403, %v3896_v49   ;;  %v3867_v49 = vld [vmem:[%s6419_s6 + $0x120] sm:$0xff]  ;;  %v5485_v30 = vpop.permute.xlu1 %1910 }
 0x15e   :  { %2778 = vperm.xlu0 %4402, %v3895_v13   ;;  %v3894_v13 = vld [vmem:[%s6420_s7 + $0x138] sm:$0xff]  ;;  %6481 = vst [vmem:[#allocation59_spill] sm:$0xff] %v5485_v30 }
 0x161   :  { %2896 = vperm.xlu1 %4403, %v3912_v6   ;;  %v3893_v6 = vld [vmem:[%s6420_s7 + $0x130] sm:$0xff] }
 0x162   :  { %2891 = vperm.xlu0 %4402, %v3911_v35   ;;  %v5490_v35 = vpop.permute.xlu0 %1905 }
 0x163   :  { %6482 = vst [vmem:[#allocation60_spill] sm:$0xff] %v5490_v35  ;;  %v3866_v35 = vld [vmem:[%s6419_s6 + $0x118] sm:$0xff] }
 0x165   :  { %2505 = vperm.xlu1 %4403, %v3868_v20   ;;  %v3909_v20 = vld [vmem:[%s6421_s8 + $0x130] sm:$0xff] }
 0x166   :  { %2500 = vperm.xlu0 %4402, %v3867_v49   ;;  %v5498_v49 = vpop.permute.xlu1 %1549  ;;  %v5500_v18 = vpop.permute.xlu0 %1544 }
 0x167   :  { %6483 = vst [vmem:[#allocation61_spill] sm:$0xff] %v5498_v49  ;;  %6484 = vst [vmem:[#allocation62_spill] sm:$0xff] %v5500_v18  ;;  %v3908_v49 = vld [vmem:[%s6421_s8 + $0x128] sm:$0xff] }
 0x168   :  { %v3864_v18 = vld [vmem:[%s6419_s6 + $0x108] sm:$0xff] }
 0x169   :  { %2773 = vperm.xlu1 %4403, %v3894_v13   ;;  %v3865_v13 = vld [vmem:[%s6419_s6 + $0x110] sm:$0xff] }
 0x16a   :  { %2768 = vperm.xlu0 %4402, %v3893_v6   ;;  %v3892_v6 = vld [vmem:[%s6420_s7 + $0x128] sm:$0xff]  ;;  %v5511_v30 = vpop.permute.xlu1 %1559 }
 0x16b   :  { %6485 = vst [vmem:[#allocation63_spill] sm:$0xff] %v5511_v30 }
 0x16d   :  { %2886 = vperm.xlu1 %4403, %v3910_v26   ;;  %v3891_v26 = vld [vmem:[%s6420_s7 + $0x120] sm:$0xff] }
 0x16e   :  { %2881 = vperm.xlu0 %4402, %v3909_v20   ;;  %v5516_v20 = vpop.permute.xlu0 %1554 }
 0x16f   :  { %6486 = vst [vmem:[#allocation64_spill] sm:$0xff] %v5516_v20 }
 0x171   :  { %2495 = vperm.xlu1 %4403, %v3866_v35   ;;  %v3907_v35 = vld [vmem:[%s6421_s8 + $0x120] sm:$0xff] }
 0x172   :  { %2490 = vperm.xlu0 %4402, %v3865_v13   ;;  %v5524_v13 = vpop.permute.xlu1 %1807  ;;  %v5526_v30 = vpop.permute.xlu0 %1802 }
 0x173   :  { %6487 = vst [vmem:[#allocation65_spill] sm:$0xff] %v5524_v13  ;;  %6488 = vst [vmem:[#allocation66_spill] sm:$0xff] %v5526_v30  ;;  %v3906_v13 = vld [vmem:[%s6421_s8 + $0x118] sm:$0xff] }
 0x175   :  { %2763 = vperm.xlu1 %4403, %v3892_v6   ;;  %v3863_v6 = vld [vmem:[%s6419_s6 + $0x100] sm:$0xff] }
 0x176   :  { %2758 = vperm.xlu0 %4402, %v3891_v26   ;;  %v3890_v26 = vld [vmem:[%s6420_s7 + $0x118] sm:$0xff]  ;;  %v5537_v20 = vpop.permute.xlu1 %1817 }
 0x177   :  { %6489 = vst [vmem:[#allocation67_spill] sm:$0xff] %v5537_v20 }
 0x179   :  { %2876 = vperm.xlu1 %4403, %v3908_v49   ;;  %v3889_v49 = vld [vmem:[%s6420_s7 + $0x110] sm:$0xff] }
 0x17a   :  { %2871 = vperm.xlu0 %4402, %v3907_v35   ;;  %v5542_v35 = vpop.permute.xlu0 %1812 }
 0x17b   :  { %6490 = vst [vmem:[#allocation68_spill] sm:$0xff] %v5542_v35  ;;  %v3888_v35 = vld [vmem:[%s6420_s7 + $0x108] sm:$0xff] }
 0x17d   :  { %2485 = vperm.xlu1 %4403, %v3864_v18   ;;  %v3905_v18 = vld [vmem:[%s6421_s8 + $0x110] sm:$0xff] }
 0x17e   :  { %2480 = vperm.xlu0 %4402, %v3863_v6   ;;  %v5550_v6 = vpop.permute.xlu1 %1920  ;;  %v5552_v20 = vpop.permute.xlu0 %1915 }
 0x17f   :  { %6491 = vst [vmem:[#allocation69_spill] sm:$0xff] %v5550_v6  ;;  %6492 = vst [vmem:[#allocation70_spill] sm:$0xff] %v5552_v20  ;;  %v2984_v6 = vld [vmem:[%s6423_s10 + $0x78] sm:$0xff] }
 0x181   :  { %2753 = vperm.xlu1 %4403, %v3890_v26   ;;  %v3887_v26 = vld [vmem:[%s6420_s7 + $0x100] sm:$0xff] }
 0x182   :  { %2748 = vperm.xlu0 %4402, %v3889_v49   ;;  %v3904_v49 = vld [vmem:[%s6421_s8 + $0x108] sm:$0xff]  ;;  %v5563_v30 = vpop.permute.xlu1 %1930 }
 0x183   :  { %6493 = vst [vmem:[#allocation71_spill] sm:$0xff] %v5563_v30 }
 0x185   :  { %2866 = vperm.xlu1 %4403, %v3906_v13   ;;  %v3903_v13 = vld [vmem:[%s6421_s8 + $0x100] sm:$0xff] }
 0x186   :  { %2861 = vperm.xlu0 %4402, %v3905_v18   ;;  %v5568_v18 = vpop.permute.xlu0 %1925 }
 0x187   :  { %6494 = vst [vmem:[#allocation72_spill] sm:$0xff] %v5568_v18  ;;  %v2982_v18 = vld [vmem:[%s6423_s10 + $0x68] sm:$0xff] }
 0x189   :  { %2743 = vperm.xlu1 %4403, %v3888_v35   ;;  %v2983_v35 = vld [vmem:[%s6423_s10 + $0x70] sm:$0xff] }
 0x18a   :  { %2738 = vperm.xlu0 %4402, %v3887_v26   ;;  %v5576_v26 = vpop.permute.xlu1 %1569  ;;  %v5578_v20 = vpop.permute.xlu0 %1564 }
 0x18b   :  { %6495 = vst [vmem:[#allocation73_spill] sm:$0xff] %v5576_v26  ;;  %6496 = vst [vmem:[#allocation74_spill] sm:$0xff] %v5578_v20  ;;  %v4413_v26 = vld [vmem:[%s6418_s5] sm:$0xff]  }
 0x18c   :  { %4156 = vmatprep.mubr.bf16.mxu0 %v4413_v26  ;;  %v2974_v26 = vld [vmem:[%s6423_s10 + $0x28] sm:$0xff] }
 0x18d   :  { %2856 = vperm.xlu1 %4403, %v3904_v49   ;;  %v2981_v49 = vld [vmem:[%s6423_s10 + $0x60] sm:$0xff] }
 0x18e   :  { %2851 = vperm.xlu0 %4402, %v3903_v13   ;;  %v2980_v13 = vld [vmem:[%s6423_s10 + $0x58] sm:$0xff]  ;;  %v5589_v30 = vpop.permute.xlu1 %1579 }
 0x18f   :  { %6497 = vst [vmem:[#allocation75_spill] sm:$0xff] %v5589_v30 }
 0x191   :  { %3062 = vperm.xlu1 %4403, %v2984_v6   ;;  %v2979_v6 = vld [vmem:[%s6423_s10 + $0x50] sm:$0xff] }
 0x192   :  { %3057 = vperm.xlu0 %4402, %v2983_v35   ;;  %v5594_v35 = vpop.permute.xlu0 %1574  ;;  %v5605_v30 = vpop.permute.xlu1 %1827 }
 0x193   :  { %6498 = vst [vmem:[#allocation76_spill] sm:$0xff] %v5594_v35  ;;  %6499 = vst [vmem:[#allocation77_spill] sm:$0xff] %v5605_v30  ;;  %v2972_v30 = vld [vmem:[%s6423_s10 + $0x18] sm:$0xff] }
 0x195   :  { %3052 = vperm.xlu1 %4403, %v2982_v18   ;;  %v2978_v18 = vld [vmem:[%s6423_s10 + $0x48] sm:$0xff] }
 0x196   :  { %3047 = vperm.xlu0 %4402, %v2981_v49   ;;  %v2977_v49 = vld [vmem:[%s6423_s10 + $0x40] sm:$0xff]  ;;  %v5607_v20 = vpop.permute.xlu0 %1822  ;;  %v5618_v35 = vpop.permute.xlu1 %1837 }
 0x197   :  { %6500 = vst [vmem:[#allocation78_spill] sm:$0xff] %v5607_v20  ;;  %6501 = vst [vmem:[#allocation79_spill] sm:$0xff] %v5618_v35 }
 0x199   :  { %3042 = vperm.xlu1 %4403, %v2980_v13   ;;  %v2976_v13 = vld [vmem:[%s6423_s10 + $0x38] sm:$0xff] }
 0x19a   :  { %3037 = vperm.xlu0 %4402, %v2979_v6   ;;  %v2975_v6 = vld [vmem:[%s6423_s10 + $0x30] sm:$0xff] }
 0x19d   :  { %3032 = vperm.xlu1 %4403, %v2978_v18   ;;  %v2973_v18 = vld [vmem:[%s6423_s10 + $0x20] sm:$0xff] }
 0x19e   :  { %3027 = vperm.xlu0 %4402, %v2977_v49   ;;  %v5623_v49 = vpop.permute.xlu0 %1832 }
 0x19f   :  { %6502 = vst [vmem:[#allocation80_spill] sm:$0xff] %v5623_v49  ;;  %v2970_v49 = vld [vmem:[%s6423_s10 + $0x8] sm:$0xff] }
 0x1a1   :  { %3022 = vperm.xlu1 %4403, %v2976_v13   ;;  %v2971_v13 = vld [vmem:[%s6423_s10 + $0x10] sm:$0xff] }
 0x1a2   :  { %3017 = vperm.xlu0 %4402, %v2975_v6   ;;  %v5631_v6 = vpop.permute.xlu1 %1940  ;;  %v5633_v20 = vpop.permute.xlu0 %1935 }
 0x1a3   :  { %6503 = vst [vmem:[#allocation81_spill] sm:$0xff] %v5631_v6  ;;  %6504 = vst [vmem:[#allocation82_spill] sm:$0xff] %v5633_v20  ;;  %v3253_v6 = vld [vmem:[%s6425_s12 + $0x18] sm:$0xff] }
 0x1a5   :  { %3012 = vperm.xlu1 %4403, %v2974_v26   ;;  %v2969_v26 = vld [vmem:[%s6423_s10] sm:$0xff] }
 0x1a6   :  { %3007 = vperm.xlu0 %4402, %v2973_v18   ;;  %v3251_v18 = vld [vmem:[%s6425_s12 + $0x8] sm:$0xff]  ;;  %v5644_v35 = vpop.permute.xlu1 %1950 }
 0x1a7   :  { %6505 = vst [vmem:[#allocation83_spill] sm:$0xff] %v5644_v35 }
 0x1a9   :  { %3002 = vperm.xlu1 %4403, %v2972_v30   ;;  %v3250_v30 = vld [vmem:[%s6425_s12] sm:$0xff] }
 0x1aa   :  { %2997 = vperm.xlu0 %4402, %v2971_v13   ;;  %v5649_v13 = vpop.permute.xlu0 %1945 }
 0x1ab   :  { %6506 = vst [vmem:[#allocation84_spill] sm:$0xff] %v5649_v13  ;;  %v3255_v13 = vld [vmem:[%s6425_s12 + $0x28] sm:$0xff] }
 0x1ad   :  { %2992 = vperm.xlu1 %4403, %v2970_v49   ;;  %v3252_v49 = vld [vmem:[%s6425_s12 + $0x10] sm:$0xff] }
 0x1ae   :  { %2987 = vperm.xlu0 %4402, %v2969_v26   ;;  %v5657_v26 = vpop.permute.xlu1 %1589  ;;  %v5659_v20 = vpop.permute.xlu0 %1584 }
 0x1af   :  { %6507 = vst [vmem:[#allocation85_spill] sm:$0xff] %v5657_v26  ;;  %6508 = vst [vmem:[#allocation86_spill] sm:$0xff] %v5659_v20  ;;  %v3259_v26 = vld [vmem:[%s6425_s12 + $0x48] sm:$0xff]  ;;  %v3261_v20 = vld [vmem:[%s6425_s12 + $0x58] sm:$0xff] }
 0x1b1   :  { %3273 = vperm.xlu1 %4403, %v3251_v18   ;;  %v3254_v18 = vld [vmem:[%s6425_s12 + $0x20] sm:$0xff] }
 0x1b2   :  { %3268 = vperm.xlu0 %4402, %v3250_v30   ;;  %v3257_v30 = vld [vmem:[%s6425_s12 + $0x38] sm:$0xff]  ;;  %v5670_v35 = vpop.permute.xlu1 %1599 }
 0x1b3   :  { %6509 = vst [vmem:[#allocation87_spill] sm:$0xff] %v5670_v35 }
 0x1b5   :  { %3283 = vperm.xlu1 %4403, %v3253_v6   ;;  %v3256_v6 = vld [vmem:[%s6425_s12 + $0x30] sm:$0xff] }
 0x1b6   :  { %3278 = vperm.xlu0 %4402, %v3252_v49   ;;  %v5675_v49 = vpop.permute.xlu0 %1594 }
 0x1b7   :  { %6510 = vst [vmem:[#allocation88_spill] sm:$0xff] %v5675_v49 }
 0x1b9   :  { %3293 = vperm.xlu1 %4403, %v3255_v13   ;;  %v3258_v13 = vld [vmem:[%s6425_s12 + $0x40] sm:$0xff] }
 0x1ba   :  { %3288 = vperm.xlu0 %4402, %v3254_v18   ;;  %v5683_v18 = vpop.permute.xlu1 %1847  ;;  %v5685_v35 = vpop.permute.xlu0 %1842 }
 0x1bb   :  { %6511 = vst [vmem:[#allocation89_spill] sm:$0xff] %v5683_v18  ;;  %6512 = vst [vmem:[#allocation90_spill] sm:$0xff] %v5685_v35  ;;  %v3265_v18 = vld [vmem:[%s6425_s12 + $0x78] sm:$0xff] }
 0x1bd   :  { %3303 = vperm.xlu1 %4403, %v3257_v30   ;;  %v3260_v30 = vld [vmem:[%s6425_s12 + $0x50] sm:$0xff] }
 0x1be   :  { %3298 = vperm.xlu0 %4402, %v3256_v6   ;;  %v3263_v6 = vld [vmem:[%s6425_s12 + $0x68] sm:$0xff]  ;;  %v5696_v49 = vpop.permute.xlu1 %1857 }
 0x1bf   :  { %6513 = vst [vmem:[#allocation91_spill] sm:$0xff] %v5696_v49 }
 0x1c1   :  { %3313 = vperm.xlu1 %4403, %v3259_v26   ;;  %v3262_v26 = vld [vmem:[%s6425_s12 + $0x60] sm:$0xff] }
 0x1c2   :  { %3308 = vperm.xlu0 %4402, %v3258_v13   ;;  %v5701_v13 = vpop.permute.xlu0 %1852 }
 0x1c3   :  { %6514 = vst [vmem:[#allocation92_spill] sm:$0xff] %v5701_v13 }
 0x1c5   :  { %3323 = vperm.xlu1 %4403, %v3261_v20   ;;  %v3264_v20 = vld [vmem:[%s6425_s12 + $0x70] sm:$0xff] }
 0x1c6   :  { %3318 = vperm.xlu0 %4402, %v3260_v30   ;;  %v5709_v30 = vpop.permute.xlu1 %1960  ;;  %v5711_v49 = vpop.permute.xlu0 %1955 }
 0x1c7   :  { %6515 = vst [vmem:[#allocation93_spill] sm:$0xff] %v5709_v30  ;;  %6516 = vst [vmem:[#allocation94_spill] sm:$0xff] %v5711_v49 }
 0x1c9   :  { %3333 = vperm.xlu1 %4403, %v3263_v6  }
 0x1ca   :  { %3328 = vperm.xlu0 %4402, %v3262_v26  }
 0x1cd   :  { %3343 = vperm.xlu1 %4403, %v3265_v18  }
 0x1ce   :  { %3338 = vperm.xlu0 %4402, %v3264_v20  }
 0x1d8   :  { %v4126_v35 = vpop.f32.mrf.mxu1 }
 0x1da   :  { %v449_v33 = vpop.f32.mrf.mxu1 }
 0x1dc   :  { %v4127_v32 = vpop.f32.mrf.mxu1 }
 0x1de   :  { %v452_v13 = vpop.f32.mrf.mxu1 }
 0x1e0   :  { %v4130_v6 = vpop.f32.mrf.mxu1 }
 0x1e2   :  { %v465_v26 = vpop.f32.mrf.mxu1 }
 0x1e4   :  { %v4131_v55 = vpop.f32.mrf.mxu1 }
 0x1e6   :  { %v468_v12 = vpop.f32.mrf.mxu1 }
 0x1e8   :  { %v4134_v3 = vpop.f32.mrf.mxu1 }
 0x1e9   :  { %v490_v19 = vadd.f32 %v4134_v3, %v4909_v48  ;;  %v4417_v3 = vld [vmem:[%s6418_s5 + $0x20] sm:$0xff]  }
 0x1ea   :  { %v481_v28 = vpop.f32.mrf.mxu1 }
 0x1ec   :  { %v4135_v45 = vpop.f32.mrf.mxu1 }
 0x1ed   :  { %v493_v42 = vadd.f32 %v4135_v45, %v4907_v47  ;;  %v477_v47 = vadd.f32 %v4131_v55, %v4930_v56 }
 0x1ee   :  { %v484_v23 = vpop.f32.mrf.mxu1 }
 0x1ef   :  { %v523_v25 = vmax.f32 %v493_v42, 0.0 }
 0x1f0   :  { %v4138_v7 = vpop.f32.mrf.mxu1 }
 0x1f1   :  { %v506_v30 = vadd.f32 %v4138_v7, %v4887_v39  ;;  %v485_v39 = vadd.f32 %v484_v23, %v4920_v52 }
 0x1f2   :  { %v497_v51 = vpop.f32.mrf.mxu1 }
 0x1f3   :  { %v498_v49 = vadd.f32 %v497_v51, %v4889_v40  ;;  %v526_v17 = vmax.f32 %v506_v30, 0.0  ;;  %v522_v40 = vmax.f32 %v490_v19, 0.0  ;;  %v521_v45 = vmax.f32 %v485_v39, 0.0 }
 0x1f4   :  { %v4139_v18 = vpop.f32.mrf.mxu1 }
 0x1f5   :  { %v509_v20 = vadd.f32 %v4139_v18, %v4897_v43  ;;  %v524_v2 = vmax.f32 %v498_v49, 0.0  ;;  %v482_v43 = vadd.f32 %v481_v28, %v4922_v53  ;;  %v549_v51 = vpack.c.bf16 %v523_v25, %v522_v40  ;;  %v4419_v28 = vld [vmem:[%s6418_s5 + $0x30] sm:$0xff]  }
 0x1f6   :  { %v500_v29 = vpop.f32.mrf.mxu1  ;;  %v461_v53 = vadd.f32 %v4127_v32, %v4950_v0  ;;  %v458_v25 = vadd.f32 %v4126_v35, %v4952_v1  ;;  %v4414_v1 = vld [vmem:[%s6418_s5 + $0x8] sm:$0xff]   ;;  %v4420_v32 = vld [vmem:[%s6418_s5 + $0x38] sm:$0xff]  }
 0x1f7   :  { %v527_v63 = vmax.f32 %v509_v20, 0.0  ;;  %v501_v50 = vadd.f32 %v500_v29, %v4899_v44  ;;  %v474_v44 = vadd.f32 %v4130_v6, %v4932_v57  ;;  %v520_v48 = vmax.f32 %v482_v43, 0.0 }
 0x1f8   :  { %v515_v57 = vmax.f32 %v461_v53, 0.0  ;;  %v450_v29 = vadd.f32 %v449_v33, %v4962_v5  ;;  %v4416_v5 = vld [vmem:[%s6418_s5 + $0x18] sm:$0xff]  }
 0x1f9   :  { %v551_v11 = vpack.c.bf16 %v527_v63, %v526_v17  ;;  %v525_v46 = vmax.f32 %v501_v50, 0.0  ;;  %v519_v50 = vmax.f32 %v477_v47, 0.0  ;;  %v469_v63 = vadd.f32 %v468_v12, %v4940_v60  ;;  %v4418_v12 = vld [vmem:[%s6418_s5 + $0x28] sm:$0xff]  }
 0x1fa   :  { %v548_v52 = vpack.c.bf16 %v521_v45, %v520_v48  ;;  %v453_v17 = vadd.f32 %v452_v13, %v4960_v4  ;;  %v514_v60 = vmax.f32 %v458_v25, 0.0  ;;  %v512_v0 = vmax.f32 %v450_v29, 0.0  ;;  %v4415_v4 = vld [vmem:[%s6418_s5 + $0x10] sm:$0xff]   ;;  %v6517_v45 = vld [vmem:[#allocation6_spill] sm:$0xff] }
 0x1fb   :  { %v550_v7 = vpack.c.bf16 %v525_v46, %v524_v2  ;;  %4140 = vmatprep.subr.bf16.mxu0 %v551_v11  ;;  %v518_v46 = vmax.f32 %v474_v44, 0.0  ;;  %v517_v56 = vmax.f32 %v469_v63, 0.0  ;;  %v6518_v44 = vld [vmem:[#allocation14_spill] sm:$0xff] }
 0x1fc   :  { %4141 = vmatpush3.bf16.msra.mxu0 %v551_v11  ;;  %v466_v11 = vadd.f32 %v465_v26, %v4942_v61  ;;  %v545_v61 = vpack.c.bf16 %v515_v57, %v514_v60  ;;  %v513_v23 = vmax.f32 %v453_v17, 0.0  ;;  %v6524_v25 = vld [vmem:[#allocation10_spill] sm:$0xff]  ;;  %v6525_v17 = vld [vmem:[#allocation13_spill] sm:$0xff] }
 0x1fd   :  { %4142 = vmatprep.subr.bf16.mxu0 %v550_v7  ;;  %v547_v2 = vpack.c.bf16 %v519_v50, %v518_v46  ;;  %v6519_v50 = vld [vmem:[#allocation5_spill] sm:$0xff] }
 0x1fe   :  { %v516_v19 = vmax.f32 %v466_v11, 0.0  ;;  %v544_v55 = vpack.c.bf16 %v513_v23, %v512_v0  ;;  %v6521_v46 = vld [vmem:[#allocation9_spill] sm:$0xff] }
 0x200   :  { %4143 = vmatpush3.bf16.msra.mxu0 %v550_v7  ;;  %v546_v42 = vpack.c.bf16 %v517_v56, %v516_v19 }
 0x201   :  { %4144 = vmatprep.subr.bf16.mxu0 %v549_v51 }
 0x204   :  { %4145 = vmatpush3.bf16.msra.mxu0 %v549_v51 }
 0x205   :  { %4146 = vmatprep.subr.bf16.mxu0 %v548_v52 }
 0x208   :  { %4147 = vmatpush3.bf16.msra.mxu0 %v548_v52  ;;  %v6520_v52 = vld [vmem:[#allocation12_spill] sm:$0xff] }
 0x209   :  { %4148 = vmatprep.subr.bf16.mxu0 %v547_v2 }
 0x20c   :  { %4149 = vmatpush3.bf16.msra.mxu0 %v547_v2 }
 0x20d   :  { %4150 = vmatprep.subr.bf16.mxu0 %v546_v42 }
 0x210   :  { %4151 = vmatpush3.bf16.msra.mxu0 %v546_v42 }
 0x211   :  { %4152 = vmatprep.subr.bf16.mxu0 %v545_v61 }
 0x214   :  { %4153 = vmatpush3.bf16.msra.mxu0 %v545_v61  ;;  %v6526_v61 = vld [vmem:[#allocation11_spill] sm:$0xff] }
 0x215   :  { %4154 = vmatprep.subr.bf16.mxu0 %v544_v55 }
 0x218   :  { %4155 = vmatpush3.bf16.msra.mxu0 %v544_v55 }
 0x21b   :  { %4157 = vmatmul.mubr.bf16.vlgmr.msra.gmra.mxu0 %v4414_v1 }
 0x21c   :  { %4160 = vmatprep.mubr.bf16.mxu0 %v4415_v4  ;;  %v6527_v4 = vld [vmem:[#allocation16_spill] sm:$0xff] }
 0x223   :  { %4161 = vmatmul.mubr.bf16.gmra.mxu0 %v4416_v5 }
 0x224   :  { %4164 = vmatprep.mubr.bf16.mxu0 %v4417_v3 }
 0x22b   :  { %4165 = vmatmul.mubr.bf16.gmra.mxu0 %v4418_v12  ;;  %v6528_v12 = vld [vmem:[#allocation18_spill] sm:$0xff] }
 0x22c   :  { %4168 = vmatprep.mubr.bf16.mxu0 %v4419_v28 }
 0x233   :  { %4169 = vmatmul.mubr.bf16.gmra.mxu0 %v4420_v32  ;;  %v6529_v32 = vld [vmem:[#allocation17_spill] sm:$0xff] }
 0x2db   :  { %v4158_v33 = vpop.f32.mrf.mxu0 }
 0x2dc   :  { %v739_v35 = vadd.f32 %v4158_v33, %v4982_v16 }
 0x2dd   :  { %v730_v49 = vpop.f32.mrf.mxu0 }
 0x2de   :  { %v731_v13 = vadd.f32 %v730_v49, %v4972_v9  ;;  %v795_v18 = vmax.f32 %v739_v35, 0.0  ;;  %v6530_v49 = vld [vmem:[#allocation15_spill] sm:$0xff] }
 0x2df   :  { %v4159_v30 = vpop.f32.mrf.mxu0 }
 0x2e0   :  { %v793_v6 = vmax.f32 %v731_v13, 0.0  ;;  %v742_v26 = vadd.f32 %v4159_v30, %v4980_v15  ;;  %v907_v16 = vmul.f32 %v6517_v45, %v795_v18  ;;  %v6531_v30 = vld [vmem:[#allocation26_spill] sm:$0xff]  ;;  %v6536_v45 = vld [vmem:[#allocation25_spill] sm:$0xff] }
 0x2e1   :  { %v733_v20 = vpop.f32.mrf.mxu0 }
 0x2e2   :  { %v796_v39 = vmax.f32 %v742_v26, 0.0  ;;  %v734_v7 = vadd.f32 %v733_v20, %v4970_v8  ;;  %v905_v43 = vmul.f32 %v4992_v24, %v793_v6  ;;  %v6522_v8 = vld [vmem:[#allocation8_spill] sm:$0xff]  ;;  %v6523_v24 = vld [vmem:[#allocation7_spill] sm:$0xff]  ;;  %v5770_v19 = vadd.f32 %v6524_v25, %v907_v16  ;;  %v6533_v20 = vld [vmem:[#allocation21_spill] sm:$0xff] }
 0x2e3   :  { %v4162_v40 = vpop.f32.mrf.mxu0  ;;  %v6532_v26 = vld [vmem:[#allocation24_spill] sm:$0xff] }
 0x2e4   :  { %v908_v47 = vmul.f32 %v5000_v31, %v796_v39  ;;  %v794_v51 = vmax.f32 %v734_v7, 0.0  ;;  %v755_v48 = vadd.f32 %v4162_v40, %v6518_v44  ;;  %v5764_v2 = vadd.f32 %v6522_v8, %v905_v43  ;;  %v6534_v40 = vld [vmem:[#allocation20_spill] sm:$0xff]  ;;  %v6537_v44 = vld [vmem:[#allocation22_spill] sm:$0xff] }
 0x2e5   :  { %v746_v9 = vpop.f32.mrf.mxu0 }
 0x2e6   :  { %v906_v63 = vmul.f32 %v6519_v50, %v794_v51  ;;  %v747_v15 = vadd.f32 %v746_v9, %v6520_v52  ;;  %v5761_v11 = vadd.f32 %v6521_v46, %v908_v47  ;;  %v799_v57 = vmax.f32 %v755_v48, 0.0  ;;  %v6535_v47 = vld [vmem:[#allocation19_spill] sm:$0xff] }
 0x2e7   :  { %v4163_v53 = vpop.f32.mrf.mxu0 }
 0x2e8   :  { %v5767_v56 = vadd.f32 %v6523_v24, %v906_v63  ;;  %v797_v31 = vmax.f32 %v747_v15, 0.0  ;;  %v758_v42 = vadd.f32 %v4163_v53, %v6525_v17  ;;  %v1034_v0 = vpack.c.bf16 %v5761_v11, %v5770_v19  ;;  %v6538_v53 = vld [vmem:[#allocation23_spill] sm:$0xff] }
 0x2e9   :  { %v749_v60 = vpop.f32.mrf.mxu0  ;;  %v911_v28 = vmul.f32 %v6528_v12, %v799_v57  ;;  %v6540_v57 = vld [vmem:[#allocation28_spill] sm:$0xff] }
 0x2ea   :  { %v1033_v29 = vpack.c.bf16 %v5767_v56, %v5764_v2  ;;  %v750_v23 = vadd.f32 %v749_v60, %v6526_v61  ;;  %v800_v55 = vmax.f32 %v758_v42, 0.0  ;;  %v909_v5 = vmul.f32 %v6527_v4, %v797_v31  ;;  %v6539_v31 = vld [vmem:[#allocation29_spill] sm:$0xff] }
 0x2eb   :  { %v4166_v1 = vpop.f32.mrf.mxu0  ;;  %v5797_v48 = vadd.f32 %v6537_v44, %v911_v28 }
 0x2ec   :  { %v798_v3 = vmax.f32 %v750_v23, 0.0  ;;  %4174 = vmatprep.mubr.msk.bf16.mxu1 %vm90_vm0, %v1033_v29  ;;  %v912_v33 = vmul.f32 %v6529_v32, %v800_v55  ;;  %v771_v6 = vadd.f32 %v4166_v1, %v6531_v30  ;;  %v5790_v43 = vadd.f32 %v6534_v40, %v909_v5  ;;  %v6541_v29 = vld [vmem:[#allocation30_spill] sm:$0xff]  ;;  %v6542_v55 = vld [vmem:[#allocation27_spill] sm:$0xff]  ;;  %v6543_v5 = vld [vmem:[#allocation33_spill] sm:$0xff] }
 0x2ed   :  { %v762_v35 = vpop.f32.mrf.mxu0  ;;  %4175 = vmatmul.mubr.msk.bf16.vlgmr.msra.gmra.mxu1 %vm90_vm0, %v1034_v0  ;;  %v6544_v32 = vld [vmem:[#allocation32_spill] sm:$0xff]  ;;  %v6546_v30 = vld [vmem:[#allocation34_spill] sm:$0xff] }
 0x2ee   :  { %v910_v13 = vmul.f32 %v6530_v49, %v798_v3  ;;  %v763_v18 = vadd.f32 %v762_v35, %v6532_v26  ;;  %v5787_v39 = vadd.f32 %v6533_v20, %v912_v33  ;;  %v803_v52 = vmax.f32 %v771_v6, 0.0  ;;  %v6545_v35 = vld [vmem:[#allocation31_spill] sm:$0xff] }
 0x2ef   :  { %v4167_v7 = vpop.f32.mrf.mxu0 }
 0x2f0   :  { %v5793_v51 = vadd.f32 %v6535_v47, %v910_v13  ;;  %v774_v16 = vadd.f32 %v4167_v7, %v6536_v45  ;;  %v801_v9 = vmax.f32 %v763_v18, 0.0  ;;  %v1036_v46 = vpack.c.bf16 %v5787_v39, %v5797_v48 }
 0x2f1   :  { %v765_v50 = vpop.f32.mrf.mxu0  ;;  %v915_v61 = vmul.f32 %v6541_v29, %v803_v52 }
 0x2f2   :  { %v1035_v63 = vpack.c.bf16 %v5793_v51, %v5790_v43  ;;  %v804_v15 = vmax.f32 %v774_v16, 0.0  ;;  %v766_v8 = vadd.f32 %v765_v50, %v6538_v53  ;;  %v913_v17 = vmul.f32 %v6540_v57, %v801_v9 }
 0x2f3   :  { %v4170_v24 = vpop.f32.mrf.mxu0 }
 0x2f4   :  { %v916_v25 = vmul.f32 %v6539_v31, %v804_v15  ;;  %4178 = vmatprep.mubr.msk.bf16.mxu1 %vm90_vm0, %v1035_v63  ;;  %v802_v42 = vmax.f32 %v766_v8, 0.0  ;;  %v787_v23 = vadd.f32 %v4170_v24, %v5204_v62  ;;  %v5817_v33 = vadd.f32 %v6544_v32, %v913_v17 }
 0x2f5   :  { %v778_v60 = vpop.f32.mrf.mxu0  ;;  %4179 = vmatmul.mubr.msk.bf16.gmra.mxu1 %vm90_vm0, %v1036_v46  ;;  %v1027_v62 = vadd.f32 %v6546_v30, %v915_v61 }
 0x2f6   :  { %v779_v0 = vadd.f32 %v778_v60, %v5182_v54  ;;  %v914_v1 = vmul.f32 %v6542_v55, %v802_v42  ;;  %v5813_v3 = vadd.f32 %v6543_v5, %v916_v25  ;;  %v807_v6 = vmax.f32 %v787_v23, 0.0 }
 0x2f7   :  { %v4171_v4 = vpop.f32.mrf.mxu0 }
 0x2f8   :  { %v805_v12 = vmax.f32 %v779_v0, 0.0  ;;  %v790_v28 = vadd.f32 %v4171_v4, %v5197_v21  ;;  %v5820_v49 = vadd.f32 %v6545_v35, %v914_v1  ;;  %v1038_v20 = vpack.c.bf16 %v5813_v3, %v1027_v62 }
 0x2f9   :  { %v781_v13 = vpop.f32.mrf.mxu0  ;;  %v919_v47 = vmul.f32 %v5251_v27, %v807_v6  ;;  %v1164_v27 = vstv %s1163_s4 }
 0x2fa   :  { %v808_v54 = vmax.f32 %v790_v28, 0.0  ;;  %v782_v26 = vadd.f32 %v781_v13, %v5178_v36  ;;  %v1037_v18 = vpack.c.bf16 %v5820_v49, %v5817_v33  ;;  %v917_v21 = vmul.f32 %v5222_v38, %v805_v12 }
 0x2fb   :  { %v1031_v9 = vadd.f32 %v5284_v58, %v919_v47  ;;  %v1165_v52 = vmul.f32 %v1164_v27, %v5764_v2  ;;  %v1166_v46 = vmul.f32 %v1164_v27, %v5767_v56  ;;  %v1171_v42 = vmul.f32 %v1164_v27, %v5797_v48 }
 0x2fc   :  { %v920_v7 = vmul.f32 %v5241_v10, %v808_v54  ;;  %v806_v40 = vmax.f32 %v782_v26, 0.0  ;;  %4182 = vmatprep.mubr.msk.bf16.mxu1 %vm90_vm0, %v1037_v18  ;;  %v1029_v36 = vadd.f32 %v5268_v14, %v917_v21  ;;  %v1169_v29 = vmul.f32 %v1164_v27, %v5790_v43 }
 0x2fd   :  { %4183 = vmatmul.mubr.msk.bf16.gmra.mxu1 %vm90_vm0, %v1038_v20  ;;  %v1170_v2 = vmul.f32 %v1164_v27, %v5793_v51  ;;  %v1175_v12 = vmul.f32 %v1164_v27, %v1027_v62  ;;  %v1176_v28 = vmul.f32 %v1164_v27, %v5813_v3  ;;  %v1174_v43 = vmul.f32 %v1164_v27, %v5820_v49  ;;  %v4422_v49 = vld [vmem:[%s6416_s3 + $0x48] sm:$0xff]  }
 0x2fe   :  { %v918_v45 = vmul.f32 %v5217_v37, %v806_v40  ;;  %v1032_v16 = vadd.f32 %v5279_v22, %v920_v7  ;;  %v4421_v37 = vld [vmem:[%s6416_s3 + $0x40] sm:$0xff]   ;;  %v1168_v22 = vmul.f32 %v1164_v27, %v5761_v11  ;;  %v1179_v20 = vmul.f32 %v1164_v27, %v1031_v9 }
 0x2ff   :  { %4206 = vmatprep.mubr.bf16.mxu0 %v4421_v37  ;;  %v1177_v40 = vmul.f32 %v1164_v27, %v1029_v36 }
 0x300   :  { %v1030_v44 = vadd.f32 %v5265_v34, %v918_v45  ;;  %v1040_v50 = vpack.c.bf16 %v1032_v16, %v1031_v9  ;;  %v1167_v34 = vmul.f32 %v1164_v27, %v5770_v19  ;;  %v1172_v19 = vmul.f32 %v1164_v27, %v5787_v39  ;;  %v4425_v9 = vld [vmem:[%s6416_s3 + $0x60] sm:$0xff]  }
 0x301   :  { %v1173_v39 = vmul.f32 %v1164_v27, %v5817_v33  ;;  %v1180_v21 = vmul.f32 %v1164_v27, %v1032_v16  ;;  %v4507_v16 = vld [vmem:[%s6414_s1] sm:$0xff]  }
 0x302   :  { %v1039_v38 = vpack.c.bf16 %v1030_v44, %v1029_v36  ;;  %v1178_v47 = vmul.f32 %v1164_v27, %v1030_v44  ;;  %v4423_v36 = vld [vmem:[%s6416_s3 + $0x50] sm:$0xff]   ;;  %v4424_v44 = vld [vmem:[%s6416_s3 + $0x58] sm:$0xff]  }
 0x303   :  { %v4427_v27 = vld [vmem:[%s6416_s3 + $0x70] sm:$0xff]  }
 0x304   :  { %4186 = vmatprep.mubr.msk.bf16.mxu1 %vm90_vm0, %v1039_v38 }
 0x305   :  { %4187 = vmatmul.mubr.msk.bf16.gmra.mxu1 %vm90_vm0, %v1040_v50 }
 0x3ad   :  { %v4176_v10 = vpop.f32.mrf.mxu1 }
 0x3ae   :  { %v1183_v63 = vadd.f32 %v4176_v10, %v1167_v34  ;;  %v4426_v10 = vld [vmem:[%s6416_s3 + $0x68] sm:$0xff]   ;;  %v4429_v34 = vld [vmem:[%s6418_s5 + $0x40] sm:$0xff]  }
 0x3af   :  { %v1099_v14 = vpop.f32.mrf.mxu1  ;;  %4238 = vmatprep.mubr.bf16.mxu1 %v4429_v34 }
 0x3b0   :  { %v1181_v8 = vadd.f32 %v1165_v52, %v1099_v14  ;;  %v4428_v14 = vld [vmem:[%s6416_s3 + $0x78] sm:$0xff]  }
 0x3b1   :  { %v4177_v58 = vpop.f32.mrf.mxu1 }
 0x3b2   :  { %v1184_v15 = vadd.f32 %v4177_v58, %v1168_v22 }
 0x3b3   :  { %v1102_v53 = vpop.f32.mrf.mxu1 }
 0x3b4   :  { %v1215_v24 = vpack.c.bf16 %v1184_v15, %v1183_v63  ;;  %v1182_v31 = vadd.f32 %v1166_v46, %v1102_v53 }
 0x3b5   :  { %v4180_v25 = vpop.f32.mrf.mxu1 }
 0x3b6   :  { %v1214_v57 = vpack.c.bf16 %v1182_v31, %v1181_v8  ;;  %v1187_v11 = vadd.f32 %v4180_v25, %v1171_v42 }
 0x3b7   :  { %v1115_v17 = vpop.f32.mrf.mxu1 }
 0x3b8   :  { %v1185_v56 = vadd.f32 %v1169_v29, %v1115_v17  ;;  %v6547_v29 = vld [vmem:[#allocation35_spill] sm:$0xff] }
 0x3b9   :  { %v4181_v60 = vpop.f32.mrf.mxu1 }
 0x3ba   :  { %v1188_v61 = vadd.f32 %v4181_v60, %v1172_v19 }
 0x3bb   :  { %v1118_v23 = vpop.f32.mrf.mxu1 }
 0x3bc   :  { %v1217_v0 = vpack.c.bf16 %v1188_v61, %v1187_v11  ;;  %v1186_v55 = vadd.f32 %v1170_v2, %v1118_v23  ;;  %v6548_v23 = vld [vmem:[#allocation37_spill] sm:$0xff] }
 0x3bd   :  { %v4184_v4 = vpop.f32.mrf.mxu1 }
 0x3be   :  { %v1216_v1 = vpack.c.bf16 %v1186_v55, %v1185_v56  ;;  %v1191_v32 = vadd.f32 %v4184_v4, %v1175_v12 }
 0x3bf   :  { %v1131_v5 = vpop.f32.mrf.mxu1 }
 0x3c0   :  { %v1189_v30 = vadd.f32 %v1173_v39, %v1131_v5  ;;  %v6550_v5 = vld [vmem:[#allocation38_spill] sm:$0xff] }
 0x3c1   :  { %v4185_v48 = vpop.f32.mrf.mxu1 }
 0x3c2   :  { %v1192_v35 = vadd.f32 %v4185_v48, %v1176_v28 }
 0x3c3   :  { %v1134_v13 = vpop.f32.mrf.mxu1 }
 0x3c4   :  { %v1219_v51 = vpack.c.bf16 %v1192_v35, %v1191_v32  ;;  %v1190_v6 = vadd.f32 %v1174_v43, %v1134_v13  ;;  %v6551_v35 = vld [vmem:[#allocation39_spill] sm:$0xff]  ;;  %v6552_v13 = vld [vmem:[#allocation40_spill] sm:$0xff] }
 0x3c5   :  { %v4188_v54 = vpop.f32.mrf.mxu1 }
 0x3c6   :  { %v1218_v26 = vpack.c.bf16 %v1190_v6, %v1189_v30  ;;  %v1195_v62 = vadd.f32 %v4188_v54, %v1179_v20 }
 0x3c7   :  { %v1147_v18 = vpop.f32.mrf.mxu1 }
 0x3c8   :  { %v1193_v38 = vadd.f32 %v1177_v40, %v1147_v18  ;;  %v6554_v18 = vld [vmem:[#allocation42_spill] sm:$0xff] }
 0x3c9   :  { %v4189_v7 = vpop.f32.mrf.mxu1 }
 0x3ca   :  { %v1196_v3 = vadd.f32 %v4189_v7, %v1180_v21 }
 0x3cb   :  { %v1150_v45 = vpop.f32.mrf.mxu1 }
 0x3cc   :  { %v1221_v33 = vpack.c.bf16 %v1196_v3, %v1195_v62  ;;  %v1194_v50 = vadd.f32 %v1178_v47, %v1150_v45  ;;  %v6555_v62 = vld [vmem:[#allocation43_spill] sm:$0xff]  ;;  %v6556_v45 = vld [vmem:[#allocation44_spill] sm:$0xff] }
 0x3ce   :  { %v1220_v37 = vpack.c.bf16 %v1194_v50, %v1193_v38  ;;  %4190 = vmatprep.subr.bf16.mxu0 %v1221_v33 }
 0x3cf   :  { %4191 = vmatpush3.bf16.msra.mxu0 %v1221_v33  ;;  %v6557_v33 = vld [vmem:[#allocation45_spill] sm:$0xff] }
 0x3d0   :  { %4192 = vmatprep.subr.bf16.mxu0 %v1220_v37 }
 0x3d3   :  { %4193 = vmatpush3.bf16.msra.mxu0 %v1220_v37 }
 0x3d4   :  { %4194 = vmatprep.subr.bf16.mxu0 %v1219_v51 }
 0x3d7   :  { %4195 = vmatpush3.bf16.msra.mxu0 %v1219_v51  ;;  %v6553_v51 = vld [vmem:[#allocation41_spill] sm:$0xff] }
 0x3d8   :  { %4196 = vmatprep.subr.bf16.mxu0 %v1218_v26 }
 0x3db   :  { %4197 = vmatpush3.bf16.msra.mxu0 %v1218_v26 }
 0x3dc   :  { %4198 = vmatprep.subr.bf16.mxu0 %v1217_v0 }
 0x3df   :  { %4199 = vmatpush3.bf16.msra.mxu0 %v1217_v0 }
 0x3e0   :  { %4200 = vmatprep.subr.bf16.mxu0 %v1216_v1 }
 0x3e3   :  { %4201 = vmatpush3.bf16.msra.mxu0 %v1216_v1  ;;  %v6549_v1 = vld [vmem:[#allocation36_spill] sm:$0xff] }
 0x3e4   :  { %4202 = vmatprep.subr.bf16.mxu0 %v1215_v24 }
 0x3e7   :  { %4203 = vmatpush3.bf16.msra.mxu0 %v1215_v24 }
 0x3e8   :  { %4204 = vmatprep.subr.bf16.mxu0 %v1214_v57 }
 0x3eb   :  { %4205 = vmatpush3.bf16.msra.mxu0 %v1214_v57 }
 0x3ec   :  { %4254 = vmatprep.subr.bf16.mxu0 %v4507_v16 }
 0x3ee   :  { %4207 = vmatmul.mubr.bf16.vlgmr.msra.gmra.mxu0 %v4422_v49 }
 0x3ef   :  { %4210 = vmatprep.mubr.bf16.mxu0 %v4423_v36  ;;  %4255 = vmatpush3.bf16.msra.mxu0 %v4507_v16  ;;  %v6558_v36 = vld [vmem:[#allocation46_spill] sm:$0xff] }
 0x3f6   :  { %4211 = vmatmul.mubr.bf16.gmra.mxu0 %v4424_v44 }
 0x3f7   :  { %4214 = vmatprep.mubr.bf16.mxu0 %v4425_v9 }
 0x3fe   :  { %4215 = vmatmul.mubr.bf16.gmra.mxu0 %v4426_v10  ;;  %v6559_v10 = vld [vmem:[#allocation47_spill] sm:$0xff] }
 0x3ff   :  { %4218 = vmatprep.mubr.bf16.mxu0 %v4427_v27 }
 0x406   :  { %4219 = vmatmul.mubr.bf16.gmra.mxu0 %v4428_v14 }
 0x4ae   :  { %v4208_v22 = vpop.f32.mrf.mxu0 }
 0x4af   :  { %v1410_v16 = vadd.f32 %v4208_v22, %v6558_v36  ;;  %v4430_v22 = vld [vmem:[%s6418_s5 + $0x48] sm:$0xff]  }
 0x4b0   :  { %v1401_v58 = vpop.f32.mrf.mxu0 }
 0x4b1   :  { %v1466_v34 = vmax.f32 %v1410_v16, 0.0 }
 0x4b2   :  { %v4209_v63 = vpop.f32.mrf.mxu0 }
 0x4b3   :  { %v1413_v50 = vadd.f32 %v4209_v63, %v6557_v33 }
 0x4b4   :  { %v1404_v52 = vpop.f32.mrf.mxu0 }
 0x4b5   :  { %v1467_v9 = vmax.f32 %v1413_v50, 0.0  ;;  %v1405_v27 = vadd.f32 %v1404_v52, %v6559_v10  ;;  %v4431_v52 = vld [vmem:[%s6418_s5 + $0x50] sm:$0xff]  }
 0x4b6   :  { %v4212_v15 = vpop.f32.mrf.mxu0 }
 0x4b7   :  { %v1426_v20 = vadd.f32 %v4212_v15, %v6554_v18  ;;  %v6560_v15 = vld [vmem:[#allocation48_spill] sm:$0xff] }
 0x4b8   :  { %v1417_v46 = vpop.f32.mrf.mxu0 }
 0x4b9   :  { %v1470_v47 = vmax.f32 %v1426_v20, 0.0  ;;  %v1418_v38 = vadd.f32 %v1417_v46, %v6556_v45  ;;  %v1498_v46 = vpack.c.bf16 %v1467_v9, %v1466_v34  ;;  %v6571_v20 = vld [vmem:[#allocation59_spill] sm:$0xff]  ;;  %v6577_v34 = vld [vmem:[#allocation66_spill] sm:$0xff] }
 0x4ba   :  { %v4213_v53 = vpop.f32.mrf.mxu0 }
 0x4bb   :  { %v1429_v6 = vadd.f32 %v4213_v53, %v6553_v51  ;;  %v1468_v44 = vmax.f32 %v1418_v38, 0.0  ;;  %v1402_v53 = vadd.f32 %v1401_v58, %v6560_v15  ;;  %v4432_v58 = vld [vmem:[%s6418_s5 + $0x58] sm:$0xff]  }
 0x4bc   :  { %v1420_v8 = vpop.f32.mrf.mxu0  ;;  %v6574_v38 = vld [vmem:[#allocation60_spill] sm:$0xff] }
 0x4bd   :  { %v1471_v7 = vmax.f32 %v1429_v6, 0.0  ;;  %v1421_v40 = vadd.f32 %v1420_v8, %v6555_v62  ;;  %v1465_v8 = vmax.f32 %v1405_v27, 0.0  ;;  %v1464_v63 = vmax.f32 %v1402_v53, 0.0  ;;  %v6569_v6 = vld [vmem:[#allocation53_spill] sm:$0xff]  ;;  %v6572_v62 = vld [vmem:[#allocation58_spill] sm:$0xff] }
 0x4be   :  { %v4216_v24 = vpop.f32.mrf.mxu0 }
 0x4bf   :  { %v1442_v12 = vadd.f32 %v4216_v24, %v6550_v5  ;;  %v1500_v37 = vpack.c.bf16 %v1471_v7, %v1470_v47  ;;  %v1469_v49 = vmax.f32 %v1421_v40, 0.0  ;;  %v1497_v24 = vpack.c.bf16 %v1465_v8, %v1464_v63  ;;  %v6564_v5 = vld [vmem:[#allocation49_spill] sm:$0xff]  ;;  %v6579_v63 = vld [vmem:[#allocation67_spill] sm:$0xff] }
 0x4c0   :  { %v1433_v31 = vpop.f32.mrf.mxu0 }
 0x4c1   :  { %v1434_v30 = vadd.f32 %v1433_v31, %v6552_v13  ;;  %v1499_v14 = vpack.c.bf16 %v1469_v49, %v1468_v44  ;;  %v4433_v31 = vld [vmem:[%s6418_s5 + $0x60] sm:$0xff]   ;;  %v6568_v13 = vld [vmem:[#allocation64_spill] sm:$0xff] }
 0x4c2   :  { %v4217_v25 = vpop.f32.mrf.mxu0  ;;  %v6576_v44 = vld [vmem:[#allocation61_spill] sm:$0xff] }
 0x4c3   :  { %v1445_v56 = vadd.f32 %v4217_v25, %v6548_v23  ;;  %v1472_v21 = vmax.f32 %v1434_v30, 0.0  ;;  %v4434_v25 = vld [vmem:[%s6418_s5 + $0x68] sm:$0xff]  }
 0x4c4   :  { %v1436_v57 = vpop.f32.mrf.mxu0 }
 0x4c5   :  { %v1475_v39 = vmax.f32 %v1445_v56, 0.0  ;;  %v6563_v56 = vld [vmem:[#allocation51_spill] sm:$0xff] }
 0x4c6   :  { %v4220_v17 = vpop.f32.mrf.mxu0 }
 0x4c7   :  { %v1458_v19 = vadd.f32 %v4220_v17, %v5303_v41  ;;  %v1437_v41 = vadd.f32 %v1436_v57, %v6551_v35  ;;  %v4435_v57 = vld [vmem:[%s6418_s5 + $0x70] sm:$0xff]   ;;  %v4436_v17 = vld [vmem:[%s6418_s5 + $0x78] sm:$0xff]  }
 0x4c8   :  { %v1449_v42 = vpop.f32.mrf.mxu0 }
 0x4c9   :  { %v1450_v11 = vadd.f32 %v1449_v42, %v5325_v59  ;;  %v1478_v0 = vmax.f32 %v1458_v19, 0.0  ;;  %v1474_v59 = vmax.f32 %v1442_v12, 0.0  ;;  %v1473_v26 = vmax.f32 %v1437_v41, 0.0  ;;  %v6561_v19 = vld [vmem:[#allocation52_spill] sm:$0xff] }
 0x4ca   :  { %v4221_v60 = vpop.f32.mrf.mxu0 }
 0x4cb   :  { %v1461_v61 = vadd.f32 %v4221_v60, %v6547_v29  ;;  %v1476_v28 = vmax.f32 %v1450_v11, 0.0  ;;  %v1502_v54 = vpack.c.bf16 %v1475_v39, %v1474_v59  ;;  %v1501_v3 = vpack.c.bf16 %v1473_v26, %v1472_v21  ;;  %v6562_v29 = vld [vmem:[#allocation50_spill] sm:$0xff]  ;;  %v6566_v39 = vld [vmem:[#allocation55_spill] sm:$0xff] }
 0x4cc   :  { %v1452_v2 = vpop.f32.mrf.mxu0  ;;  %v6570_v26 = vld [vmem:[#allocation62_spill] sm:$0xff] }
 0x4cd   :  { %v1479_v55 = vmax.f32 %v1461_v61, 0.0  ;;  %v1453_v4 = vadd.f32 %v1452_v2, %v6549_v1 }
 0x4cf   :  { %v1504_v48 = vpack.c.bf16 %v1479_v55, %v1478_v0  ;;  %v1477_v32 = vmax.f32 %v1453_v4, 0.0 }
 0x4d1   :  { %v1503_v43 = vpack.c.bf16 %v1477_v32, %v1476_v28  ;;  %4222 = vmatprep.subr.bf16.mxu1 %v1504_v48 }
 0x4d2   :  { %4223 = vmatpush3.bf16.msra.mxu1 %v1504_v48  ;;  %v6565_v48 = vld [vmem:[#allocation54_spill] sm:$0xff] }
 0x4d3   :  { %4224 = vmatprep.subr.bf16.mxu1 %v1503_v43 }
 0x4d6   :  { %4225 = vmatpush3.bf16.msra.mxu1 %v1503_v43  ;;  %v6567_v43 = vld [vmem:[#allocation56_spill] sm:$0xff] }
 0x4d7   :  { %4226 = vmatprep.subr.bf16.mxu1 %v1502_v54 }
 0x4da   :  { %4227 = vmatpush3.bf16.msra.mxu1 %v1502_v54 }
 0x4db   :  { %4228 = vmatprep.subr.bf16.mxu1 %v1501_v3 }
 0x4de   :  { %4229 = vmatpush3.bf16.msra.mxu1 %v1501_v3  ;;  %v6573_v3 = vld [vmem:[#allocation57_spill] sm:$0xff] }
 0x4df   :  { %4230 = vmatprep.subr.bf16.mxu1 %v1500_v37 }
 0x4e2   :  { %4231 = vmatpush3.bf16.msra.mxu1 %v1500_v37  ;;  %v6575_v37 = vld [vmem:[#allocation63_spill] sm:$0xff] }
 0x4e3   :  { %4232 = vmatprep.subr.bf16.mxu1 %v1499_v14 }
 0x4e6   :  { %4233 = vmatpush3.bf16.msra.mxu1 %v1499_v14 }
 0x4e7   :  { %4234 = vmatprep.subr.bf16.mxu1 %v1498_v46 }
 0x4ea   :  { %4235 = vmatpush3.bf16.msra.mxu1 %v1498_v46  ;;  %v6578_v46 = vld [vmem:[#allocation68_spill] sm:$0xff] }
 0x4eb   :  { %4236 = vmatprep.subr.bf16.mxu1 %v1497_v24 }
 0x4ee   :  { %4237 = vmatpush3.bf16.msra.mxu1 %v1497_v24 }
 0x4f1   :  { %4239 = vmatmul.mubr.bf16.vlgmr.msra.gmra.mxu1 %v4430_v22 }
 0x4f2   :  { %4242 = vmatprep.mubr.bf16.mxu1 %v4431_v52  ;;  %v6580_v52 = vld [vmem:[#allocation65_spill] sm:$0xff] }
 0x4f9   :  { %4243 = vmatmul.mubr.bf16.gmra.mxu1 %v4432_v58 }
 0x4fa   :  { %4246 = vmatprep.mubr.bf16.mxu1 %v4433_v31  ;;  %v6581_v31 = vld [vmem:[#allocation76_spill] sm:$0xff] }
 0x501   :  { %4247 = vmatmul.mubr.bf16.gmra.mxu1 %v4434_v25 }
 0x502   :  { %4250 = vmatprep.mubr.bf16.mxu1 %v4435_v57  ;;  %v6582_v57 = vld [vmem:[#allocation74_spill] sm:$0xff] }
 0x509   :  { %4251 = vmatmul.mubr.bf16.gmra.mxu1 %v4436_v17 }
 0x5b1   :  { %v4240_v42 = vpop.f32.mrf.mxu1 }
 0x5b2   :  { %v1693_v60 = vadd.f32 %v4240_v42, %v6561_v19  ;;  %v6583_v42 = vld [vmem:[#allocation71_spill] sm:$0xff] }
 0x5b3   :  { %v1684_v11 = vpop.f32.mrf.mxu1 }
 0x5b4   :  { %v1685_v61 = vadd.f32 %v1684_v11, %v6562_v29  ;;  %v1749_v55 = vmax.f32 %v1693_v60, 0.0  ;;  %v6584_v11 = vld [vmem:[#allocation70_spill] sm:$0xff] }
 0x5b5   :  { %v4241_v2 = vpop.f32.mrf.mxu1 }
 0x5b6   :  { %v1747_v23 = vmax.f32 %v1685_v61, 0.0  ;;  %v1696_v0 = vadd.f32 %v4241_v2, %v6563_v56  ;;  %v1862_v59 = vmul.f32 %v6567_v43, %v1749_v55  ;;  %v6585_v61 = vld [vmem:[#allocation69_spill] sm:$0xff] }
 0x5b7   :  { %v1687_v1 = vpop.f32.mrf.mxu1 }
 0x5b8   :  { %v1750_v4 = vmax.f32 %v1696_v0, 0.0  ;;  %v1688_v12 = vadd.f32 %v1687_v1, %v6564_v5  ;;  %v1860_v32 = vmul.f32 %v6565_v48, %v1747_v23  ;;  %v5937_v33 = vadd.f32 %v6574_v38, %v1862_v59  ;;  %v6586_v23 = vld [vmem:[#allocation75_spill] sm:$0xff]  ;;  %v6587_v0 = vld [vmem:[#allocation72_spill] sm:$0xff]  ;;  %v6590_v59 = vld [vmem:[#allocation78_spill] sm:$0xff] }
 0x5b9   :  { %v4244_v28 = vpop.f32.mrf.mxu1  ;;  %v6595_v38 = vld [vmem:[#allocation83_spill] sm:$0xff] }
 0x5ba   :  { %v1863_v35 = vmul.f32 %v6566_v39, %v1750_v4  ;;  %v1748_v41 = vmax.f32 %v1688_v12, 0.0  ;;  %v1709_v30 = vadd.f32 %v4244_v28, %v6568_v13  ;;  %v5931_v40 = vadd.f32 %v6572_v62, %v1860_v32  ;;  %v6588_v32 = vld [vmem:[#allocation73_spill] sm:$0xff] }
 0x5bb   :  { %v1700_v51 = vpop.f32.mrf.mxu1  ;;  %v6594_v62 = vld [vmem:[#allocation77_spill] sm:$0xff] }
 0x5bc   :  { %v1861_v54 = vmul.f32 %v6569_v6, %v1748_v41  ;;  %v1701_v18 = vadd.f32 %v1700_v51, %v6570_v26  ;;  %v5928_v21 = vadd.f32 %v6571_v20, %v1863_v35  ;;  %v1753_v50 = vmax.f32 %v1709_v30, 0.0  ;;  %v6589_v41 = vld [vmem:[#allocation79_spill] sm:$0xff]  ;;  %v6591_v6 = vld [vmem:[#allocation80_spill] sm:$0xff]  ;;  %v6593_v20 = vld [vmem:[#allocation86_spill] sm:$0xff] }
 0x5bd   :  { %v4245_v7 = vpop.f32.mrf.mxu1  ;;  %v6592_v26 = vld [vmem:[#allocation88_spill] sm:$0xff] }
 0x5be   :  { %v5934_v47 = vadd.f32 %v6573_v3, %v1861_v54  ;;  %v1751_v45 = vmax.f32 %v1701_v18, 0.0  ;;  %v1712_v49 = vadd.f32 %v4245_v7, %v6575_v37  ;;  %v1990_v10 = vpack.c.bf16 %v5928_v21, %v5937_v33 }
 0x5bf   :  { %v1703_v36 = vpop.f32.mrf.mxu1  ;;  %v1866_v8 = vmul.f32 %v6578_v46, %v1753_v50  ;;  %v6600_v46 = vld [vmem:[#allocation85_spill] sm:$0xff] }
 0x5c0   :  { %v1989_v16 = vpack.c.bf16 %v5934_v47, %v5931_v40  ;;  %v1704_v9 = vadd.f32 %v1703_v36, %v6576_v44  ;;  %v1754_v27 = vmax.f32 %v1712_v49, 0.0  ;;  %v1864_v15 = vmul.f32 %v6577_v34, %v1751_v45  ;;  %v6596_v49 = vld [vmem:[#allocation87_spill] sm:$0xff] }
 0x5c1   :  { %v4248_v14 = vpop.f32.mrf.mxu1  ;;  %v5964_v55 = vadd.f32 %v6587_v0, %v1866_v8  ;;  %v6606_v0 = vld [vmem:[#allocation93_spill] sm:$0xff] }
 0x5c2   :  { %v1752_v53 = vmax.f32 %v1704_v9, 0.0  ;;  %4256 = vmatprep.mubr.msk.bf16.mxu0 %vm90_vm0, %v1989_v16  ;;  %v1867_v24 = vmul.f32 %v6579_v63, %v1754_v27  ;;  %v1725_v25 = vadd.f32 %v4248_v14, %v6581_v31  ;;  %v5957_v29 = vadd.f32 %v6584_v11, %v1864_v15  ;;  %v6597_v16 = vld [vmem:[#allocation82_spill] sm:$0xff]  ;;  %v6598_v9 = vld [vmem:[#allocation81_spill] sm:$0xff]  ;;  %v6599_v14 = vld [vmem:[#allocation84_spill] sm:$0xff]  ;;  %v1971_v11 = vpop.permute.xlu1 %1970 }
 0x5c3   :  { %v1716_v22 = vpop.f32.mrf.mxu1  ;;  %4257 = vmatmul.mubr.msk.bf16.vlgmr.msra.gmra.mxu0 %vm90_vm0, %v1990_v10 }
 0x5c4   :  { %v1865_v58 = vmul.f32 %v6580_v52, %v1752_v53  ;;  %v1717_v17 = vadd.f32 %v1716_v22, %v6582_v57  ;;  %v5954_v19 = vadd.f32 %v6583_v42, %v1867_v24  ;;  %v1757_v12 = vmax.f32 %v1725_v25, 0.0  ;;  %v6601_v22 = vld [vmem:[#allocation90_spill] sm:$0xff]  ;;  %v6603_v57 = vld [vmem:[#allocation92_spill] sm:$0xff]  ;;  %v6604_v42 = vld [vmem:[#allocation89_spill] sm:$0xff] }
 0x5c5   :  { %v4249_v60 = vpop.f32.mrf.mxu1 }
 0x5c6   :  { %v5960_v2 = vadd.f32 %v6585_v61, %v1865_v58  ;;  %v1728_v56 = vadd.f32 %v4249_v60, %v6586_v23  ;;  %v1755_v1 = vmax.f32 %v1717_v17, 0.0  ;;  %v1992_v48 = vpack.c.bf16 %v5954_v19, %v5964_v55  ;;  %v6602_v58 = vld [vmem:[#allocation91_spill] sm:$0xff]  ;;  %v6605_v61 = vld [vmem:[#allocation94_spill] sm:$0xff] }
 0x5c7   :  { %v1719_v4 = vpop.f32.mrf.mxu1  ;;  %v1870_v54 = vmul.f32 %v6591_v6, %v1757_v12 }
 0x5c8   :  { %v1991_v5 = vpack.c.bf16 %v5960_v2, %v5957_v29  ;;  %v1758_v28 = vmax.f32 %v1728_v56, 0.0  ;;  %v1720_v39 = vadd.f32 %v1719_v4, %v6588_v32  ;;  %v1868_v13 = vmul.f32 %v6590_v59, %v1755_v1  ;;  %v1966_v4 = vpop.permute.xlu0 %1965 }
 0x5c9   :  { %v4252_v35 = vpop.f32.mrf.mxu1  ;;  %v1983_v34 = vadd.f32 %v6599_v14, %v1870_v54 }
 0x5ca   :  { %v1871_v43 = vmul.f32 %v6589_v41, %v1758_v28  ;;  %4260 = vmatprep.mubr.msk.bf16.mxu0 %vm90_vm0, %v1991_v5  ;;  %v1756_v30 = vmax.f32 %v1720_v39, 0.0  ;;  %v1741_v18 = vadd.f32 %v4252_v35, %v6592_v26  ;;  %v5984_v44 = vadd.f32 %v6597_v16, %v1868_v13 }
 0x5cb   :  { %v1732_v51 = vpop.f32.mrf.mxu1  ;;  %4261 = vmatmul.mubr.msk.bf16.gmra.mxu0 %vm90_vm0, %v1992_v48  ;;  %v4437_v48 = vld [vmem:[%s6416_s3 + $0x80] sm:$0xff]   ;;  %v2120_v39 = vstv %s2119_s24 }
 0x5cc   :  { %v1733_v7 = vadd.f32 %v1732_v51, %v6593_v20  ;;  %v1869_v3 = vmul.f32 %v6594_v62, %v1756_v30  ;;  %v5980_v50 = vadd.f32 %v6595_v38, %v1871_v43  ;;  %v1761_v15 = vmax.f32 %v1741_v18, 0.0  ;;  %4288 = vmatprep.mubr.bf16.mxu1 %v4437_v48  ;;  %v4444_v48 = vld [vmem:[%s6416_s3 + $0xb8] sm:$0xff]  }
 0x5cd   :  { %v4253_v45 = vpop.f32.mrf.mxu1  ;;  %v2123_v41 = vmul.f32 %v2120_v39, %v5937_v33  ;;  %v2124_v43 = vmul.f32 %v2120_v39, %v5928_v21  ;;  %v2121_v30 = vmul.f32 %v2120_v39, %v5931_v40  ;;  %v2122_v6 = vmul.f32 %v2120_v39, %v5934_v47 }
 0x5ce   :  { %v1759_v37 = vmax.f32 %v1733_v7, 0.0  ;;  %v1744_v36 = vadd.f32 %v4253_v45, %v6596_v49  ;;  %v5987_v10 = vadd.f32 %v6598_v9, %v1869_v3  ;;  %v1994_v24 = vpack.c.bf16 %v5980_v50, %v1983_v34 }
 0x5cf   :  { %v1735_v27 = vpop.f32.mrf.mxu1  ;;  %v1874_v17 = vmul.f32 %v6603_v57, %v1761_v15  ;;  %v2127_v45 = vmul.f32 %v2120_v39, %v5964_v55  ;;  %v2128_v33 = vmul.f32 %v2120_v39, %v5954_v19  ;;  %v2126_v40 = vmul.f32 %v2120_v39, %v5960_v2 }
 0x5d0   :  { %v1762_v53 = vmax.f32 %v1744_v36, 0.0  ;;  %v1736_v8 = vadd.f32 %v1735_v27, %v6600_v46  ;;  %v1993_v63 = vpack.c.bf16 %v5987_v10, %v5984_v44  ;;  %v1872_v52 = vmul.f32 %v6601_v22, %v1759_v37 }
 0x5d1   :  { %v1987_v5 = vadd.f32 %v1966_v4, %v1874_v17  ;;  %v2125_v37 = vmul.f32 %v2120_v39, %v5957_v29  ;;  %v2132_v46 = vmul.f32 %v2120_v39, %v5980_v50  ;;  %v2129_v19 = vmul.f32 %v2120_v39, %v5984_v44 }
 0x5d2   :  { %v1875_v31 = vmul.f32 %v6602_v58, %v1762_v53  ;;  %v1760_v25 = vmax.f32 %v1736_v8, 0.0  ;;  %4264 = vmatprep.mubr.msk.bf16.mxu0 %vm90_vm0, %v1993_v63  ;;  %v1985_v23 = vadd.f32 %v6605_v61, %v1872_v52  ;;  %v2131_v53 = vmul.f32 %v2120_v39, %v1983_v34 }
 0x5d3   :  { %4265 = vmatmul.mubr.msk.bf16.gmra.mxu0 %vm90_vm0, %v1994_v24  ;;  %v2130_v29 = vmul.f32 %v2120_v39, %v5987_v10  ;;  %v2135_v57 = vmul.f32 %v2120_v39, %v1987_v5  ;;  %v4438_v10 = vld [vmem:[%s6416_s3 + $0x88] sm:$0xff]  }
 0x5d4   :  { %v1873_v60 = vmul.f32 %v6604_v42, %v1760_v25  ;;  %v1988_v56 = vadd.f32 %v1971_v11, %v1875_v31 }
 0x5d6   :  { %v1986_v1 = vadd.f32 %v6606_v0, %v1873_v60  ;;  %v1996_v28 = vpack.c.bf16 %v1988_v56, %v1987_v5  ;;  %v2136_v17 = vmul.f32 %v2120_v39, %v1988_v56  ;;  %v2133_v60 = vmul.f32 %v2120_v39, %v1985_v23  ;;  %v4440_v56 = vld [vmem:[%s6416_s3 + $0x98] sm:$0xff]   ;;  %v4442_v5 = vld [vmem:[%s6416_s3 + $0xa8] sm:$0xff]  }
 0x5d8   :  { %v1995_v12 = vpack.c.bf16 %v1986_v1, %v1985_v23  ;;  %v2134_v11 = vmul.f32 %v2120_v39, %v1986_v1  ;;  %v4439_v23 = vld [vmem:[%s6416_s3 + $0x90] sm:$0xff]   ;;  %v4441_v1 = vld [vmem:[%s6416_s3 + $0xa0] sm:$0xff]  }
 0x5da   :  { %4268 = vmatprep.mubr.msk.bf16.mxu0 %vm90_vm0, %v1995_v12 }
 0x5db   :  { %4269 = vmatmul.mubr.msk.bf16.gmra.mxu0 %vm90_vm0, %v1996_v28  ;;  %v4443_v28 = vld [vmem:[%s6416_s3 + $0xb0] sm:$0xff]  }
 0x683   :  { %v4258_v32 = vpop.f32.mrf.mxu0 }
 0x684   :  { %v2139_v13 = vadd.f32 %v4258_v32, %v2123_v41  ;;  %v4445_v32 = vld [vmem:[%s6418_s5 + $0x80] sm:$0xff]  }
 0x685   :  { %v2055_v35 = vpop.f32.mrf.mxu0  ;;  %4320 = vmatprep.mubr.bf16.mxu0 %v4445_v32 }
 0x686   :  { %v2137_v26 = vadd.f32 %v2121_v30, %v2055_v35  ;;  %v2268_v30 = vpop.permute.xlu0 %2267 }
 0x687   :  { %v4259_v59 = vpop.f32.mrf.mxu0 }
 0x688   :  { %v2140_v51 = vadd.f32 %v4259_v59, %v2124_v43  ;;  %v2273_v59 = vpop.permute.xlu1 %2272 }
 0x689   :  { %v2058_v54 = vpop.f32.mrf.mxu0 }
 0x68a   :  { %v2171_v18 = vpack.c.bf16 %v2140_v51, %v2139_v13  ;;  %v2138_v20 = vadd.f32 %v2122_v6, %v2058_v54 }
 0x68b   :  { %v4262_v7 = vpop.f32.mrf.mxu0 }
 0x68c   :  { %v2170_v62 = vpack.c.bf16 %v2138_v20, %v2137_v26  ;;  %v2143_v21 = vadd.f32 %v4262_v7, %v2127_v45  ;;  %v2263_v54 = vpop.permute.xlu1 %2262 }
 0x68d   :  { %v2071_v3 = vpop.f32.mrf.mxu0 }
 0x68e   :  { %v2141_v47 = vadd.f32 %v2125_v37, %v2071_v3 }
 0x68f   :  { %v4263_v38 = vpop.f32.mrf.mxu0 }
 0x690   :  { %v2144_v49 = vadd.f32 %v4263_v38, %v2128_v33 }
 0x691   :  { %v2074_v36 = vpop.f32.mrf.mxu0 }
 0x692   :  { %v2173_v16 = vpack.c.bf16 %v2144_v49, %v2143_v21  ;;  %v2142_v9 = vadd.f32 %v2126_v40, %v2074_v36 }
 0x693   :  { %v4266_v14 = vpop.f32.mrf.mxu0 }
 0x694   :  { %v2172_v27 = vpack.c.bf16 %v2142_v9, %v2141_v47  ;;  %v2147_v8 = vadd.f32 %v4266_v14, %v2131_v53 }
 0x695   :  { %v2087_v15 = vpop.f32.mrf.mxu0 }
 0x696   :  { %v2145_v22 = vadd.f32 %v2129_v19, %v2087_v15 }
 0x697   :  { %v4267_v55 = vpop.f32.mrf.mxu0 }
 0x698   :  { %v2148_v63 = vadd.f32 %v4267_v55, %v2132_v46 }
 0x699   :  { %v2090_v24 = vpop.f32.mrf.mxu0 }
 0x69a   :  { %v2175_v2 = vpack.c.bf16 %v2148_v63, %v2147_v8  ;;  %v2146_v52 = vadd.f32 %v2130_v29, %v2090_v24 }
 0x69b   :  { %v4270_v58 = vpop.f32.mrf.mxu0 }
 0x69c   :  { %v2174_v31 = vpack.c.bf16 %v2146_v52, %v2145_v22  ;;  %v2151_v34 = vadd.f32 %v4270_v58, %v2135_v57 }
 0x69d   :  { %v2103_v25 = vpop.f32.mrf.mxu0 }
 0x69e   :  { %v2149_v0 = vadd.f32 %v2133_v60, %v2103_v25 }
 0x69f   :  { %v4271_v42 = vpop.f32.mrf.mxu0 }
 0x6a0   :  { %v2152_v50 = vadd.f32 %v4271_v42, %v2136_v17 }
 0x6a1   :  { %v2106_v61 = vpop.f32.mrf.mxu0 }
 0x6a2   :  { %v2177_v44 = vpack.c.bf16 %v2152_v50, %v2151_v34  ;;  %v2150_v4 = vadd.f32 %v2134_v11, %v2106_v61 }
 0x6a4   :  { %v2176_v12 = vpack.c.bf16 %v2150_v4, %v2149_v0  ;;  %4272 = vmatprep.subr.bf16.mxu1 %v2177_v44 }
 0x6a5   :  { %4273 = vmatpush3.bf16.msra.mxu1 %v2177_v44 }
 0x6a6   :  { %4274 = vmatprep.subr.bf16.mxu1 %v2176_v12 }
 0x6a9   :  { %4275 = vmatpush3.bf16.msra.mxu1 %v2176_v12 }
 0x6aa   :  { %4276 = vmatprep.subr.bf16.mxu1 %v2175_v2 }
 0x6ad   :  { %4277 = vmatpush3.bf16.msra.mxu1 %v2175_v2 }
 0x6ae   :  { %4278 = vmatprep.subr.bf16.mxu1 %v2174_v31 }
 0x6b1   :  { %4279 = vmatpush3.bf16.msra.mxu1 %v2174_v31 }
 0x6b2   :  { %4280 = vmatprep.subr.bf16.mxu1 %v2173_v16 }
 0x6b5   :  { %4281 = vmatpush3.bf16.msra.mxu1 %v2173_v16 }
 0x6b6   :  { %4282 = vmatprep.subr.bf16.mxu1 %v2172_v27 }
 0x6b9   :  { %4283 = vmatpush3.bf16.msra.mxu1 %v2172_v27 }
 0x6ba   :  { %4284 = vmatprep.subr.bf16.mxu1 %v2171_v18 }
 0x6bd   :  { %4285 = vmatpush3.bf16.msra.mxu1 %v2171_v18  ;;  %v2258_v18 = vpop.permute.xlu0 %2257 }
 0x6be   :  { %4286 = vmatprep.subr.bf16.mxu1 %v2170_v62 }
 0x6c1   :  { %4287 = vmatpush3.bf16.msra.mxu1 %v2170_v62  ;;  %v2253_v62 = vpop.permute.xlu1 %2252  ;;  %v2248_v45 = vpop.permute.xlu0 %2247 }
 0x6c4   :  { %4289 = vmatmul.mubr.bf16.vlgmr.msra.gmra.mxu1 %v4438_v10 }
 0x6c5   :  { %4292 = vmatprep.mubr.bf16.mxu1 %v4439_v23  ;;  %v2243_v21 = vpop.permute.xlu1 %2242  ;;  %v2238_v40 = vpop.permute.xlu0 %2237 }
 0x6c9   :  { %v2233_v46 = vpop.permute.xlu1 %2232  ;;  %v2228_v29 = vpop.permute.xlu0 %2227 }
 0x6cc   :  { %4293 = vmatmul.mubr.bf16.gmra.mxu1 %v4440_v56 }
 0x6cd   :  { %4296 = vmatprep.mubr.bf16.mxu1 %v4441_v1  ;;  %v2223_v31 = vpop.permute.xlu1 %2222  ;;  %v2218_v42 = vpop.permute.xlu0 %2217 }
 0x6d1   :  { %v2213_v0 = vpop.permute.xlu1 %2212  ;;  %v2208_v12 = vpop.permute.xlu0 %2207 }
 0x6d4   :  { %4297 = vmatmul.mubr.bf16.gmra.mxu1 %v4442_v5 }
 0x6d5   :  { %4300 = vmatprep.mubr.bf16.mxu1 %v4443_v28  ;;  %v2203_v28 = vpop.permute.xlu1 %2202 }
 0x6dc   :  { %4301 = vmatmul.mubr.bf16.gmra.mxu1 %v4444_v48 }
 0x784   :  { %v6042_v39 = vpop.f32.mrf.mxu1 }
 0x785   :  { %v2366_v1 = vadd.f32 %v6042_v39, %v2208_v12  ;;  %v4446_v39 = vld [vmem:[%s6418_s5 + $0x88] sm:$0xff]  }
 0x786   :  { %v6044_v35 = vpop.f32.mrf.mxu1 }
 0x788   :  { %v4291_v41 = vpop.f32.mrf.mxu1 }
 0x789   :  { %v2369_v10 = vadd.f32 %v4291_v41, %v2213_v0 }
 0x78a   :  { %v6046_v43 = vpop.f32.mrf.mxu1 }
 0x78b   :  { %v2423_v48 = vmax.f32 %v2369_v10, 0.0  ;;  %v2361_v32 = vadd.f32 %v6046_v43, %v2203_v28  ;;  %v4447_v43 = vld [vmem:[%s6418_s5 + $0x90] sm:$0xff]  }
 0x78c   :  { %v4294_v13 = vpop.f32.mrf.mxu1 }
 0x78d   :  { %v2382_v34 = vadd.f32 %v4294_v13, %v2228_v29  ;;  %v2198_v13 = vpop.permute.xlu0 %2197  ;;  %v2421_v41 = vmax.f32 %v2361_v32, 0.0 }
 0x78e   :  { %v2373_v51 = vpop.f32.mrf.mxu1 }
 0x78f   :  { %v2426_v44 = vmax.f32 %v2382_v34, 0.0  ;;  %v2374_v4 = vadd.f32 %v2373_v51, %v2218_v42  ;;  %v2358_v51 = vadd.f32 %v6044_v35, %v2198_v13  ;;  %v4448_v35 = vld [vmem:[%s6418_s5 + $0x98] sm:$0xff]  }
 0x790   :  { %v4295_v6 = vpop.f32.mrf.mxu1 }
 0x791   :  { %v2385_v25 = vadd.f32 %v4295_v6, %v2233_v46  ;;  %v2424_v5 = vmax.f32 %v2374_v4, 0.0 }
 0x792   :  { %v2376_v26 = vpop.f32.mrf.mxu1 }
 0x793   :  { %v2427_v50 = vmax.f32 %v2385_v25, 0.0  ;;  %v2377_v11 = vadd.f32 %v2376_v26, %v2223_v31 }
 0x794   :  { %v4298_v20 = vpop.f32.mrf.mxu1 }
 0x795   :  { %v2398_v55 = vadd.f32 %v4298_v20, %v2248_v45  ;;  %v2456_v23 = vpack.c.bf16 %v2427_v50, %v2426_v44  ;;  %v2425_v56 = vmax.f32 %v2377_v11, 0.0  ;;  %v4450_v20 = vld [vmem:[%s6418_s5 + $0xa8] sm:$0xff]   ;;  %v2551_v45 = vpop.permute.xlu0 %2550 }
 0x796   :  { %v2389_v7 = vpop.f32.mrf.mxu1 }
 0x797   :  { %v2430_v52 = vmax.f32 %v2398_v55, 0.0  ;;  %v2390_v58 = vadd.f32 %v2389_v7, %v2238_v40  ;;  %v4451_v7 = vld [vmem:[%s6418_s5 + $0xb0] sm:$0xff]  }
 0x798   :  { %v4299_v3 = vpop.f32.mrf.mxu1 }
 0x799   :  { %v2401_v27 = vadd.f32 %v4299_v3, %v2253_v62  ;;  %v2428_v60 = vmax.f32 %v2390_v58, 0.0  ;;  %v4452_v62 = vld [vmem:[%s6418_s5 + $0xb8] sm:$0xff]   ;;  %v2556_v3 = vpop.permute.xlu1 %2555 }
 0x79a   :  { %v2392_v33 = vpop.f32.mrf.mxu1 }
 0x79b   :  { %v2431_v24 = vmax.f32 %v2401_v27, 0.0  ;;  %v2393_v22 = vadd.f32 %v2392_v33, %v2243_v21 }
 0x79c   :  { %v4302_v38 = vpop.f32.mrf.mxu1 }
 0x79d   :  { %v2414_v49 = vadd.f32 %v4302_v38, %v2268_v30  ;;  %v2458_v57 = vpack.c.bf16 %v2431_v24, %v2430_v52  ;;  %v2429_v17 = vmax.f32 %v2393_v22, 0.0  ;;  %v2422_v30 = vmax.f32 %v2366_v1, 0.0  ;;  %v6072_v33 = vpop.permute.xlu1 %2545  ;;  %v2541_v38 = vpop.permute.xlu0 %2540 }
 0x79e   :  { %v2405_v37 = vpop.f32.mrf.mxu1 }
 0x79f   :  { %v2406_v47 = vadd.f32 %v2405_v37, %v2258_v18  ;;  %v2434_v14 = vmax.f32 %v2414_v49, 0.0  ;;  %v2457_v61 = vpack.c.bf16 %v2429_v17, %v2428_v60  ;;  %v2454_v6 = vpack.c.bf16 %v2423_v48, %v2422_v30  ;;  %v4449_v18 = vld [vmem:[%s6418_s5 + $0xa0] sm:$0xff]  }
 0x7a0   :  { %v4303_v36 = vpop.f32.mrf.mxu1 }
 0x7a1   :  { %v2417_v16 = vadd.f32 %v4303_v36, %v2273_v59  ;;  %v2432_v8 = vmax.f32 %v2406_v47, 0.0  ;;  %v2455_v59 = vpack.c.bf16 %v2425_v56, %v2424_v5  ;;  %v6074_v21 = vpop.permute.xlu1 %2813  ;;  %v2809_v37 = vpop.permute.xlu0 %2808  ;;  %v4453_v36 = vld [vmem:[%s6422_s9] sm:$0xff]  }
 0x7a2   :  { %v2408_v9 = vpop.f32.mrf.mxu1  ;;  %4352 = vmatprep.mubr.bf16.mxu1 %v4453_v36 }
 0x7a3   :  { %v2435_v15 = vmax.f32 %v2417_v16, 0.0  ;;  %v2409_v53 = vadd.f32 %v2408_v9, %v2263_v54  ;;  %v2420_v54 = vmax.f32 %v2358_v51, 0.0 }
 0x7a5   :  { %v2460_v19 = vpack.c.bf16 %v2435_v15, %v2434_v14  ;;  %v2433_v63 = vmax.f32 %v2409_v53, 0.0  ;;  %v2453_v26 = vpack.c.bf16 %v2421_v41, %v2420_v54  ;;  %v6076_v49 = vpop.permute.xlu1 %2926  ;;  %v6078_v40 = vpop.permute.xlu0 %2921 }
 0x7a7   :  { %v2459_v2 = vpack.c.bf16 %v2433_v63, %v2432_v8  ;;  %4304 = vmatprep.subr.bf16.mxu0 %v2460_v19 }
 0x7a8   :  { %4305 = vmatpush3.bf16.msra.mxu0 %v2460_v19 }
 0x7a9   :  { %4306 = vmatprep.subr.bf16.mxu0 %v2459_v2  ;;  %v2536_v47 = vpop.permute.xlu1 %2535  ;;  %v2531_v16 = vpop.permute.xlu0 %2530 }
 0x7ac   :  { %4307 = vmatpush3.bf16.msra.mxu0 %v2459_v2 }
 0x7ad   :  { %4308 = vmatprep.subr.bf16.mxu0 %v2458_v57  ;;  %v6083_v9 = vpop.permute.xlu1 %2803  ;;  %v2799_v27 = vpop.permute.xlu0 %2798 }
 0x7b0   :  { %4309 = vmatpush3.bf16.msra.mxu0 %v2458_v57 }
 0x7b1   :  { %4310 = vmatprep.subr.bf16.mxu0 %v2457_v61  ;;  %v6085_v14 = vpop.permute.xlu1 %2916  ;;  %v6087_v15 = vpop.permute.xlu0 %2911 }
 0x7b4   :  { %4311 = vmatpush3.bf16.msra.mxu0 %v2457_v61 }
 0x7b5   :  { %4312 = vmatprep.subr.bf16.mxu0 %v2456_v23  ;;  %v2526_v53 = vpop.permute.xlu1 %2525  ;;  %v2521_v46 = vpop.permute.xlu0 %2520 }
 0x7b8   :  { %4313 = vmatpush3.bf16.msra.mxu0 %v2456_v23 }
 0x7b9   :  { %4314 = vmatprep.subr.bf16.mxu0 %v2455_v59  ;;  %v2794_v55 = vpop.permute.xlu1 %2793  ;;  %v6089_v8 = vpop.permute.xlu0 %2788 }
 0x7bc   :  { %4315 = vmatpush3.bf16.msra.mxu0 %v2455_v59 }
 0x7bd   :  { %4316 = vmatprep.subr.bf16.mxu0 %v2454_v6  ;;  %v6091_v19 = vpop.permute.xlu1 %2906  ;;  %v6093_v63 = vpop.permute.xlu0 %2901 }
 0x7c0   :  { %4317 = vmatpush3.bf16.msra.mxu0 %v2454_v6 }
 0x7c1   :  { %4318 = vmatprep.subr.bf16.mxu0 %v2453_v26  ;;  %v2516_v29 = vpop.permute.xlu1 %2515  ;;  %v2511_v24 = vpop.permute.xlu0 %2510 }
 0x7c4   :  { %4319 = vmatpush3.bf16.msra.mxu0 %v2453_v26 }
 0x7c5   :  { %v6095_v22 = vpop.permute.xlu1 %2783  ;;  %v6097_v2 = vpop.permute.xlu0 %2778 }
 0x7c7   :  { %4321 = vmatmul.mubr.bf16.vlgmr.msra.gmra.mxu0 %v4446_v39 }
 0x7c8   :  { %4324 = vmatprep.mubr.bf16.mxu0 %v4447_v43 }
 0x7c9   :  { %v6099_v52 = vpop.permute.xlu1 %2896  ;;  %v6101_v58 = vpop.permute.xlu0 %2891 }
 0x7cd   :  { %v2506_v31 = vpop.permute.xlu1 %2505  ;;  %v6103_v25 = vpop.permute.xlu0 %2500 }
 0x7cf   :  { %4325 = vmatmul.mubr.bf16.gmra.mxu0 %v4448_v35 }
 0x7d0   :  { %4328 = vmatprep.mubr.bf16.mxu0 %v4449_v18 }
 0x7d1   :  { %v6109_v42 = vpop.permute.xlu1 %2773  ;;  %v6113_v60 = vpop.permute.xlu0 %2768 }
 0x7d5   :  { %v6117_v61 = vpop.permute.xlu1 %2886  ;;  %v6119_v44 = vpop.permute.xlu0 %2881 }
 0x7d6   :  { %6607 = vst [vmem:[#allocation6_spill] sm:$0xff] %v6119_v44 }
 0x7d7   :  { %4329 = vmatmul.mubr.bf16.gmra.mxu0 %v4450_v20 }
 0x7d8   :  { %4332 = vmatprep.mubr.bf16.mxu0 %v4451_v7 }
 0x7d9   :  { %v2496_v10 = vpop.permute.xlu1 %2495  ;;  %v6121_v56 = vpop.permute.xlu0 %2490 }
 0x7dd   :  { %v6123_v28 = vpop.permute.xlu1 %2763  ;;  %v6125_v32 = vpop.permute.xlu0 %2758 }
 0x7de   :  { %6608 = vst [vmem:[#allocation14_spill] sm:$0xff] %v6125_v32 }
 0x7df   :  { %4333 = vmatmul.mubr.bf16.gmra.mxu0 %v4452_v62 }
 0x7e1   :  { %v6127_v54 = vpop.permute.xlu1 %2876  ;;  %v6129_v18 = vpop.permute.xlu0 %2871 }
 0x887   :  { %v6105_v57 = vpop.f32.mrf.mxu0 }
 0x889   :  { %v6107_v17 = vpop.f32.mrf.mxu0 }
 0x88b   :  { %v6111_v34 = vpop.f32.mrf.mxu0 }
 0x88d   :  { %v6115_v50 = vpop.f32.mrf.mxu0 }
 0x88f   :  { %v4326_v11 = vpop.f32.mrf.mxu0 }
 0x891   :  { %v2656_v0 = vpop.f32.mrf.mxu0 }
 0x893   :  { %v4327_v4 = vpop.f32.mrf.mxu0 }
 0x895   :  { %v2659_v12 = vpop.f32.mrf.mxu0 }
 0x897   :  { %v4330_v23 = vpop.f32.mrf.mxu0 }
 0x898   :  { %v2681_v26 = vadd.f32 %v4330_v23, %v2531_v16  ;;  %v2668_v16 = vadd.f32 %v4327_v4, %v2516_v29  ;;  %v2660_v29 = vadd.f32 %v2659_v12, %v2506_v31 }
 0x899   :  { %v2672_v1 = vpop.f32.mrf.mxu0 }
 0x89b   :  { %v4331_v5 = vpop.f32.mrf.mxu0 }
 0x89c   :  { %v2684_v30 = vadd.f32 %v4331_v5, %v2536_v47  ;;  %v2673_v47 = vadd.f32 %v2672_v1, %v2521_v46  ;;  %v2649_v1 = vadd.f32 %v6105_v57, %v6121_v56  ;;  %v6609_v56 = vld [vmem:[#allocation6_spill] sm:$0xff] }
 0x89d   :  { %v2675_v48 = vpop.f32.mrf.mxu0 }
 0x89e   :  { %v2714_v20 = vmax.f32 %v2684_v30, 0.0  ;;  %v2676_v62 = vadd.f32 %v2675_v48, %v2526_v53  ;;  %v2665_v48 = vadd.f32 %v4326_v11, %v2511_v24  ;;  %v2657_v24 = vadd.f32 %v2656_v0, %v6103_v25 }
 0x89f   :  { %v4334_v59 = vpop.f32.mrf.mxu0  ;;  %v2652_v11 = vadd.f32 %v6111_v34, %v2496_v10 }
 0x8a0   :  { %v2697_v13 = vadd.f32 %v4334_v59, %v2551_v45  ;;  %v2713_v45 = vmax.f32 %v2681_v26, 0.0  ;;  %v2827_v23 = vmul.f32 %v2794_v55, %v2714_v20  ;;  %v2707_v0 = vmax.f32 %v2657_v24, 0.0 }
 0x8a1   :  { %v2688_v51 = vpop.f32.mrf.mxu0  ;;  %v2705_v26 = vmax.f32 %v2649_v1, 0.0 }
 0x8a2   :  { %v2717_v6 = vmax.f32 %v2697_v13, 0.0  ;;  %v2689_v41 = vadd.f32 %v2688_v51, %v2541_v38  ;;  %v2486_v13 = vpop.permute.xlu1 %2485  ;;  %v2712_v51 = vmax.f32 %v2676_v62, 0.0  ;;  %v2940_v55 = vadd.f32 %v6091_v19, %v2827_v23 }
 0x8a3   :  { %v4335_v39 = vpop.f32.mrf.mxu0  ;;  %v2708_v19 = vmax.f32 %v2660_v29, 0.0  ;;  %v2644_v34 = vadd.f32 %v6115_v50, %v2486_v13 }
 0x8a4   :  { %v2715_v43 = vmax.f32 %v2689_v41, 0.0  ;;  %v2700_v35 = vadd.f32 %v4335_v39, %v2556_v3  ;;  %v2830_v36 = vmul.f32 %v2809_v37, %v2717_v6  ;;  %v2481_v37 = vpop.permute.xlu0 %2480  ;;  %v2711_v6 = vmax.f32 %v2673_v47, 0.0  ;;  %v6610_v39 = vld [vmem:[#allocation14_spill] sm:$0xff] }
 0x8a5   :  { %v2691_v7 = vpop.f32.mrf.mxu0  ;;  %v2821_v10 = vmul.f32 %v6123_v28, %v2708_v19  ;;  %v2641_v57 = vadd.f32 %v6107_v17, %v2481_v37  ;;  %v4458_v37 = vld [vmem:[%s6422_s9 + $0x28] sm:$0xff]  }
 0x8a6   :  { %v2718_v44 = vmax.f32 %v2700_v35, 0.0  ;;  %v2692_v32 = vadd.f32 %v2691_v7, %v6072_v33  ;;  %v2828_v5 = vmul.f32 %v2799_v27, %v2715_v43  ;;  %v2943_v3 = vadd.f32 %v6078_v40, %v2830_v36  ;;  %v2754_v4 = vpop.permute.xlu1 %2753 }
 0x8a7   :  { %v2826_v33 = vmul.f32 %v6089_v8, %v2713_v45  ;;  %v2825_v40 = vmul.f32 %v6095_v22, %v2712_v51  ;;  %v2820_v43 = vmul.f32 %v6610_v39, %v2707_v0  ;;  %v2704_v35 = vmax.f32 %v2644_v34, 0.0 }
 0x8a8   :  { %v2831_v38 = vmul.f32 %v6074_v21, %v2718_v44  ;;  %v2716_v59 = vmax.f32 %v2692_v32, 0.0  ;;  %v2941_v27 = vadd.f32 %v6087_v15, %v2828_v5  ;;  %v2710_v44 = vmax.f32 %v2668_v16, 0.0 }
 0x8a9   :  { %v2939_v8 = vadd.f32 %v6093_v63, %v2826_v33  ;;  %v2824_v15 = vmul.f32 %v6097_v2, %v2711_v6  ;;  %v2938_v22 = vadd.f32 %v6099_v52, %v2825_v40  ;;  %v2706_v32 = vmax.f32 %v2652_v11, 0.0  ;;  %v4460_v33 = vld [vmem:[%s6422_s9 + $0x38] sm:$0xff]   ;;  %v4461_v6 = vld [vmem:[%s6424_s11] sm:$0xff]  }
 0x8aa   :  { %v2944_v30 = vadd.f32 %v6076_v49, %v2831_v38  ;;  %v2829_v53 = vmul.f32 %v6083_v9, %v2716_v59  ;;  %v2709_v9 = vmax.f32 %v2665_v48, 0.0  ;;  %v2823_v31 = vmul.f32 %v6109_v42, %v2710_v44  ;;  %v2867_v2 = vpop.permute.xlu1 %2866  ;;  %v4459_v48 = vld [vmem:[%s6422_s9 + $0x30] sm:$0xff]   ;;  %4384 = vmatprep.mubr.bf16.mxu0 %v4461_v6 }
 0x8ab   :  { %v2966_v12 = vpack.c.bf16 %v2940_v55, %v2939_v8  ;;  %v2937_v63 = vadd.f32 %v6101_v58, %v2824_v15  ;;  %v2819_v58 = vmul.f32 %v2754_v4, %v2706_v32  ;;  %v2934_v20 = vadd.f32 %v6127_v54, %v2821_v10 }
 0x8ac   :  { %v2942_v21 = vadd.f32 %v6085_v14, %v2829_v53  ;;  %v2968_v46 = vpack.c.bf16 %v2944_v30, %v2943_v3  ;;  %v2749_v14 = vpop.permute.xlu0 %2748  ;;  %v2822_v25 = vmul.f32 %v6113_v60, %v2709_v9  ;;  %v2936_v42 = vadd.f32 %v6117_v61, %v2823_v31  ;;  %v4455_v3 = vld [vmem:[%s6422_s9 + $0x10] sm:$0xff]   ;;  %v4456_v30 = vld [vmem:[%s6422_s9 + $0x18] sm:$0xff]   ;;  %v4457_v53 = vld [vmem:[%s6422_s9 + $0x20] sm:$0xff]  }
 0x8ad   :  { %v2965_v52 = vpack.c.bf16 %v2938_v22, %v2937_v63  ;;  %v2818_v61 = vmul.f32 %v2749_v14, %v2705_v26  ;;  %v2703_v28 = vmax.f32 %v2641_v57, 0.0  ;;  %v2933_v62 = vadd.f32 %v6129_v18, %v2820_v43  ;;  %v4454_v18 = vld [vmem:[%s6422_s9 + $0x8] sm:$0xff]  }
 0x8ae   :  { %4336 = vmatprep.subr.bf16.mxu1 %v2968_v46  ;;  %v2967_v49 = vpack.c.bf16 %v2942_v21, %v2941_v27  ;;  %v2935_v60 = vadd.f32 %v6609_v56, %v2822_v25  ;;  %v2744_v7 = vpop.permute.xlu1 %2743  ;;  %v2932_v45 = vadd.f32 %v2867_v2, %v2819_v58 }
 0x8af   :  { %4337 = vmatpush3.bf16.msra.mxu1 %v2968_v46  ;;  %v2817_v17 = vmul.f32 %v2744_v7, %v2704_v35  ;;  %v2963_v47 = vpack.c.bf16 %v2934_v20, %v2933_v62 }
 0x8b0   :  { %4338 = vmatprep.subr.bf16.mxu1 %v2967_v49  ;;  %v2862_v41 = vpop.permute.xlu0 %2861  ;;  %v2964_v50 = vpack.c.bf16 %v2936_v42, %v2935_v60 }
 0x8b1   :  { %v2931_v5 = vadd.f32 %v2862_v41, %v2818_v61 }
 0x8b2   :  { %v2857_v59 = vpop.permute.xlu1 %2856 }
 0x8b3   :  { %4339 = vmatpush3.bf16.msra.mxu1 %v2967_v49  ;;  %v2930_v13 = vadd.f32 %v2857_v59, %v2817_v17  ;;  %v2962_v16 = vpack.c.bf16 %v2932_v45, %v2931_v5 }
 0x8b4   :  { %4340 = vmatprep.subr.bf16.mxu1 %v2966_v12  ;;  %v2739_v36 = vpop.permute.xlu0 %2738 }
 0x8b5   :  { %v2816_v38 = vmul.f32 %v2739_v36, %v2703_v28 }
 0x8b6   :  { %v3063_v29 = vpop.permute.xlu1 %3062 }
 0x8b7   :  { %4341 = vmatpush3.bf16.msra.mxu1 %v2966_v12 }
 0x8b8   :  { %4342 = vmatprep.subr.bf16.mxu1 %v2965_v52  ;;  %v2852_v54 = vpop.permute.xlu0 %2851 }
 0x8b9   :  { %v2929_v23 = vadd.f32 %v2852_v54, %v2816_v38 }
 0x8ba   :  { %v3053_v9 = vpop.permute.xlu1 %3052 }
 0x8bb   :  { %4343 = vmatpush3.bf16.msra.mxu1 %v2965_v52  ;;  %v2961_v51 = vpack.c.bf16 %v2930_v13, %v2929_v23 }
 0x8bc   :  { %4344 = vmatprep.subr.bf16.mxu1 %v2964_v50  ;;  %v3058_v40 = vpop.permute.xlu0 %3057 }
 0x8be   :  { %v3043_v11 = vpop.permute.xlu1 %3042 }
 0x8bf   :  { %4345 = vmatpush3.bf16.msra.mxu1 %v2964_v50 }
 0x8c0   :  { %4346 = vmatprep.subr.bf16.mxu1 %v2963_v47  ;;  %v3048_v8 = vpop.permute.xlu0 %3047 }
 0x8c2   :  { %v3033_v1 = vpop.permute.xlu1 %3032 }
 0x8c3   :  { %4347 = vmatpush3.bf16.msra.mxu1 %v2963_v47 }
 0x8c4   :  { %4348 = vmatprep.subr.bf16.mxu1 %v2962_v16  ;;  %v3038_v19 = vpop.permute.xlu0 %3037 }
 0x8c6   :  { %v3023_v57 = vpop.permute.xlu1 %3022 }
 0x8c7   :  { %4349 = vmatpush3.bf16.msra.mxu1 %v2962_v16 }
 0x8c8   :  { %4350 = vmatprep.subr.bf16.mxu1 %v2961_v51  ;;  %v3028_v63 = vpop.permute.xlu0 %3027 }
 0x8ca   :  { %v3013_v28 = vpop.permute.xlu1 %3012 }
 0x8cb   :  { %4351 = vmatpush3.bf16.msra.mxu1 %v2961_v51 }
 0x8cc   :  { %v3018_v58 = vpop.permute.xlu0 %3017 }
 0x8ce   :  { %4353 = vmatmul.mubr.bf16.vlgmr.msra.gmra.mxu1 %v4454_v18  ;;  %v3003_v16 = vpop.permute.xlu1 %3002 }
 0x8cf   :  { %4356 = vmatprep.mubr.bf16.mxu1 %v4455_v3 }
 0x8d0   :  { %v3008_v17 = vpop.permute.xlu0 %3007 }
 0x8d4   :  { %v2998_v51 = vpop.permute.xlu0 %2997 }
 0x8d6   :  { %4357 = vmatmul.mubr.bf16.gmra.mxu1 %v4456_v30 }
 0x8d7   :  { %4360 = vmatprep.mubr.bf16.mxu1 %v4457_v53 }
 0x8de   :  { %4361 = vmatmul.mubr.bf16.gmra.mxu1 %v4458_v37 }
 0x8df   :  { %4364 = vmatprep.mubr.bf16.mxu1 %v4459_v48  ;;  %v2993_v48 = vpop.permute.xlu1 %2992 }
 0x8e6   :  { %4365 = vmatmul.mubr.bf16.gmra.mxu1 %v4460_v33 }
 0x98e   :  { %v6183_v27 = vpop.f32.mrf.mxu1 }
 0x98f   :  { %v3156_v53 = vadd.f32 %v6183_v27, %v2998_v51  ;;  %v4462_v27 = vld [vmem:[%s6424_s11 + $0x8] sm:$0xff]  }
 0x990   :  { %v6185_v21 = vpop.f32.mrf.mxu1 }
 0x992   :  { %v4355_v46 = vpop.f32.mrf.mxu1 }
 0x993   :  { %v3159_v18 = vadd.f32 %v4355_v46, %v3003_v16 }
 0x994   :  { %v6187_v44 = vpop.f32.mrf.mxu1 }
 0x995   :  { %v3213_v33 = vmax.f32 %v3159_v18, 0.0  ;;  %v3151_v6 = vadd.f32 %v6187_v44, %v2993_v48  ;;  %v4463_v44 = vld [vmem:[%s6424_s11 + $0x10] sm:$0xff]  }
 0x996   :  { %v4358_v55 = vpop.f32.mrf.mxu1 }
 0x997   :  { %v3172_v47 = vadd.f32 %v4358_v55, %v3018_v58  ;;  %v2988_v55 = vpop.permute.xlu0 %2987  ;;  %v3211_v46 = vmax.f32 %v3151_v6, 0.0 }
 0x998   :  { %v3163_v49 = vpop.f32.mrf.mxu1 }
 0x999   :  { %v3216_v54 = vmax.f32 %v3172_v47, 0.0  ;;  %v3164_v23 = vadd.f32 %v3163_v49, %v3008_v17  ;;  %v3148_v49 = vadd.f32 %v6185_v21, %v2988_v55  ;;  %v4464_v21 = vld [vmem:[%s6424_s11 + $0x18] sm:$0xff]  }
 0x99a   :  { %v4359_v4 = vpop.f32.mrf.mxu1 }
 0x99b   :  { %v3175_v62 = vadd.f32 %v4359_v4, %v3023_v57  ;;  %v3214_v37 = vmax.f32 %v3164_v23, 0.0 }
 0x99c   :  { %v3166_v24 = vpop.f32.mrf.mxu1 }
 0x99d   :  { %v3217_v38 = vmax.f32 %v3175_v62, 0.0  ;;  %v3167_v59 = vadd.f32 %v3166_v24, %v3013_v28 }
 0x99e   :  { %v4362_v15 = vpop.f32.mrf.mxu1 }
 0x99f   :  { %v3188_v56 = vadd.f32 %v4362_v15, %v3038_v19  ;;  %v3245_v3 = vpack.c.bf16 %v3217_v38, %v3216_v54  ;;  %v3215_v30 = vmax.f32 %v3167_v59, 0.0  ;;  %v4466_v15 = vld [vmem:[%s6424_s11 + $0x28] sm:$0xff]   ;;  %v3274_v19 = vpop.permute.xlu1 %3273 }
 0x9a0   :  { %v3179_v14 = vpop.f32.mrf.mxu1 }
 0x9a1   :  { %v3220_v7 = vmax.f32 %v3188_v56, 0.0  ;;  %v3180_v61 = vadd.f32 %v3179_v14, %v3028_v63  ;;  %v4467_v14 = vld [vmem:[%s6424_s11 + $0x30] sm:$0xff]  }
 0x9a2   :  { %v4363_v31 = vpop.f32.mrf.mxu1 }
 0x9a3   :  { %v3191_v10 = vadd.f32 %v4363_v31, %v3043_v11  ;;  %v3218_v5 = vmax.f32 %v3180_v61, 0.0  ;;  %v4468_v11 = vld [vmem:[%s6424_s11 + $0x38] sm:$0xff]   ;;  %v3269_v31 = vpop.permute.xlu0 %3268 }
 0x9a4   :  { %v3182_v22 = vpop.f32.mrf.mxu1 }
 0x9a5   :  { %v3221_v35 = vmax.f32 %v3191_v10, 0.0  ;;  %v3183_v20 = vadd.f32 %v3182_v22, %v3033_v1 }
 0x9a6   :  { %v4366_v12 = vpop.f32.mrf.mxu1 }
 0x9a7   :  { %v3204_v0 = vadd.f32 %v4366_v12, %v3058_v40  ;;  %v3247_v36 = vpack.c.bf16 %v3221_v35, %v3220_v7  ;;  %v3219_v45 = vmax.f32 %v3183_v20, 0.0  ;;  %v3212_v40 = vmax.f32 %v3156_v53, 0.0  ;;  %v3279_v22 = vpop.permute.xlu0 %3278  ;;  %v3284_v12 = vpop.permute.xlu1 %3283 }
 0x9a8   :  { %v3195_v25 = vpop.f32.mrf.mxu1 }
 0x9a9   :  { %v3196_v32 = vadd.f32 %v3195_v25, %v3048_v8  ;;  %v3224_v52 = vmax.f32 %v3204_v0, 0.0  ;;  %v3246_v13 = vpack.c.bf16 %v3219_v45, %v3218_v5  ;;  %v3243_v4 = vpack.c.bf16 %v3213_v33, %v3212_v40  ;;  %v4465_v8 = vld [vmem:[%s6424_s11 + $0x20] sm:$0xff]  }
 0x9aa   :  { %v4367_v2 = vpop.f32.mrf.mxu1 }
 0x9ab   :  { %v3207_v34 = vadd.f32 %v4367_v2, %v3063_v29  ;;  %v3222_v60 = vmax.f32 %v3196_v32, 0.0  ;;  %v3244_v29 = vpack.c.bf16 %v3215_v30, %v3214_v37  ;;  %v3289_v1 = vpop.permute.xlu0 %3288  ;;  %v3294_v25 = vpop.permute.xlu1 %3293 }
 0x9ac   :  { %v3198_v42 = vpop.f32.mrf.mxu1 }
 0x9ad   :  { %v3225_v41 = vmax.f32 %v3207_v34, 0.0  ;;  %v3199_v26 = vadd.f32 %v3198_v42, %v3053_v9  ;;  %v3210_v9 = vmax.f32 %v3148_v49, 0.0 }
 0x9af   :  { %v3249_v39 = vpack.c.bf16 %v3225_v41, %v3224_v52  ;;  %v3223_v43 = vmax.f32 %v3199_v26, 0.0  ;;  %v3242_v24 = vpack.c.bf16 %v3211_v46, %v3210_v9  ;;  %v3299_v63 = vpop.permute.xlu0 %3298  ;;  %v3304_v32 = vpop.permute.xlu1 %3303 }
 0x9b1   :  { %v3248_v50 = vpack.c.bf16 %v3223_v43, %v3222_v60  ;;  %4368 = vmatprep.subr.bf16.mxu0 %v3249_v39 }
 0x9b2   :  { %4369 = vmatpush3.bf16.msra.mxu0 %v3249_v39 }
 0x9b3   :  { %4370 = vmatprep.subr.bf16.mxu0 %v3248_v50  ;;  %v3309_v10 = vpop.permute.xlu0 %3308  ;;  %v3314_v41 = vpop.permute.xlu1 %3313 }
 0x9b6   :  { %4371 = vmatpush3.bf16.msra.mxu0 %v3248_v50 }
 0x9b7   :  { %4372 = vmatprep.subr.bf16.mxu0 %v3247_v36  ;;  %v3319_v56 = vpop.permute.xlu0 %3318  ;;  %v3324_v39 = vpop.permute.xlu1 %3323 }
 0x9ba   :  { %4373 = vmatpush3.bf16.msra.mxu0 %v3247_v36 }
 0x9bb   :  { %4374 = vmatprep.subr.bf16.mxu0 %v3246_v13  ;;  %v3329_v35 = vpop.permute.xlu0 %3328  ;;  %v3334_v7 = vpop.permute.xlu1 %3333 }
 0x9be   :  { %4375 = vmatpush3.bf16.msra.mxu0 %v3246_v13 }
 0x9bf   :  { %4376 = vmatprep.subr.bf16.mxu0 %v3245_v3  ;;  %v3339_v51 = vpop.permute.xlu0 %3338 }
 0x9c2   :  { %4377 = vmatpush3.bf16.msra.mxu0 %v3245_v3 }
 0x9c3   :  { %4378 = vmatprep.subr.bf16.mxu0 %v3244_v29 }
 0x9c6   :  { %4379 = vmatpush3.bf16.msra.mxu0 %v3244_v29  ;;  %v3344_v29 = vpop.permute.xlu1 %3343 }
 0x9c7   :  { %4380 = vmatprep.subr.bf16.mxu0 %v3243_v4 }
 0x9ca   :  { %4381 = vmatpush3.bf16.msra.mxu0 %v3243_v4 }
 0x9cb   :  { %4382 = vmatprep.subr.bf16.mxu0 %v3242_v24 }
 0x9ce   :  { %4383 = vmatpush3.bf16.msra.mxu0 %v3242_v24 }
 0x9d1   :  { %4385 = vmatmul.mubr.bf16.vlgmr.msra.gmra.mxu0 %v4462_v27 }
 0x9d2   :  { %4388 = vmatprep.mubr.bf16.mxu0 %v4463_v44 }
 0x9d9   :  { %4389 = vmatmul.mubr.bf16.gmra.mxu0 %v4464_v21 }
 0x9da   :  { %4392 = vmatprep.mubr.bf16.mxu0 %v4465_v8 }
 0x9e1   :  { %4393 = vmatmul.mubr.bf16.gmra.mxu0 %v4466_v15 }
 0x9e2   :  { %4396 = vmatprep.mubr.bf16.mxu0 %v4467_v14 }
 0x9e9   :  { %4397 = vmatmul.mubr.bf16.gmra.mxu0 %v4468_v11 }
 0xa91   :  { %v4386_v0 = vpop.f32.mrf.mxu0 }
 0xa92   :  { %v3437_v47 = vadd.f32 %v4386_v0, %v3279_v22 }
 0xa93   :  { %v3428_v2 = vpop.f32.mrf.mxu0 }
 0xa94   :  { %v3429_v5 = vadd.f32 %v3428_v2, %v3269_v31  ;;  %v3493_v55 = vsel %vm90_vm0, %v3437_v47, -inf }
 0xa95   :  { %v4387_v34 = vpop.f32.mrf.mxu0 }
 0xa96   :  { %v3440_v61 = vadd.f32 %v4387_v34, %v3284_v12  ;;  %v3491_v40 = vsel %vm90_vm0, %v3429_v5, -inf }
 0xa97   :  { %v3431_v42 = vpop.f32.mrf.mxu0 }
 0xa98   :  { %v3432_v38 = vadd.f32 %v3431_v42, %v3274_v19  ;;  %v3494_v18 = vsel %vm90_vm0, %v3440_v61, -inf }
 0xa99   :  { %v4390_v52 = vpop.f32.mrf.mxu0 }
 0xa9a   :  { %v6215_v28 = vadd.f32 %v4390_v52, %v3299_v63  ;;  %v3492_v49 = vsel %vm90_vm0, %v3432_v38, -inf }
 0xa9b   :  { %v3444_v26 = vpop.f32.mrf.mxu0 }
 0xa9c   :  { %v3445_v62 = vadd.f32 %v3444_v26, %v3289_v1  ;;  %v3499_v3 = vsel %vm90_vm0, %v6215_v28, -inf }
 0xa9d   :  { %v4391_v57 = vpop.f32.mrf.mxu0  ;;  %v3500_v21 = vmax.f32 %v3493_v55, %v3499_v3 }
 0xa9e   :  { %v6213_v50 = vadd.f32 %v4391_v57, %v3304_v32  ;;  %v3495_v30 = vsel %vm90_vm0, %v3445_v62, -inf }
 0xa9f   :  { %v3447_v60 = vpop.f32.mrf.mxu0  ;;  %v3496_v8 = vmax.f32 %v3491_v40, %v3495_v30 }
 0xaa0   :  { %v6217_v45 = vadd.f32 %v3447_v60, %v3294_v25  ;;  %v3501_v13 = vsel %vm90_vm0, %v6213_v50, -inf }
 0xaa1   :  { %v4394_v43 = vpop.f32.mrf.mxu0  ;;  %v3502_v4 = vmax.f32 %v3494_v18, %v3501_v13 }
 0xaa2   :  { %v6223_v16 = vadd.f32 %v4394_v43, %v3319_v56  ;;  %v3497_v37 = vsel %vm90_vm0, %v6217_v45, -inf }
 0xaa3   :  { %v3460_v58 = vpop.f32.mrf.mxu0  ;;  %v3498_v15 = vmax.f32 %v3492_v49, %v3497_v37 }
 0xaa4   :  { %v6225_v54 = vadd.f32 %v3460_v58, %v3309_v10  ;;  %v3507_v9 = vsel %vm90_vm0, %v6223_v16, -inf }
 0xaa5   :  { %v4395_v20 = vpop.f32.mrf.mxu0  ;;  %v3508_v1 = vmax.f32 %v3500_v21, %v3507_v9 }
 0xaa6   :  { %v6219_v17 = vadd.f32 %v4395_v20, %v3324_v39  ;;  %v3503_v24 = vsel %vm90_vm0, %v6225_v54, -inf }
 0xaa7   :  { %v3463_v36 = vpop.f32.mrf.mxu0  ;;  %v3504_v25 = vmax.f32 %v3496_v8, %v3503_v24 }
 0xaa8   :  { %v6227_v23 = vadd.f32 %v3463_v36, %v3314_v41  ;;  %v3509_v48 = vsel %vm90_vm0, %v6219_v17, -inf }
 0xaa9   :  { %v4398_v59 = vpop.f32.mrf.mxu0  ;;  %v3510_v14 = vmax.f32 %v3502_v4, %v3509_v48 }
 0xaaa   :  { %v6237_v33 = vadd.f32 %v4398_v59, %v3339_v51  ;;  %v3505_v27 = vsel %vm90_vm0, %v6227_v23, -inf }
 0xaab   :  { %v3476_v53 = vpop.f32.mrf.mxu0  ;;  %v3506_v0 = vmax.f32 %v3498_v15, %v3505_v27 }
 0xaac   :  { %v6239_v6 = vadd.f32 %v3476_v53, %v3329_v35  ;;  %v3515_v31 = vsel %vm90_vm0, %v6237_v33, -inf }
 0xaad   :  { %v4399_v46 = vpop.f32.mrf.mxu0  ;;  %v3516_v32 = vmax.f32 %v3508_v1, %v3515_v31 }
 0xaae   :  { %v6250_v44 = vadd.f32 %v4399_v46, %v3344_v29  ;;  %v3511_v19 = vsel %vm90_vm0, %v6239_v6, -inf }
 0xaaf   :  { %v3479_v11 = vpop.f32.mrf.mxu0  ;;  %v3512_v34 = vmax.f32 %v3504_v25, %v3511_v19 }
 0xab0   :  { %v3517_v22 = vsel %vm90_vm0, %v6250_v44, -inf  ;;  %v3480_v12 = vadd.f32 %v3479_v11, %v3334_v7 }
 0xab1   :  { %v3518_v63 = vmax.f32 %v3510_v14, %v3517_v22 }
 0xab2   :  { %v3513_v2 = vsel %vm90_vm0, %v3480_v12, -inf }
 0xab3   :  { %v3514_v42 = vmax.f32 %v3506_v0, %v3513_v2  ;;  %v3520_v10 = vmax.f32 %v3516_v32, %v3518_v63 }
 0xab5   :  { %v3519_v52 = vmax.f32 %v3512_v34, %v3514_v42 }
 0xab7   :  { %v3521_v41 = vmax.f32 %v3519_v52, %v3520_v10 }
 0xab9   :  { %v3522_v26 = vrot.slane %v3521_v41, 4 }
 0xabb   :  { %v3523_v57 = vmax.f32 %v3521_v41, %v3522_v26 }
 0xabd   :  { %v3524_v56 = vrot.slane %v3523_v57, 2 }
 0xabf   :  { %v3525_v60 = vmax.f32 %v3523_v57, %v3524_v56 }
 0xac1   :  { %v3526_v39 = vrot.slane %v3525_v60, 1 }
 0xac3   :  { %v3527_v43 = vmax.f32 %v3525_v60, %v3526_v39 }
 0xac5   :  { %v6259_v58 = vsub.f32 %v3429_v5, %v3527_v43  ;;  %v6261_v35 = vsub.f32 %v3432_v38, %v3527_v43  ;;  %v6263_v20 = vsub.f32 %v3437_v47, %v3527_v43  ;;  %v6265_v7 = vsub.f32 %v3440_v61, %v3527_v43 }
 0xac6   :  { %v6267_v36 = vsub.f32 %v3445_v62, %v3527_v43  ;;  %v6273_v18 = vsub.f32 %v6217_v45, %v3527_v43  ;;  %v6277_v38 = vsub.f32 %v6215_v28, %v3527_v43  ;;  %v6281_v62 = vsub.f32 %v6213_v50, %v3527_v43 }
 0xac7   :  { %v3544_v59 = vmul.f32 1.442695, %v6259_v58  ;;  %v3546_v13 = vmul.f32 1.442695, %v6261_v35  ;;  %v3548_v51 = vmul.f32 1.442695, %v6263_v20  ;;  %v6285_v3 = vsub.f32 %v6225_v54, %v3527_v43 }
 0xac8   :  { %v3550_v5 = vmul.f32 1.442695, %v6265_v7  ;;  %v3552_v61 = vmul.f32 1.442695, %v6267_v36  ;;  %v3554_v47 = vmul.f32 1.442695, %v6273_v18  ;;  %v6289_v30 = vsub.f32 %v6227_v23, %v3527_v43 }
 0xac9   :  { %4469 = vpow2.f32 %v3544_v59  ;;  %v3556_v45 = vmul.f32 1.442695, %v6277_v38  ;;  %v3558_v28 = vmul.f32 1.442695, %v6281_v62  ;;  %v6293_v53 = vsub.f32 %v6223_v16, %v3527_v43 }
 0xaca   :  { %4471 = vpow2.f32 %v3546_v13  ;;  %v3560_v50 = vmul.f32 1.442695, %v6285_v3  ;;  %v6297_v37 = vsub.f32 %v6219_v17, %v3527_v43  ;;  %v3562_v54 = vmul.f32 1.442695, %v6289_v30 }
 0xacb   :  { %4473 = vpow2.f32 %v3548_v51  ;;  %v6301_v29 = vsub.f32 %v6239_v6, %v3527_v43  ;;  %v3564_v23 = vmul.f32 1.442695, %v6293_v53  ;;  %v6305_v49 = vsub.f32 %v3480_v12, %v3527_v43 }
 0xacc   :  { %4475 = vpow2.f32 %v3550_v5  ;;  %v3566_v17 = vmul.f32 1.442695, %v6297_v37  ;;  %v6310_v24 = vsub.f32 %v6237_v33, %v3527_v43  ;;  %v6315_v15 = vsub.f32 %v6250_v44, %v3527_v43 }
 0xacd   :  { %4477 = vpow2.f32 %v3552_v61  ;;  %v3568_v6 = vmul.f32 1.442695, %v6301_v29  ;;  %v3570_v14 = vmul.f32 1.442695, %v6305_v49 }
 0xace   :  { %4479 = vpow2.f32 %v3554_v47  ;;  %v3572_v33 = vmul.f32 1.442695, %v6310_v24  ;;  %v3574_v25 = vmul.f32 1.442695, %v6315_v15 }
 0xacf   :  { %4481 = vpow2.f32 %v3556_v45 }
 0xad0   :  { %4483 = vpow2.f32 %v3558_v28 }
 0xad1   :  { %4485 = vpow2.f32 %v3560_v50 }
 0xad2   :  { %4487 = vpow2.f32 %v3562_v54 }
 0xad3   :  { %4489 = vpow2.f32 %v3564_v23 }
 0xad4   :  { %4491 = vpow2.f32 %v3566_v17 }
 0xad5   :  { %4493 = vpow2.f32 %v3568_v6 }
 0xad6   :  { %v4470_v48 = vpop.eup %4469  ;;  %4495 = vpow2.f32 %v3570_v14 }
 0xad7   :  { %v4472_v55 = vpop.eup %4471  ;;  %v3576_v16 = vsel %vm90_vm0, %v4470_v48, 0.0  ;;  %4497 = vpow2.f32 %v3572_v33 }
 0xad8   :  { %v4474_v40 = vpop.eup %4473  ;;  %v3577_v4 = vsel %vm90_vm0, %v4472_v55, 0.0  ;;  %4499 = vpow2.f32 %v3574_v25 }
 0xad9   :  { %v4476_v46 = vpop.eup %4475  ;;  %v3578_v9 = vadd.f32 %v3577_v4, %v3576_v16  ;;  %v3579_v27 = vsel %vm90_vm0, %v4474_v40, 0.0 }
 0xada   :  { %v4478_v21 = vpop.eup %4477  ;;  %v3581_v11 = vsel %vm90_vm0, %v4476_v46, 0.0 }
 0xadb   :  { %v3580_v8 = vadd.f32 %v3579_v27, %v3578_v9  ;;  %v4480_v31 = vpop.eup %4479  ;;  %v3583_v22 = vsel %vm90_vm0, %v4478_v21, 0.0 }
 0xadc   :  { %v4482_v12 = vpop.eup %4481  ;;  %v3585_v44 = vsel %vm90_vm0, %v4480_v31, 0.0 }
 0xadd   :  { %v3582_v19 = vadd.f32 %v3581_v11, %v3580_v8  ;;  %v4484_v0 = vpop.eup %4483  ;;  %v3587_v2 = vsel %vm90_vm0, %v4482_v12, 0.0 }
 0xade   :  { %v4486_v32 = vpop.eup %4485  ;;  %v3589_v42 = vsel %vm90_vm0, %v4484_v0, 0.0 }
 0xadf   :  { %v3584_v1 = vadd.f32 %v3583_v22, %v3582_v19  ;;  %v4488_v10 = vpop.eup %4487  ;;  %v3591_v41 = vsel %vm90_vm0, %v4486_v32, 0.0 }
 0xae0   :  { %v4490_v26 = vpop.eup %4489  ;;  %v3593_v56 = vsel %vm90_vm0, %v4488_v10, 0.0 }
 0xae1   :  { %v3586_v63 = vadd.f32 %v3585_v44, %v3584_v1  ;;  %v4492_v60 = vpop.eup %4491  ;;  %v3595_v43 = vsel %vm90_vm0, %v4490_v26, 0.0 }
 0xae2   :  { %v4494_v59 = vpop.eup %4493  ;;  %v3597_v51 = vsel %vm90_vm0, %v4492_v60, 0.0 }
 0xae3   :  { %v3588_v34 = vadd.f32 %v3587_v2, %v3586_v63  ;;  %v4496_v5 = vpop.eup %4495  ;;  %v3599_v47 = vsel %vm90_vm0, %v4494_v59, 0.0 }
 0xae4   :  { %v4498_v45 = vpop.eup %4497  ;;  %v3601_v50 = vsel %vm90_vm0, %v4496_v5, 0.0 }
 0xae5   :  { %v3590_v52 = vadd.f32 %v3589_v42, %v3588_v34  ;;  %v4500_v54 = vpop.eup %4499  ;;  %v3603_v23 = vsel %vm90_vm0, %v4498_v45, 0.0 }
 0xae6   :  { %v3605_v16 = vsel %vm90_vm0, %v4500_v54, 0.0 }
 0xae7   :  { %v3592_v57 = vadd.f32 %v3591_v41, %v3590_v52 }
 0xae9   :  { %v3594_v39 = vadd.f32 %v3593_v56, %v3592_v57 }
 0xaeb   :  { %v3596_v13 = vadd.f32 %v3595_v43, %v3594_v39 }
 0xaed   :  { %v3598_v61 = vadd.f32 %v3597_v51, %v3596_v13 }
 0xaef   :  { %v3600_v28 = vadd.f32 %v3599_v47, %v3598_v61 }
 0xaf1   :  { %v3602_v48 = vadd.f32 %v3601_v50, %v3600_v28 }
 0xaf3   :  { %v3604_v55 = vadd.f32 %v3603_v23, %v3602_v48 }
 0xaf5   :  { %v3606_v40 = vadd.f32 %v3605_v16, %v3604_v55 }
 0xaf7   :  { %v3607_v17 = vrot.slane %v3606_v40, 4 }
 0xaf9   :  { %v3608_v4 = vadd.f32 %v3607_v17, %v3606_v40 }
 0xafb   :  { %v3609_v46 = vrot.slane %v3608_v4, 2 }
 0xafd   :  { %v3610_v9 = vadd.f32 %v3609_v46, %v3608_v4 }
 0xaff   :  { %v3611_v6 = vrot.slane %v3610_v9, 1 }
 0xb01   :  { %v3612_v27 = vadd.f32 %v3611_v6, %v3610_v9 }
 0xb03   :  { %4501 = vlog2.f32 %v3612_v27 }
 0xb10   :  { %v4502_v21 = vpop.eup %4501 }
 0xb11   :  { %v3614_v8 = vmul.f32 0.6931472, %v4502_v21 }
 0xb13   :  { %v3615_v14 = vsub.f32 %v6259_v58, %v3614_v8  ;;  %v3616_v11 = vsub.f32 %v6261_v35, %v3614_v8  ;;  %v3617_v31 = vsub.f32 %v6263_v20, %v3614_v8  ;;  %v3618_v19 = vsub.f32 %v6265_v7, %v3614_v8 }
 0xb14   :  { %v3619_v33 = vsub.f32 %v6267_v36, %v3614_v8  ;;  %v3620_v22 = vsub.f32 %v6273_v18, %v3614_v8  ;;  %v3621_v12 = vsub.f32 %v6277_v38, %v3614_v8  ;;  %v3622_v1 = vsub.f32 %v6281_v62, %v3614_v8 }
 0xb15   :  { %v3623_v25 = vsub.f32 %v6285_v3, %v3614_v8  ;;  %v3624_v44 = vsub.f32 %v6289_v30, %v3614_v8  ;;  %v3625_v58 = vsub.f32 %v6293_v53, %v3614_v8  ;;  %v3626_v35 = vsub.f32 %v6297_v37, %v3614_v8  ;;  %3631 = vst.msk [vmem:[%s6426_s13] sm:$0xff] %vm90_vm0, %v3615_v14 }
 0xb16   :  { %3632 = vst.msk [vmem:[%s6426_s13 + $0x8] sm:$0xff] %vm90_vm0, %v3616_v11  ;;  %3633 = vst.msk [vmem:[%s6426_s13 + $0x10] sm:$0xff] %vm90_vm0, %v3617_v31  ;;  %v3627_v20 = vsub.f32 %v6301_v29, %v3614_v8  ;;  %v3628_v7 = vsub.f32 %v6305_v49, %v3614_v8  ;;  %v3629_v36 = vsub.f32 %v6310_v24, %v3614_v8 }
 0xb17   :  { %3634 = vst.msk [vmem:[%s6426_s13 + $0x18] sm:$0xff] %vm90_vm0, %v3618_v19  ;;  %v3630_v18 = vsub.f32 %v6315_v15, %v3614_v8  ;;  %3635 = vst.msk [vmem:[%s6426_s13 + $0x20] sm:$0xff] %vm90_vm0, %v3619_v33 }
 0xb18   :  { %3636 = vst.msk [vmem:[%s6426_s13 + $0x28] sm:$0xff] %vm90_vm0, %v3620_v22  ;;  %3637 = vst.msk [vmem:[%s6426_s13 + $0x30] sm:$0xff] %vm90_vm0, %v3621_v12 }
 0xb19   :  { %3638 = vst.msk [vmem:[%s6426_s13 + $0x38] sm:$0xff] %vm90_vm0, %v3622_v1  ;;  %3639 = vst.msk [vmem:[%s6426_s13 + $0x40] sm:$0xff] %vm90_vm0, %v3623_v25 }
 0xb1a   :  { %3640 = vst.msk [vmem:[%s6426_s13 + $0x48] sm:$0xff] %vm90_vm0, %v3624_v44  ;;  %3641 = vst.msk [vmem:[%s6426_s13 + $0x50] sm:$0xff] %vm90_vm0, %v3625_v58 }
 0xb1b   :  { %3642 = vst.msk [vmem:[%s6426_s13 + $0x58] sm:$0xff] %vm90_vm0, %v3626_v35  ;;  %3643 = vst.msk [vmem:[%s6426_s13 + $0x60] sm:$0xff] %vm90_vm0, %v3627_v20 }
 0xb1c   :  { %3644 = vst.msk [vmem:[%s6426_s13 + $0x68] sm:$0xff] %vm90_vm0, %v3628_v7  ;;  %3645 = vst.msk [vmem:[%s6426_s13 + $0x70] sm:$0xff] %vm90_vm0, %v3629_v36 }
 0xb1d   :  { %3646 = vst.msk [vmem:[%s6426_s13 + $0x78] sm:$0xff] %vm90_vm0, %v3630_v18 }
 0xb1e   :  { %3651 = vsyncpa [#allocation3], 1 }

</bundles_post_ra>
